<compile_context>
chip_gen: v7x
topology: tpu7x:2x2x1
jax: 0.10.0
libtpu: 0.0.40
codegen_flags: <defaults>
</compile_context>

<pallas_src>
import math

import jax
import jax.numpy as jnp
from jax.experimental import pallas as pl
from jax.experimental.pallas import tpu as pltpu

# ---------------------------------------------------------------------------
# Model dimensions (len_X_h chosen small & consistent with the module).
# ---------------------------------------------------------------------------
LEN_X_H = 32                    # input feature dim (len_X_h in the reference)
H1, H2, H3, H4 = 160, 320, 80, 1
FC4_PAD = 128                   # fc4 output padded to a full lane group


def _round_up(n, m):
    return ((n + m - 1) // m) * m


def _choose_tile_b(batch):
    """Batch-tile heuristic (see header): one tile for small batches,
    1024-row tiles (>= 2 grid steps) for large ones."""
    if batch <= 1024:
        return _round_up(max(batch, 8), 128)
    return 1024


# ---------------------------------------------------------------------------
# Pallas kernel: fused 4-layer MLP for one batch tile.
# ---------------------------------------------------------------------------
def sae_kernel(x_ref, w1_ref, b1_ref, w2_ref, b2_ref, w3_ref, b3_ref,
               w4p_ref, b4_ref, o_ref):
    # fc1 / fc2 / fc3: bf16 operands, f32 accumulation on the MXU.
    x = x_ref[...].astype(jnp.bfloat16)
    h = jnp.dot(x, w1_ref[...], preferred_element_type=jnp.float32) + b1_ref[...]
    h = jnp.maximum(h, 0.0)                                    # ReLU(fc1)
    # fcd: Dropout(p=0.1) is identity at inference.
    # TODO(synk): training-mode dropout (pltpu.prng_random_bits mask) not implemented.
    h = jnp.dot(h.astype(jnp.bfloat16), w2_ref[...],
                preferred_element_type=jnp.float32) + b2_ref[...]
    h = jnp.maximum(h, 0.0)                                    # ReLU(fc2)
    h = jnp.dot(h.astype(jnp.bfloat16), w3_ref[...],
                preferred_element_type=jnp.float32) + b3_ref[...]
    h = jnp.maximum(h, 0.0)                                    # ReLU(fc3)
    # fc4 kept in f32.  w4 is zero-padded to (80, 128) so the matmul emits a
    # full-width aligned (TILE_B, 128) tile; its XLU transpose plus a row-0
    # slice gives a lane-dense (1, TILE_B) result row for the store.
    y = jnp.dot(h, w4p_ref[...], preferred_element_type=jnp.float32)   # (TILE_B, 128)
    o_ref[...] = jnp.transpose(y)[0:1, :] + b4_ref[...]                 # (1, TILE_B)


def sae_forward(x, params):
    """x: (B, LEN_X_H) float32; params: dict of (in,out) weights, (1,out) biases."""
    B, feat = x.shape
    assert feat == LEN_X_H
    tile_b = _choose_tile_b(B)
    n_tiles = pl.cdiv(B, tile_b)
    b_pad = n_tiles * tile_b
    if b_pad != B:                                  # pad batch to tile multiple
        x = jnp.pad(x, ((0, b_pad - B), (0, 0)))

    # bf16 matmul operands for fc1..fc3; fc4 stays f32 and is zero-padded to
    # 128 output columns (column 0 holds the real weights).
    w1 = params["w1"].astype(jnp.bfloat16)
    w2 = params["w2"].astype(jnp.bfloat16)
    w3 = params["w3"].astype(jnp.bfloat16)
    w4p = jnp.pad(params["w4"], ((0, 0), (0, FC4_PAD - H4)))     # (H3, 128) f32
    b1, b2, b3, b4 = params["b1"], params["b2"], params["b3"], params["b4"]

    weight_ops = (w1, b1, w2, b2, w3, b3, w4p, b4)
    # Constant index_maps -> parameters are DMA'd once and stay VMEM-resident.
    in_specs = [pl.BlockSpec((tile_b, LEN_X_H), lambda i: (i, 0))]       # x tile
    in_specs += [pl.BlockSpec(op.shape, lambda i: (0, 0)) for op in weight_ops]

    out = pl.pallas_call(
        sae_kernel,
        out_shape=jax.ShapeDtypeStruct((n_tiles, tile_b), jnp.float32),
        grid=(n_tiles,),
        in_specs=in_specs,
        out_specs=pl.BlockSpec((1, tile_b), lambda i: (i, 0)),   # lane-dense row
        compiler_params=pltpu.CompilerParams(
            dimension_semantics=("parallel",)),    # shard batch tiles across TCs (v7x)
    )(x, *weight_ops)

    return out.reshape(b_pad, 1)[:B]               # back to (B, 1)


# ---------------------------------------------------------------------------
# Deterministic parameter init (mimics nn.Linear default: U(-1/sqrt(in), 1/sqrt(in))).
# Weights are stored as (in, out) = transpose of PyTorch's (out, in).
# ---------------------------------------------------------------------------
def init_params(key):
    dims = [(LEN_X_H, H1), (H1, H2), (H2, H3), (H3, H4)]
    params = {}
    for i, (din, dout) in enumerate(dims, start=1):
        key, kw, kb = jax.random.split(key, 3)
        bound = 1.0 / math.sqrt(din)
        params[f"w{i}"] = jax.random.uniform(
            kw, (din, dout), jnp.float32, minval=-bound, maxval=bound)
        params[f"b{i}"] = jax.random.uniform(
            kb, (1, dout), jnp.float32, minval=-bound, maxval=bound)
    return params


def sae_reference(x, params):
    """Plain-JAX f32 reference for correctness checking."""
    h = jax.nn.relu(x @ params["w1"] + params["b1"])
    h = jax.nn.relu(h @ params["w2"] + params["b2"])
    h = jax.nn.relu(h @ params["w3"] + params["b3"])
    return h @ params["w4"] + params["b4"]


if __name__ == "__main__":
    key = jax.random.PRNGKey(0)
    key, kx = jax.random.split(key)
    params = init_params(key)

    x = jax.random.normal(kx, (2048, LEN_X_H), jnp.float32)
    ref = sae_reference(x, params)

    # Single-tile path: B=512 -> one 512-row tile (amortizes per-step overhead).
    out = jax.block_until_ready(sae_forward(x[:512], params))
    assert out.shape == (512, 1), out.shape
    assert jnp.allclose(out, ref[:512], atol=2e-2, rtol=2e-2), "mismatch (B=512)"

    # Multi-tile path: B=2048 -> 2 x 1024-row tiles on the "parallel" batch axis
    # (both v7x TensorCores get work; harmless on v5e/v6e).
    out_full = jax.block_until_ready(sae_forward(x, params))
    assert jnp.allclose(out_full, ref, atol=2e-2, rtol=2e-2), "mismatch (B=2048)"

    # Ragged small batch (padded internally to one 128-row tile).
    out_small = jax.block_until_ready(sae_forward(x[:8], params))
    assert jnp.allclose(out_small, ref[:8], atol=2e-2, rtol=2e-2), "mismatch (B=8)"

    print("KERNEL_OK")
</pallas_src>

<mosaic_0001>
module attributes {stable_mosaic.version = 11 : i64} {
  func.func @sae_kernel(%arg0: i32, %arg1: memref<512x32xf32, #tpu.memory_space<vmem>>, %arg2: memref<32x160xbf16, #tpu.memory_space<vmem>>, %arg3: memref<1x160xf32, #tpu.memory_space<vmem>>, %arg4: memref<160x320xbf16, #tpu.memory_space<vmem>>, %arg5: memref<1x320xf32, #tpu.memory_space<vmem>>, %arg6: memref<320x80xbf16, #tpu.memory_space<vmem>>, %arg7: memref<1x80xf32, #tpu.memory_space<vmem>>, %arg8: memref<80x128xf32, #tpu.memory_space<vmem>>, %arg9: memref<1x1xf32, #tpu.memory_space<vmem>>, %arg10: memref<1x512xf32, #tpu.memory_space<vmem>>) attributes {dimension_semantics = [#tpu.dimension_semantics<parallel>], iteration_bounds = array<i64: 1>, scalar_prefetch = 0 : i64, scratch_operands = 0 : i64, tpu.core_type = #tpu.core_type<tc>, window_params = [{transform_indices = @transform_0, window_bounds = array<i64: 512, 32>}, {pipeline_mode = #tpu.pipeline_mode<synchronous>, transform_indices = @transform_1, window_bounds = array<i64: 32, 160>}, {pipeline_mode = #tpu.pipeline_mode<synchronous>, transform_indices = @transform_2, window_bounds = array<i64: 1, 160>}, {pipeline_mode = #tpu.pipeline_mode<synchronous>, transform_indices = @transform_3, window_bounds = array<i64: 160, 320>}, {pipeline_mode = #tpu.pipeline_mode<synchronous>, transform_indices = @transform_4, window_bounds = array<i64: 1, 320>}, {pipeline_mode = #tpu.pipeline_mode<synchronous>, transform_indices = @transform_5, window_bounds = array<i64: 320, 80>}, {pipeline_mode = #tpu.pipeline_mode<synchronous>, transform_indices = @transform_6, window_bounds = array<i64: 1, 80>}, {pipeline_mode = #tpu.pipeline_mode<synchronous>, transform_indices = @transform_7, window_bounds = array<i64: 80, 128>}, {pipeline_mode = #tpu.pipeline_mode<synchronous>, transform_indices = @transform_8, window_bounds = array<i64: 1, 1>}, {transform_indices = @transform_9, window_bounds = array<i64: 1, 512>}]} {
    %c0 = arith.constant 0 : index
    %c0_0 = arith.constant 0 : index
    %0 = vector.load %arg1[%c0, %c0_0] : memref<512x32xf32, #tpu.memory_space<vmem>>, vector<512x32xf32>
    %1 = arith.truncf %0 : vector<512x32xf32> to vector<512x32xbf16>
    %c0_1 = arith.constant 0 : index
    %c0_2 = arith.constant 0 : index
    %2 = vector.load %arg2[%c0_1, %c0_2] : memref<32x160xbf16, #tpu.memory_space<vmem>>, vector<32x160xbf16>
    %cst = arith.constant dense<0.000000e+00> : vector<512x160xf32>
    %3 = tpu.matmul %1, %2, %cst {dimension_numbers = #tpu.dot_dimension_numbers<[1], [0], [0], [1], [0, 0, 1, 1], [], []>} : vector<512x32xbf16>, vector<32x160xbf16>, vector<512x160xf32> -> vector<512x160xf32>
    %c0_3 = arith.constant 0 : index
    %c0_4 = arith.constant 0 : index
    %4 = vector.load %arg3[%c0_3, %c0_4] : memref<1x160xf32, #tpu.memory_space<vmem>>, vector<1x160xf32>
    %5 = vector.broadcast %4 : vector<1x160xf32> to vector<512x160xf32>
    %6 = arith.addf %3, %5 : vector<512x160xf32>
    %cst_5 = arith.constant 0.000000e+00 : f32
    %7 = vector.broadcast %cst_5 : f32 to vector<512x160xf32>
    %8 = arith.maximumf %6, %7 : vector<512x160xf32>
    %9 = arith.truncf %8 : vector<512x160xf32> to vector<512x160xbf16>
    %c0_6 = arith.constant 0 : index
    %c0_7 = arith.constant 0 : index
    %10 = vector.load %arg4[%c0_6, %c0_7] : memref<160x320xbf16, #tpu.memory_space<vmem>>, vector<160x320xbf16>
    %cst_8 = arith.constant dense<0.000000e+00> : vector<512x320xf32>
    %11 = tpu.matmul %9, %10, %cst_8 {dimension_numbers = #tpu.dot_dimension_numbers<[1], [0], [0], [1], [0, 0, 1, 1], [], []>} : vector<512x160xbf16>, vector<160x320xbf16>, vector<512x320xf32> -> vector<512x320xf32>
    %c0_9 = arith.constant 0 : index
    %c0_10 = arith.constant 0 : index
    %12 = vector.load %arg5[%c0_9, %c0_10] : memref<1x320xf32, #tpu.memory_space<vmem>>, vector<1x320xf32>
    %13 = vector.broadcast %12 : vector<1x320xf32> to vector<512x320xf32>
    %14 = arith.addf %11, %13 : vector<512x320xf32>
    %cst_11 = arith.constant 0.000000e+00 : f32
    %15 = vector.broadcast %cst_11 : f32 to vector<512x320xf32>
    %16 = arith.maximumf %14, %15 : vector<512x320xf32>
    %17 = arith.truncf %16 : vector<512x320xf32> to vector<512x320xbf16>
    %c0_12 = arith.constant 0 : index
    %c0_13 = arith.constant 0 : index
    %18 = vector.load %arg6[%c0_12, %c0_13] : memref<320x80xbf16, #tpu.memory_space<vmem>>, vector<320x80xbf16>
    %cst_14 = arith.constant dense<0.000000e+00> : vector<512x80xf32>
    %19 = tpu.matmul %17, %18, %cst_14 {dimension_numbers = #tpu.dot_dimension_numbers<[1], [0], [0], [1], [0, 0, 1, 1], [], []>} : vector<512x320xbf16>, vector<320x80xbf16>, vector<512x80xf32> -> vector<512x80xf32>
    %c0_15 = arith.constant 0 : index
    %c0_16 = arith.constant 0 : index
    %20 = vector.load %arg7[%c0_15, %c0_16] : memref<1x80xf32, #tpu.memory_space<vmem>>, vector<1x80xf32>
    %21 = vector.broadcast %20 : vector<1x80xf32> to vector<512x80xf32>
    %22 = arith.addf %19, %21 : vector<512x80xf32>
    %cst_17 = arith.constant 0.000000e+00 : f32
    %23 = vector.broadcast %cst_17 : f32 to vector<512x80xf32>
    %24 = arith.maximumf %22, %23 : vector<512x80xf32>
    %c0_18 = arith.constant 0 : index
    %c0_19 = arith.constant 0 : index
    %25 = vector.load %arg8[%c0_18, %c0_19] : memref<80x128xf32, #tpu.memory_space<vmem>>, vector<80x128xf32>
    %cst_20 = arith.constant dense<0.000000e+00> : vector<512x128xf32>
    %26 = tpu.matmul %24, %25, %cst_20 {dimension_numbers = #tpu.dot_dimension_numbers<[1], [0], [0], [1], [0, 0, 1, 1], [], []>} : vector<512x80xf32>, vector<80x128xf32>, vector<512x128xf32> -> vector<512x128xf32>
    %27 = tpu.transpose %26, [1, 0] : vector<512x128xf32> -> vector<128x512xf32>
    %28 = vector.extract_strided_slice %27 {offsets = [0, 0], sizes = [1, 512], strides = [1, 1]} : vector<128x512xf32> to vector<1x512xf32>
    %c0_21 = arith.constant 0 : index
    %c0_22 = arith.constant 0 : index
    %29 = vector.load %arg9[%c0_21, %c0_22] : memref<1x1xf32, #tpu.memory_space<vmem>>, vector<1x1xf32>
    %30 = vector.broadcast %29 : vector<1x1xf32> to vector<1x512xf32>
    %31 = arith.addf %28, %30 : vector<1x512xf32>
    %c0_23 = arith.constant 0 : index
    %c0_24 = arith.constant 0 : index
    %32 = vector.load %arg10[%c0_23, %c0_24] : memref<1x512xf32, #tpu.memory_space<vmem>>, vector<1x512xf32>
    tpu.vector_store %arg10[%c0_23, %c0_24], %31 {strides = array<i32>} : memref<1x512xf32, #tpu.memory_space<vmem>>, vector<1x512xf32>,
    return
  }
  func.func @transform_0(%arg0: i32) -> (i32, i32) {
    %c0_i32 = arith.constant 0 : i32
    %c0_i32_0 = arith.constant 0 : i32
    return %arg0, %c0_i32 : i32, i32
  }
  func.func @transform_1(%arg0: i32) -> (i32, i32) {
    %c0_i32 = arith.constant 0 : i32
    %c0_i32_0 = arith.constant 0 : i32
    %c0_i32_1 = arith.constant 0 : i32
    return %c0_i32, %c0_i32_0 : i32, i32
  }
  func.func @transform_2(%arg0: i32) -> (i32, i32) {
    %c0_i32 = arith.constant 0 : i32
    %c0_i32_0 = arith.constant 0 : i32
    %c0_i32_1 = arith.constant 0 : i32
    return %c0_i32, %c0_i32_0 : i32, i32
  }
  func.func @transform_3(%arg0: i32) -> (i32, i32) {
    %c0_i32 = arith.constant 0 : i32
    %c0_i32_0 = arith.constant 0 : i32
    %c0_i32_1 = arith.constant 0 : i32
    return %c0_i32, %c0_i32_0 : i32, i32
  }
  func.func @transform_4(%arg0: i32) -> (i32, i32) {
    %c0_i32 = arith.constant 0 : i32
    %c0_i32_0 = arith.constant 0 : i32
    %c0_i32_1 = arith.constant 0 : i32
    return %c0_i32, %c0_i32_0 : i32, i32
  }
  func.func @transform_5(%arg0: i32) -> (i32, i32) {
    %c0_i32 = arith.constant 0 : i32
    %c0_i32_0 = arith.constant 0 : i32
    %c0_i32_1 = arith.constant 0 : i32
    return %c0_i32, %c0_i32_0 : i32, i32
  }
  func.func @transform_6(%arg0: i32) -> (i32, i32) {
    %c0_i32 = arith.constant 0 : i32
    %c0_i32_0 = arith.constant 0 : i32
    %c0_i32_1 = arith.constant 0 : i32
    return %c0_i32, %c0_i32_0 : i32, i32
  }
  func.func @transform_7(%arg0: i32) -> (i32, i32) {
    %c0_i32 = arith.constant 0 : i32
    %c0_i32_0 = arith.constant 0 : i32
    %c0_i32_1 = arith.constant 0 : i32
    return %c0_i32, %c0_i32_0 : i32, i32
  }
  func.func @transform_8(%arg0: i32) -> (i32, i32) {
    %c0_i32 = arith.constant 0 : i32
    %c0_i32_0 = arith.constant 0 : i32
    %c0_i32_1 = arith.constant 0 : i32
    return %c0_i32, %c0_i32_0 : i32, i32
  }
  func.func @transform_9(%arg0: i32) -> (i32, i32) {
    %c0_i32 = arith.constant 0 : i32
    %c0_i32_0 = arith.constant 0 : i32
    return %arg0, %c0_i32 : i32, i32
  }
}

</mosaic_0001>

<bundles_post_ra>
// kernel: tpu_custom_call.1
= control target key start
LH: loop header
LB: loop body
LE: loop exit
PB: predicated region body
PF: predicated region fallthrough
CT: control target
= control target key end

     0   :  { %s6054_s0 = inlined_call_operand.vmem [shape: f32[512,32], index: 0, kind: input, shape index: {}]   ;;  %s6055_s1 = inlined_call_operand.vmem [shape: bf16[32,160], index: 1, kind: input, shape index: {}]   ;;  %s6056_s2 = inlined_call_operand.vmem [shape: f32[1,160], index: 2, kind: input, shape index: {}]   ;;  %s6057_s3 = inlined_call_operand.vmem [shape: bf16[160,320], index: 3, kind: input, shape index: {}]   ;;  %s6058_s4 = inlined_call_operand.vmem [shape: f32[1,320], index: 4, kind: input, shape index: {}]   ;;  %s6059_s5 = inlined_call_operand.vmem [shape: bf16[320,80], index: 5, kind: input, shape index: {}]   ;;  %s6060_s6 = inlined_call_operand.vmem [shape: f32[1,80], index: 6, kind: input, shape index: {}]   ;;  %s6061_s7 = inlined_call_operand.vmem [shape: f32[80,128], index: 7, kind: input, shape index: {}]   ;;  %s6062_s8 = inlined_call_operand.<no memory space> [shape: f32[1,1], index: 8, kind: input, shape index: {}]   ;;  %s6063_s9 = inlined_call_operand.hbm [shape: f32[1,512], index: 9, kind: output, shape index: {}]  }
   0x1   :  { %v14_v0 = vstv %s6062_s8 }
   0x2   :  { %15 = vst [vmem:[#allocation2] sm:$0x1] %v14_v0 }
   0x3   :  { %v4339_v1 = vld [vmem:[%s6055_s1 + $0x4] ss:$8 sps:$4 sm:$0xff]   ;;  %v4341_v2 = vld [vmem:[%s6055_s1] ss:$8 sps:$4 sm:$0xff]   ;;  %v4429_v3 = vmov 0   ;;  %vm168_vm0 = vcmask 261120  }
   0x4   :  { %297 = vmatprep.mubr.bf16.mxu0 %v4429_v3  ;;  %4337 = vset.pattern.permute.xlu1 %v4429_v3  ;;  %v4342_v4 = vld [vmem:[%s6055_s1 + $0x14] ss:$8 sps:$4 sm:$0xff]   ;;  %v4344_v5 = vld [vmem:[%s6055_s1 + $0x10] ss:$8 sps:$4 sm:$0xff]   ;;  %v36_v6 = vld [vmem:[%s6054_s0] sm:$0xff] }
   0x5   :  { %265 = vmatprep.subr.bf16.mxu0 %v4339_v1  ;;  %v37_v7 = vld [vmem:[%s6054_s0 + $0x8] sm:$0xff]  ;;  %v38_v10 = vld [vmem:[%s6054_s0 + $0x10] sm:$0xff]  ;;  %v39_v11 = vld [vmem:[%s6054_s0 + $0x18] sm:$0xff] }
   0x6   :  { %266 = vmatpush1.bf16.msra.mxu0 %v4341_v2  ;;  %v100_v8 = vpack.c.bf16 %v37_v7, %v36_v6  ;;  %v4345_v9 = vld [vmem:[%s6057_s3 + $0x8] ss:$12 sps:$4 sm:$0xff]   ;;  %v4346_v12 = vld [vmem:[%s6057_s3 + $0x20] ss:$12 sps:$4 sm:$0xff]   ;;  %v101_v13 = vpack.c.bf16 %v39_v11, %v38_v10  ;;  %v4347_v14 = vld [vmem:[%s6057_s3 + $0x38] ss:$12 sps:$4 sm:$0xff]  }
   0x7   :  { %267 = vmatprep.subr.bf16.mxu0 %v4342_v4  ;;  %v40_v15 = vld [vmem:[%s6054_s0 + $0x20] sm:$0xff]  ;;  %v41_v16 = vld [vmem:[%s6054_s0 + $0x28] sm:$0xff]  ;;  %v4348_v17 = vld [vmem:[%s6057_s3 + $0x50] ss:$12 sps:$4 sm:$0xff]  }
   0x8   :  { %v4349_v18 = vld [vmem:[%s6057_s3 + $0x68] ss:$12 sps:$4 sm:$0xff]   ;;  %v102_v19 = vpack.c.bf16 %v41_v16, %v40_v15  ;;  %v43_v21 = vld [vmem:[%s6054_s0 + $0x38] sm:$0xff]  ;;  %v4350_v22 = vld [vmem:[%s6057_s3 + $0x80] ss:$12 sps:$4 sm:$0xff]  }
   0x9   :  { %v42_v20 = vld [vmem:[%s6054_s0 + $0x30] sm:$0xff]  ;;  %v4351_v24 = vld [vmem:[%s6057_s3 + $0x98] ss:$12 sps:$4 sm:$0xff]   ;;  %v45_v26 = vld [vmem:[%s6054_s0 + $0x48] sm:$0xff] }
   0xa   :  { %268 = vmatpush1.bf16.msra.mxu0 %v4344_v5  ;;  %v103_v23 = vpack.c.bf16 %v43_v21, %v42_v20  ;;  %v44_v25 = vld [vmem:[%s6054_s0 + $0x40] sm:$0xff]  ;;  %v46_v28 = vld [vmem:[%s6054_s0 + $0x50] sm:$0xff]  ;;  %v47_v29 = vld [vmem:[%s6054_s0 + $0x58] sm:$0xff] }
   0xb   :  { %1476 = vmatprep.subr.bf16.mxu0 %v4429_v3  ;;  %v104_v27 = vpack.c.bf16 %v45_v26, %v44_v25  ;;  %v105_v30 = vpack.c.bf16 %v47_v29, %v46_v28 }
   0xd   :  { %3741 = vmatmul.mubr.msk.bf16.vlgmr.msra.gmra.mrb[0].mxu0 %vm168_vm0, %v100_v8 }
   0xe   :  { %1477 = vmatpush1.bf16.msra.mxu0 %v4345_v9  ;;  %307 = vmatprep.mubr.bf16.mxu0 %v4429_v3 }
   0xf   :  { %1478 = vmatprep.subr.bf16.mxu0 %v4429_v3 }
  0x12   :  { %1479 = vmatpush1.bf16.msra.mxu0 %v4346_v12 }
  0x13   :  { %1480 = vmatprep.subr.bf16.mxu0 %v4429_v3 }
  0x15   :  { %3742 = vmatmul.mubr.msk.bf16.gmra.mrb[4].mxu0 %vm168_vm0, %v101_v13 }
  0x16   :  { %317 = vmatprep.mubr.bf16.mxu0 %v4429_v3  ;;  %1481 = vmatpush1.bf16.msra.mxu0 %v4347_v14 }
  0x17   :  { %1482 = vmatprep.subr.bf16.mxu0 %v4429_v3 }
  0x1a   :  { %1483 = vmatpush1.bf16.msra.mxu0 %v4348_v17 }
  0x1b   :  { %1484 = vmatprep.subr.bf16.mxu0 %v4429_v3 }
  0x1d   :  { %3743 = vmatmul.mubr.msk.bf16.gmra.mrb[8].mxu0 %vm168_vm0, %v102_v19 }
  0x1e   :  { %327 = vmatprep.mubr.bf16.mxu0 %v4429_v3  ;;  %1485 = vmatpush1.bf16.msra.mxu0 %v4349_v18 }
  0x1f   :  { %1486 = vmatprep.subr.bf16.mxu0 %v4429_v3 }
  0x22   :  { %1487 = vmatpush1.bf16.msra.mxu0 %v4350_v22 }
  0x23   :  { %1488 = vmatprep.subr.bf16.mxu0 %v4429_v3 }
  0x25   :  { %3744 = vmatmul.mubr.msk.bf16.gmra.mrb[12].mxu0 %vm168_vm0, %v103_v23 }
  0x26   :  { %337 = vmatprep.mubr.bf16.mxu0 %v4429_v3  ;;  %1489 = vmatpush1.bf16.msra.mxu0 %v4351_v24 }
  0x27   :  { %1490 = vmatprep.subr.bf16.mxu0 %v4429_v3 }
  0x2d   :  { %3745 = vmatmul.mubr.msk.bf16.gmra.mrb[16].mxu0 %vm168_vm0, %v104_v27 }
  0x2e   :  { %347 = vmatprep.mubr.bf16.mxu0 %v4429_v3 }
  0x2f   :  { %16 = vsyncpa [#allocation4], 0  ;;  %v48_v31 = vld [vmem:[%s6054_s0 + $0x60] sm:$0xff]  ;;  %v49_v32 = vld [vmem:[%s6054_s0 + $0x68] sm:$0xff]  ;;  %vm2220_vm1 = vcmask 523264   ;;  %vm2969_vm2 = vcmask 654336  }
  0x30   :  { %v106_v33 = vpack.c.bf16 %v49_v32, %v48_v31  ;;  %v4352_v34 = vld [vmem:[%s6057_s3 + $0xb0] ss:$12 sps:$4 sm:$0xff]   ;;  %v4355_v38 = vld [vmem:[%s6057_s3] ss:$12 sps:$4 sm:$0xff]   ;;  %v4358_v41 = vld [vmem:[%s6057_s3 + $0x18] ss:$12 sps:$4 sm:$0xff]  }
  0x31   :  { %v4353_v35 = vld [vmem:[%s6057_s3 + $0x4] ss:$12 sps:$4 sm:$0xff]   ;;  %v51_v37 = vld [vmem:[%s6054_s0 + $0x78] sm:$0xff]  ;;  %1491 = vmatpush1.bf16.msra.mxu0 %v4352_v34  ;;  %v4359_v42 = vld [vmem:[%s6057_s3 + $0x34] ss:$12 sps:$4 sm:$0xff]  }
  0x32   :  { %v50_v36 = vld [vmem:[%s6054_s0 + $0x70] sm:$0xff]  ;;  %1123 = vmatprep.subr.bf16.mxu1 %v4353_v35  ;;  %1492 = vmatprep.subr.bf16.mxu0 %v4429_v3  ;;  %v4356_v40 = vld [vmem:[%s6057_s3 + $0x1c] ss:$12 sps:$4 sm:$0xff]   ;;  %v52_v43 = vld [vmem:[%s6054_s0 + $0x80] sm:$0xff] }
  0x33   :  { %1124 = vmatpush1.bf16.msra.mxu1 %v4355_v38  ;;  %v107_v39 = vpack.c.bf16 %v51_v37, %v50_v36  ;;  %v53_v44 = vld [vmem:[%s6054_s0 + $0x88] sm:$0xff]  ;;  %v4361_v45 = vld [vmem:[%s6057_s3 + $0x30] ss:$12 sps:$4 sm:$0xff]   ;;  %v4370_v55 = vld [vmem:[%s6057_s3 + $0x78] ss:$12 sps:$4 sm:$0xff]  }
  0x34   :  { %1125 = vmatprep.subr.bf16.mxu1 %v4356_v40  ;;  %v108_v46 = vpack.c.bf16 %v53_v44, %v52_v43  ;;  %v4362_v47 = vld [vmem:[%s6057_s3 + $0x4c] ss:$12 sps:$4 sm:$0xff]   ;;  %v4364_v48 = vld [vmem:[%s6057_s3 + $0x48] ss:$12 sps:$4 sm:$0xff]   ;;  %v4365_v49 = vld [vmem:[%s6057_s3 + $0x64] ss:$12 sps:$4 sm:$0xff]  }
  0x35   :  { %3746 = vmatmul.mubr.msk.bf16.gmra.mrb[20].mxu0 %vm168_vm0, %v105_v30  ;;  %v54_v50 = vld [vmem:[%s6054_s0 + $0x90] sm:$0xff]  ;;  %v55_v51 = vld [vmem:[%s6054_s0 + $0x98] sm:$0xff]  ;;  %v4367_v52 = vld [vmem:[%s6057_s3 + $0x60] ss:$12 sps:$4 sm:$0xff]  }
  0x36   :  { %357 = vmatprep.mubr.bf16.mxu0 %v4429_v3  ;;  %v109_v53 = vpack.c.bf16 %v55_v51, %v54_v50  ;;  %v4368_v54 = vld [vmem:[%s6057_s3 + $0x7c] ss:$12 sps:$4 sm:$0xff]   ;;  %v4371_v56 = vld [vmem:[%s6057_s3 + $0x94] ss:$12 sps:$4 sm:$0xff]   ;;  %v4375_v62 = vld [vmem:[%s6057_s3 + $0xac] ss:$12 sps:$4 sm:$0xff]   ;;  %v138_v51 = vlaneseq }
  0x37   :  { %1126 = vmatpush1.bf16.msra.mxu1 %v4358_v41  ;;  %v56_v57 = vld [vmem:[%s6054_s0 + $0xa0] sm:$0xff]  ;;  %v57_v58 = vld [vmem:[%s6054_s0 + $0xa8] sm:$0xff]  ;;  %v4374_v60 = vld [vmem:[%s6057_s3 + $0x90] ss:$12 sps:$4 sm:$0xff]  }
  0x38   :  { %1127 = vmatprep.subr.bf16.mxu1 %v4359_v42  ;;  %v4373_v59 = vld [vmem:[%s6057_s3 + $0xc8] ss:$12 sps:$4 sm:$0xff]   ;;  %v110_v61 = vpack.c.bf16 %v57_v58, %v56_v57  ;;  %v59_v0 = vld [vmem:[%s6054_s0 + $0xb8] sm:$0xff]  ;;  %v4378_v4 = vld [vmem:[%s6057_s3 + $0xc4] ss:$12 sps:$4 sm:$0xff]   ;;  %vm3720_vm3 = vcmp.lt.s32.totalorder %v138_v51, 512 }
  0x39   :  { %1493 = vmatpush1.bf16.msra.mxu0 %v4373_v59  ;;  %v58_v63 = vld [vmem:[%s6054_s0 + $0xb0] sm:$0xff]  ;;  %v4380_v5 = vld [vmem:[%s6057_s3 + $0xc0] ss:$12 sps:$4 sm:$0xff]   ;;  %v4381_v6 = vld [vmem:[%s6057_s3 + $0xdc] ss:$12 sps:$4 sm:$0xff]  }
  0x3a   :  { %1494 = vmatprep.subr.bf16.mxu0 %v4429_v3  ;;  %v4377_v1 = vld [vmem:[%s6057_s3 + $0xa8] ss:$12 sps:$4 sm:$0xff]   ;;  %v111_v2 = vpack.c.bf16 %v59_v0, %v58_v63  ;;  %v60_v7 = vld [vmem:[%s6054_s0 + $0xc0] sm:$0xff]  ;;  %v63_v12 = vld [vmem:[%s6054_s0 + $0xd8] sm:$0xff] }
  0x3b   :  { %1128 = vmatpush1.bf16.msra.mxu1 %v4361_v45  ;;  %v61_v8 = vld [vmem:[%s6054_s0 + $0xc8] sm:$0xff]  ;;  %v4383_v9 = vld [vmem:[%s6057_s3 + $0xd8] ss:$12 sps:$4 sm:$0xff]   ;;  %v62_v11 = vld [vmem:[%s6054_s0 + $0xd0] sm:$0xff] }
  0x3c   :  { %1129 = vmatprep.subr.bf16.mxu1 %v4362_v47  ;;  %v112_v10 = vpack.c.bf16 %v61_v8, %v60_v7  ;;  %v113_v13 = vpack.c.bf16 %v63_v12, %v62_v11  ;;  %v64_v14 = vld [vmem:[%s6054_s0 + $0xe0] sm:$0xff]  ;;  %v65_v15 = vld [vmem:[%s6054_s0 + $0xe8] sm:$0xff]  ;;  %v66_v18 = vld [vmem:[%s6054_s0 + $0xf0] sm:$0xff] }
  0x3d   :  { %3747 = vmatmul.mubr.msk.bf16.gmra.mrb[24].mxu0 %vm168_vm0, %v106_v33  ;;  %v4384_v16 = vld [vmem:[%s6057_s3 + $0xe0] ss:$12 sps:$4 sm:$0xff]   ;;  %v114_v17 = vpack.c.bf16 %v65_v15, %v64_v14  ;;  %v67_v19 = vld [vmem:[%s6054_s0 + $0xf8] sm:$0xff]  ;;  %v70_v24 = vld [vmem:[%s6054_s0 + $0x110] sm:$0xff] }
  0x3e   :  { %367 = vmatprep.mubr.bf16.mxu0 %v4429_v3  ;;  %1495 = vmatpush1.bf16.msra.mxu0 %v4384_v16  ;;  %v115_v20 = vpack.c.bf16 %v67_v19, %v66_v18  ;;  %v68_v21 = vld [vmem:[%s6054_s0 + $0x100] sm:$0xff]  ;;  %v69_v22 = vld [vmem:[%s6054_s0 + $0x108] sm:$0xff]  ;;  %v71_v25 = vld [vmem:[%s6054_s0 + $0x118] sm:$0xff] }
  0x3f   :  { %1130 = vmatpush1.bf16.msra.mxu1 %v4364_v48  ;;  %2317 = vmatprep.subr.bf16.mxu0 %v4429_v3  ;;  %v116_v23 = vpack.c.bf16 %v69_v22, %v68_v21  ;;  %v117_v26 = vpack.c.bf16 %v71_v25, %v70_v24  ;;  %v72_v27 = vld [vmem:[%s6054_s0 + $0x120] sm:$0xff]  ;;  %v73_v28 = vld [vmem:[%s6054_s0 + $0x128] sm:$0xff]  ;;  %v74_v30 = vld [vmem:[%s6054_s0 + $0x130] sm:$0xff] }
  0x40   :  { %1131 = vmatprep.subr.bf16.mxu1 %v4365_v49  ;;  %v118_v29 = vpack.c.bf16 %v73_v28, %v72_v27  ;;  %v75_v31 = vld [vmem:[%s6054_s0 + $0x138] sm:$0xff]  ;;  %v76_v33 = vld [vmem:[%s6054_s0 + $0x140] sm:$0xff]  ;;  %v77_v34 = vld [vmem:[%s6054_s0 + $0x148] sm:$0xff] }
  0x41   :  { %v119_v32 = vpack.c.bf16 %v75_v31, %v74_v30  ;;  %v120_v35 = vpack.c.bf16 %v77_v34, %v76_v33  ;;  %v78_v36 = vld [vmem:[%s6054_s0 + $0x150] sm:$0xff]  ;;  %v79_v37 = vld [vmem:[%s6054_s0 + $0x158] sm:$0xff]  ;;  %v81_v40 = vld [vmem:[%s6054_s0 + $0x168] sm:$0xff] }
  0x42   :  { %v121_v38 = vpack.c.bf16 %v79_v37, %v78_v36  ;;  %v82_v42 = vld [vmem:[%s6054_s0 + $0x170] sm:$0xff]  ;;  %v83_v43 = vld [vmem:[%s6054_s0 + $0x178] sm:$0xff]  ;;  %v84_v45 = vld [vmem:[%s6054_s0 + $0x180] sm:$0xff] }
  0x43   :  { %1132 = vmatpush1.bf16.msra.mxu1 %v4367_v52  ;;  %v123_v44 = vpack.c.bf16 %v83_v43, %v82_v42  ;;  %v86_v48 = vld [vmem:[%s6054_s0 + $0x190] sm:$0xff]  ;;  %v87_v49 = vld [vmem:[%s6054_s0 + $0x198] sm:$0xff]  ;;  %v4809_v52 = vshrl.u32 %v138_v51, 7  ;;  %v136_v57 = vld [vmem:[%s6056_s2] sm:$0x3] }
  0x44   :  { %1133 = vmatprep.subr.bf16.mxu1 %v4368_v54  ;;  %v125_v50 = vpack.c.bf16 %v87_v49, %v86_v48  ;;  %v89_v54 = vld [vmem:[%s6054_s0 + $0x1a8] sm:$0xff]  ;;  %v4859_v18 = vld [vmem:[%s6059_s5] sm:$0xff]   ;;  %v95_v33 = vld [vmem:[%s6054_s0 + $0x1d8] sm:$0xff] }
  0x45   :  { %3748 = vmatmul.mubr.msk.bf16.gmra.mrb[28].mxu0 %vm168_vm0, %v107_v39  ;;  %v80_v39 = vld [vmem:[%s6054_s0 + $0x160] sm:$0xff]  ;;  %v144_v58 = vsub.s32 1, %v4809_v52  ;;  %v93_v14 = vld [vmem:[%s6054_s0 + $0x1c8] sm:$0xff]  ;;  %v4891_v37 = vld [vmem:[%s6059_s5 + $0x10] sm:$0xff]  }
  0x46   :  { %377 = vmatprep.mubr.bf16.mxu0 %v4429_v3  ;;  %v122_v41 = vpack.c.bf16 %v81_v40, %v80_v39  ;;  %v4872_v27 = vld [vmem:[%s6059_s5 + $0x8] sm:$0xff]  }
  0x47   :  { %1134 = vmatpush1.bf16.msra.mxu1 %v4370_v55 }
  0x48   :  { %1135 = vmatprep.subr.bf16.mxu1 %v4371_v56  ;;  %v4819_v56 = vsub.s32 0, %v4809_v52 }
  0x4a   :  { %v4827_v59 = vrot.slane %v136_v57, %v4819_v56 }
  0x4b   :  { %1136 = vmatpush1.bf16.msra.mxu1 %v4374_v60  ;;  %v4831_v60 = vrot.slane %v136_v57, %v144_v58 }
  0x4c   :  { %1137 = vmatprep.subr.bf16.mxu1 %v4375_v62  ;;  %v91_v62 = vld [vmem:[%s6054_s0 + $0x1b8] sm:$0xff] }
  0x4d   :  { %3749 = vmatmul.mubr.msk.bf16.gmra.mrb[32].mxu0 %vm168_vm0, %v108_v46  ;;  %v85_v46 = vld [vmem:[%s6054_s0 + $0x188] sm:$0xff] }
  0x4e   :  { %387 = vmatprep.mubr.bf16.mxu0 %v4429_v3  ;;  %v124_v47 = vpack.c.bf16 %v85_v46, %v84_v45  ;;  %v4905_v46 = vld [vmem:[%s6059_s5 + $0x18] sm:$0xff]  }
  0x4f   :  { %1138 = vmatpush1.bf16.msra.mxu1 %v4377_v1 }
  0x50   :  { %1139 = vmatprep.subr.bf16.mxu1 %v4378_v4 }
  0x53   :  { %1140 = vmatpush1.bf16.msra.mxu1 %v4380_v5 }
  0x54   :  { %1141 = vmatprep.subr.bf16.mxu1 %v4381_v6 }
  0x55   :  { %3750 = vmatmul.mubr.msk.bf16.gmra.mrb[36].mxu0 %vm168_vm0, %v109_v53  ;;  %v88_v53 = vld [vmem:[%s6054_s0 + $0x1a0] sm:$0xff] }
  0x56   :  { %397 = vmatprep.mubr.bf16.mxu0 %v4429_v3  ;;  %v126_v55 = vpack.c.bf16 %v89_v54, %v88_v53  ;;  %v96_v53 = vld [vmem:[%s6054_s0 + $0x1e0] sm:$0xff]  ;;  %v97_v54 = vld [vmem:[%s6054_s0 + $0x1e8] sm:$0xff] }
  0x57   :  { %1142 = vmatpush1.bf16.msra.mxu1 %v4383_v9 }
  0x58   :  { %4302 = vmatprep.subr.bf16.mxu1 %v4429_v3 }
  0x5d   :  { %3751 = vmatmul.mubr.msk.bf16.gmra.mrb[40].mxu0 %vm168_vm0, %v110_v61  ;;  %v90_v61 = vld [vmem:[%s6054_s0 + $0x1b0] sm:$0xff] }
  0x5e   :  { %407 = vmatprep.mubr.bf16.mxu0 %v4429_v3 }
  0x65   :  { %3752 = vmatmul.mubr.msk.bf16.gmra.mrb[44].mxu0 %vm168_vm0, %v111_v2  ;;  %v127_v2 = vpack.c.bf16 %v91_v62, %v90_v61  ;;  %v4924_v62 = vld [vmem:[%s6059_s5 + $0x20] sm:$0xff]  }
  0x66   :  { %417 = vmatprep.mubr.bf16.mxu0 %v4429_v3 }
  0x6d   :  { %3753 = vmatmul.mubr.msk.bf16.gmra.mrb[48].mxu0 %vm168_vm0, %v112_v10 }
  0x6e   :  { %427 = vmatprep.mubr.bf16.mxu0 %v4429_v3 }
  0x75   :  { %3754 = vmatmul.mubr.msk.bf16.gmra.mrb[52].mxu0 %vm168_vm0, %v113_v13  ;;  %v92_v13 = vld [vmem:[%s6054_s0 + $0x1c0] sm:$0xff] }
  0x76   :  { %437 = vmatprep.mubr.bf16.mxu0 %v4429_v3  ;;  %v128_v21 = vpack.c.bf16 %v93_v14, %v92_v13  ;;  %v98_v13 = vld [vmem:[%s6054_s0 + $0x1f0] sm:$0xff]  ;;  %v99_v14 = vld [vmem:[%s6054_s0 + $0x1f8] sm:$0xff] }
  0x7d   :  { %3755 = vmatmul.mubr.msk.bf16.gmra.mrb[56].mxu0 %vm168_vm0, %v114_v17 }
  0x7e   :  { %447 = vmatprep.mubr.bf16.mxu0 %v4429_v3 }
  0x85   :  { %3756 = vmatmul.mubr.msk.bf16.gmra.mrb[60].mxu0 %vm168_vm0, %v115_v20 }
  0x86   :  { %457 = vmatprep.mubr.bf16.mxu0 %v4429_v3 }
  0x8d   :  { %3757 = vmatmul.mubr.msk.bf16.gmra.mrb[64].mxu0 %vm168_vm0, %v116_v23 }
  0x8e   :  { %467 = vmatprep.mubr.bf16.mxu0 %v4429_v3 }
  0x95   :  { %3758 = vmatmul.mubr.msk.bf16.gmra.mrb[68].mxu0 %vm168_vm0, %v117_v26 }
  0x96   :  { %477 = vmatprep.mubr.bf16.mxu0 %v4429_v3 }
  0x9d   :  { %3759 = vmatmul.mubr.msk.bf16.gmra.mrb[72].mxu0 %vm168_vm0, %v118_v29 }
  0x9e   :  { %487 = vmatprep.mubr.bf16.mxu0 %v4429_v3 }
  0xa5   :  { %3760 = vmatmul.mubr.msk.bf16.gmra.mrb[76].mxu0 %vm168_vm0, %v119_v32  ;;  %v94_v32 = vld [vmem:[%s6054_s0 + $0x1d0] sm:$0xff] }
  0xa6   :  { %497 = vmatprep.mubr.bf16.mxu0 %v4429_v3  ;;  %v129_v40 = vpack.c.bf16 %v95_v33, %v94_v32 }
  0xad   :  { %3761 = vmatmul.mubr.msk.bf16.gmra.mrb[80].mxu0 %vm168_vm0, %v120_v35 }
  0xae   :  { %507 = vmatprep.mubr.bf16.mxu0 %v4429_v3 }
  0xb5   :  { %3762 = vmatmul.mubr.msk.bf16.gmra.mrb[84].mxu0 %vm168_vm0, %v121_v38 }
  0xb6   :  { %517 = vmatprep.mubr.bf16.mxu0 %v4429_v3 }
  0xbd   :  { %3763 = vmatmul.mubr.msk.bf16.gmra.mrb[88].mxu0 %vm168_vm0, %v122_v41 }
  0xbe   :  { %527 = vmatprep.mubr.bf16.mxu0 %v4429_v3 }
  0xc5   :  { %3764 = vmatmul.mubr.msk.bf16.gmra.mrb[92].mxu0 %vm168_vm0, %v123_v44 }
  0xc6   :  { %537 = vmatprep.mubr.bf16.mxu0 %v4429_v3 }
  0xcd   :  { %3765 = vmatmul.mubr.msk.bf16.gmra.mrb[96].mxu0 %vm168_vm0, %v124_v47 }
  0xce   :  { %547 = vmatprep.mubr.bf16.mxu0 %v4429_v3 }
  0xd5   :  { %3766 = vmatmul.mubr.msk.bf16.gmra.mrb[100].mxu0 %vm168_vm0, %v125_v50 }
  0xd6   :  { %557 = vmatprep.mubr.bf16.mxu0 %v4429_v3 }
  0xdd   :  { %3767 = vmatmul.mubr.msk.bf16.gmra.mrb[104].mxu0 %vm168_vm0, %v126_v55 }
  0xde   :  { %567 = vmatprep.mubr.bf16.mxu0 %v4429_v3 }
  0xe0   :  { %v299_v63 = vpop.f32.mrb[0].mxu0 }
  0xe1   :  { %v300_v0 = vadd.f32 %v299_v63, %v4827_v59  ;;  %v301_v1 = vpop.f32.mrb[1].mxu0 }
  0xe2   :  { %v302_v4 = vadd.f32 %v301_v1, %v4831_v60  ;;  %v303_v5 = vpop.f32.mrb[2].mxu0  ;;  %v130_v1 = vpack.c.bf16 %v97_v54, %v96_v53 }
  0xe3   :  { %v304_v6 = vadd.f32 %v303_v5, %v4827_v59  ;;  %v305_v7 = vpop.f32.mrb[3].mxu0  ;;  %v618_v9 = vmax.f32 %v300_v0, 0.0 }
  0xe4   :  { %v306_v8 = vadd.f32 %v305_v7, %v4831_v60  ;;  %v619_v11 = vmax.f32 %v302_v4, 0.0 }
  0xe5   :  { %v620_v10 = vmax.f32 %v304_v6, 0.0  ;;  %3768 = vmatmul.mubr.msk.bf16.gmra.mrb[108].mxu0 %vm168_vm0, %v127_v2 }
  0xe6   :  { %v621_v12 = vmax.f32 %v306_v8, 0.0  ;;  %577 = vmatprep.mubr.bf16.mxu0 %v4429_v3  ;;  %v4938_v8 = vld [vmem:[%s6059_s5 + $0x28] sm:$0xff]  }
  0xe7   :  { %v4852_v15 = vpack.c.bf16 %v620_v10, %v618_v9 }
  0xe8   :  { %v309_v16 = vpop.f32.mrb[4].mxu0  ;;  %v4854_v17 = vpack.c.bf16 %v621_v12, %v619_v11 }
  0xe9   :  { %v310_v19 = vadd.f32 %v309_v16, %v4827_v59  ;;  %v311_v20 = vpop.f32.mrb[5].mxu0 }
  0xea   :  { %v312_v22 = vadd.f32 %v311_v20, %v4831_v60  ;;  %v313_v23 = vpop.f32.mrb[6].mxu0  ;;  %3803 = vmatprep.mubr.msk.bf16.mxu1 %vm168_vm0, %v4854_v17 }
  0xeb   :  { %v314_v24 = vadd.f32 %v313_v23, %v4827_v59  ;;  %v315_v25 = vpop.f32.mrb[7].mxu0  ;;  %1156 = vmatmul.mubr.bf16.vlgmr.msra.gmra.mrb[0].mxu1 %v4852_v15  ;;  %v622_v28 = vmax.f32 %v310_v19, 0.0 }
  0xec   :  { %v316_v26 = vadd.f32 %v315_v25, %v4831_v60  ;;  %4318 = vmatpush1.bf16.msra.mxu1 %v4859_v18  ;;  %v623_v30 = vmax.f32 %v312_v22, 0.0 }
  0xed   :  { %v624_v29 = vmax.f32 %v314_v24, 0.0  ;;  %3769 = vmatmul.mubr.msk.bf16.gmra.mrb[112].mxu0 %vm168_vm0, %v128_v21  ;;  %4303 = vmatprep.subr.bf16.mxu1 %v4429_v3  ;;  %v4957_v21 = vld [vmem:[%s6059_s5 + $0x30] sm:$0xff]   ;;  %v131_v24 = vpack.c.bf16 %v99_v14, %v98_v13 }
  0xee   :  { %v625_v31 = vmax.f32 %v316_v26, 0.0  ;;  %587 = vmatprep.mubr.bf16.mxu0 %v4429_v3 }
  0xef   :  { %v4883_v34 = vpack.c.bf16 %v624_v29, %v622_v28 }
  0xf0   :  { %v4885_v35 = vpack.c.bf16 %v625_v31, %v623_v30  ;;  %v319_v36 = vpop.f32.mrb[8].mxu0  ;;  %4319 = vmatpush1.bf16.msra.mxu1 %v4872_v27  ;;  %v4971_v31 = vld [vmem:[%s6059_s5 + $0x38] sm:$0xff]  }
  0xf1   :  { %v320_v38 = vadd.f32 %v319_v36, %v4827_v59  ;;  %v321_v39 = vpop.f32.mrb[9].mxu0  ;;  %4304 = vmatprep.subr.bf16.mxu1 %v4429_v3 }
  0xf2   :  { %v322_v41 = vadd.f32 %v321_v39, %v4831_v60  ;;  %v323_v42 = vpop.f32.mrb[10].mxu0  ;;  %3804 = vmatprep.mubr.msk.bf16.mxu1 %vm168_vm0, %v4885_v35 }
  0xf3   :  { %v324_v43 = vadd.f32 %v323_v42, %v4827_v59  ;;  %v325_v44 = vpop.f32.mrb[11].mxu0  ;;  %1166 = vmatmul.mubr.bf16.gmra.mrb[4].mxu1 %v4883_v34  ;;  %v626_v47 = vmax.f32 %v320_v38, 0.0  ;;  %v4985_v42 = vld [vmem:[%s6059_s5 + $0x40] sm:$0xff]  }
  0xf4   :  { %v326_v45 = vadd.f32 %v325_v44, %v4831_v60  ;;  %4320 = vmatpush1.bf16.msra.mxu1 %v4891_v37  ;;  %v627_v49 = vmax.f32 %v322_v41, 0.0 }
  0xf5   :  { %v628_v48 = vmax.f32 %v324_v43, 0.0  ;;  %3770 = vmatmul.mubr.msk.bf16.gmra.mrb[116].mxu0 %vm168_vm0, %v129_v40  ;;  %4305 = vmatprep.subr.bf16.mxu1 %v4429_v3 }
  0xf6   :  { %v629_v50 = vmax.f32 %v326_v45, 0.0  ;;  %597 = vmatprep.mubr.bf16.mxu0 %v4429_v3 }
  0xf7   :  { %v4916_v55 = vpack.c.bf16 %v628_v48, %v626_v47 }
  0xf8   :  { %v4918_v57 = vpack.c.bf16 %v629_v50, %v627_v49  ;;  %v329_v61 = vpop.f32.mrb[12].mxu0  ;;  %4321 = vmatpush1.bf16.msra.mxu1 %v4905_v46 }
  0xf9   :  { %v330_v63 = vadd.f32 %v329_v61, %v4827_v59  ;;  %v331_v0 = vpop.f32.mrb[13].mxu0  ;;  %4306 = vmatprep.subr.bf16.mxu1 %v4429_v3 }
  0xfa   :  { %v332_v2 = vadd.f32 %v331_v0, %v4831_v60  ;;  %v333_v4 = vpop.f32.mrb[14].mxu0  ;;  %3805 = vmatprep.mubr.msk.bf16.mxu1 %vm168_vm0, %v4918_v57 }
  0xfb   :  { %v334_v5 = vadd.f32 %v333_v4, %v4827_v59  ;;  %v335_v6 = vpop.f32.mrb[15].mxu0  ;;  %1176 = vmatmul.mubr.bf16.gmra.mrb[8].mxu1 %v4916_v55  ;;  %v630_v9 = vmax.f32 %v330_v63, 0.0 }
  0xfc   :  { %v336_v7 = vadd.f32 %v335_v6, %v4831_v60  ;;  %4322 = vmatpush1.bf16.msra.mxu1 %v4924_v62  ;;  %v631_v11 = vmax.f32 %v332_v2, 0.0 }
  0xfd   :  { %v632_v10 = vmax.f32 %v334_v5, 0.0  ;;  %3771 = vmatmul.mubr.msk.bf16.gmra.mrb[120].mxu0 %vm168_vm0, %v130_v1  ;;  %4307 = vmatprep.subr.bf16.mxu1 %v4429_v3 }
  0xfe   :  { %v633_v12 = vmax.f32 %v336_v7, 0.0  ;;  %607 = vmatprep.mubr.bf16.mxu0 %v4429_v3  ;;  %v5018_v7 = vld [vmem:[%s6059_s5 + $0x48] sm:$0xff]  }
  0xff   :  { %v4949_v16 = vpack.c.bf16 %v632_v10, %v630_v9 }
 0x100   :  { %v4951_v19 = vpack.c.bf16 %v633_v12, %v631_v11  ;;  %v339_v20 = vpop.f32.mrb[16].mxu0  ;;  %4323 = vmatpush1.bf16.msra.mxu1 %v4938_v8 }
 0x101   :  { %v340_v22 = vadd.f32 %v339_v20, %v4827_v59  ;;  %v341_v23 = vpop.f32.mrb[17].mxu0  ;;  %4308 = vmatprep.subr.bf16.mxu1 %v4429_v3 }
 0x102   :  { %v342_v25 = vadd.f32 %v341_v23, %v4831_v60  ;;  %v343_v26 = vpop.f32.mrb[18].mxu0  ;;  %3806 = vmatprep.mubr.msk.bf16.mxu1 %vm168_vm0, %v4951_v19 }
 0x103   :  { %v344_v28 = vadd.f32 %v343_v26, %v4827_v59  ;;  %v345_v29 = vpop.f32.mrb[19].mxu0  ;;  %1186 = vmatmul.mubr.bf16.gmra.mrb[12].mxu1 %v4949_v16  ;;  %v634_v32 = vmax.f32 %v340_v22, 0.0 }
 0x104   :  { %v346_v30 = vadd.f32 %v345_v29, %v4831_v60  ;;  %4324 = vmatpush1.bf16.msra.mxu1 %v4957_v21  ;;  %v635_v36 = vmax.f32 %v342_v25, 0.0 }
 0x105   :  { %v636_v33 = vmax.f32 %v344_v28, 0.0  ;;  %3772 = vmatmul.mubr.msk.bf16.gmra.mrb[124].mxu0 %vm168_vm0, %v131_v24  ;;  %4309 = vmatprep.subr.bf16.mxu1 %v4429_v3 }
 0x106   :  { %v637_v38 = vmax.f32 %v346_v30, 0.0  ;;  %3835 = vmatprep.mubr.msk.bf16.mxu0 %vm168_vm0, %v4854_v17 }
 0x107   :  { %v4977_v39 = vpack.c.bf16 %v636_v33, %v634_v32 }
 0x108   :  { %v4979_v40 = vpack.c.bf16 %v637_v38, %v635_v36  ;;  %v349_v41 = vpop.f32.mrb[20].mxu0  ;;  %4325 = vmatpush1.bf16.msra.mxu1 %v4971_v31 }
 0x109   :  { %v350_v43 = vadd.f32 %v349_v41, %v4827_v59  ;;  %v351_v44 = vpop.f32.mrb[21].mxu0  ;;  %4310 = vmatprep.subr.bf16.mxu1 %v4429_v3 }
 0x10a   :  { %v352_v45 = vadd.f32 %v351_v44, %v4831_v60  ;;  %v353_v17 = vpop.f32.mrb[22].mxu0  ;;  %3807 = vmatprep.mubr.msk.bf16.mxu1 %vm168_vm0, %v4979_v40 }
 0x10b   :  { %v354_v47 = vadd.f32 %v353_v17, %v4827_v59  ;;  %v355_v48 = vpop.f32.mrb[23].mxu0  ;;  %1196 = vmatmul.mubr.bf16.gmra.mrb[16].mxu1 %v4977_v39  ;;  %v638_v50 = vmax.f32 %v350_v43, 0.0  ;;  %v4395_v43 = vld [vmem:[%s6059_s5 + $0x50] sm:$0xff]  }
 0x10c   :  { %v356_v49 = vadd.f32 %v355_v48, %v4831_v60  ;;  %4326 = vmatpush1.bf16.msra.mxu1 %v4985_v42  ;;  %v639_v54 = vmax.f32 %v352_v45, 0.0 }
 0x10d   :  { %v640_v53 = vmax.f32 %v354_v47, 0.0  ;;  %1509 = vmatmul.mubr.bf16.vlgmr.msra.gmra.mrb[128].mxu0 %v4852_v15  ;;  %4311 = vmatprep.subr.bf16.mxu1 %v4429_v3 }
 0x10e   :  { %v641_v61 = vmax.f32 %v356_v49, 0.0  ;;  %3836 = vmatprep.mubr.msk.bf16.mxu0 %vm168_vm0, %v4885_v35  ;;  %2318 = vmatpush1.bf16.msra.mxu0 %v4859_v18 }
 0x10f   :  { %v5001_v63 = vpack.c.bf16 %v640_v53, %v638_v50  ;;  %2319 = vmatprep.subr.bf16.mxu0 %v4429_v3 }
 0x110   :  { %v5004_v0 = vpack.c.bf16 %v641_v61, %v639_v54  ;;  %v359_v1 = vpop.f32.mrb[24].mxu0  ;;  %4327 = vmatpush1.bf16.msra.mxu1 %v5018_v7 }
 0x111   :  { %v360_v2 = vadd.f32 %v359_v1, %v4827_v59  ;;  %v361_v4 = vpop.f32.mrb[25].mxu0  ;;  %4312 = vmatprep.subr.bf16.mxu1 %v4429_v3 }
 0x112   :  { %v362_v15 = vadd.f32 %v361_v4, %v4831_v60  ;;  %v363_v5 = vpop.f32.mrb[26].mxu0  ;;  %3808 = vmatprep.mubr.msk.bf16.mxu1 %vm168_vm0, %v5004_v0  ;;  %2320 = vmatpush1.bf16.msra.mxu0 %v4872_v27 }
 0x113   :  { %v364_v18 = vadd.f32 %v363_v5, %v4827_v59  ;;  %v365_v35 = vpop.f32.mrb[27].mxu0  ;;  %1206 = vmatmul.mubr.bf16.gmra.mrb[20].mxu1 %v5001_v63  ;;  %2321 = vmatprep.subr.bf16.mxu0 %v4429_v3  ;;  %v642_v9 = vmax.f32 %v360_v2, 0.0 }
 0x114   :  { %v366_v6 = vadd.f32 %v365_v35, %v4831_v60  ;;  %v643_v11 = vmax.f32 %v362_v15, 0.0  ;;  %4328 = vmatpush1.bf16.msra.mxu1 %v4395_v43 }
 0x115   :  { %v644_v10 = vmax.f32 %v364_v18, 0.0  ;;  %1517 = vmatmul.mubr.bf16.gmra.mrb[132].mxu0 %v4883_v34  ;;  %4313 = vmatprep.subr.bf16.mxu1 %v4429_v3 }
 0x116   :  { %v645_v27 = vmax.f32 %v366_v6, 0.0  ;;  %3837 = vmatprep.mubr.msk.bf16.mxu0 %vm168_vm0, %v4918_v57  ;;  %2322 = vmatpush1.bf16.msra.mxu0 %v4891_v37 }
 0x117   :  { %v5024_v12 = vpack.c.bf16 %v644_v10, %v642_v9  ;;  %2323 = vmatprep.subr.bf16.mxu0 %v4429_v3 }
 0x118   :  { %v5028_v13 = vpack.c.bf16 %v645_v27, %v643_v11  ;;  %v369_v14 = vpop.f32.mrb[28].mxu0  ;;  %v4396_v11 = vld [vmem:[%s6059_s5 + $0x58] sm:$0xff]  }
 0x119   :  { %v370_v34 = vadd.f32 %v369_v14, %v4827_v59  ;;  %v371_v20 = vpop.f32.mrb[29].mxu0  ;;  %4329 = vmatpush1.bf16.msra.mxu1 %v4396_v11 }
 0x11a   :  { %v372_v22 = vadd.f32 %v371_v20, %v4831_v60  ;;  %v373_v23 = vpop.f32.mrb[30].mxu0  ;;  %3809 = vmatprep.mubr.msk.bf16.mxu1 %vm168_vm0, %v5028_v13  ;;  %2324 = vmatpush1.bf16.msra.mxu0 %v4905_v46 }
 0x11b   :  { %v374_v37 = vadd.f32 %v373_v23, %v4827_v59  ;;  %v375_v57 = vpop.f32.mrb[31].mxu0  ;;  %1216 = vmatmul.mubr.bf16.gmra.mrb[24].mxu1 %v5024_v12  ;;  %2325 = vmatprep.subr.bf16.mxu0 %v4429_v3  ;;  %v646_v25 = vmax.f32 %v370_v34, 0.0 }
 0x11c   :  { %v376_v24 = vadd.f32 %v375_v57, %v4831_v60  ;;  %v647_v28 = vmax.f32 %v372_v22, 0.0  ;;  %4314 = vmatprep.subr.bf16.mxu1 %v4429_v3 }
 0x11d   :  { %v648_v26 = vmax.f32 %v374_v37, 0.0  ;;  %1525 = vmatmul.mubr.bf16.gmra.mrb[136].mxu0 %v4916_v55 }
 0x11e   :  { %v649_v29 = vmax.f32 %v376_v24, 0.0  ;;  %3838 = vmatprep.mubr.msk.bf16.mxu0 %vm168_vm0, %v4951_v19  ;;  %2326 = vmatpush1.bf16.msra.mxu0 %v4924_v62 }
 0x11f   :  { %v5044_v46 = vpack.c.bf16 %v648_v26, %v646_v25  ;;  %2327 = vmatprep.subr.bf16.mxu0 %v4429_v3 }
 0x120   :  { %v5047_v30 = vpack.c.bf16 %v649_v29, %v647_v28  ;;  %v379_v32 = vpop.f32.mrb[32].mxu0 }
 0x121   :  { %v380_v33 = vadd.f32 %v379_v32, %v4827_v59  ;;  %v381_v36 = vpop.f32.mrb[33].mxu0 }
 0x122   :  { %v382_v38 = vadd.f32 %v381_v36, %v4831_v60  ;;  %v383_v55 = vpop.f32.mrb[34].mxu0  ;;  %3810 = vmatprep.mubr.msk.bf16.mxu1 %vm168_vm0, %v5047_v30  ;;  %2328 = vmatpush1.bf16.msra.mxu0 %v4938_v8 }
 0x123   :  { %v384_v62 = vadd.f32 %v383_v55, %v4827_v59  ;;  %v385_v19 = vpop.f32.mrb[35].mxu0  ;;  %1226 = vmatmul.mubr.bf16.gmra.mrb[28].mxu1 %v5044_v46  ;;  %2329 = vmatprep.subr.bf16.mxu0 %v4429_v3  ;;  %v650_v44 = vmax.f32 %v380_v33, 0.0 }
 0x124   :  { %v386_v41 = vadd.f32 %v385_v19, %v4831_v60  ;;  %v651_v17 = vmax.f32 %v382_v38, 0.0 }
 0x125   :  { %v652_v45 = vmax.f32 %v384_v62, 0.0  ;;  %1533 = vmatmul.mubr.bf16.gmra.mrb[140].mxu0 %v4949_v16 }
 0x126   :  { %v653_v47 = vmax.f32 %v386_v41, 0.0  ;;  %3839 = vmatprep.mubr.msk.bf16.mxu0 %vm168_vm0, %v4979_v40  ;;  %2330 = vmatpush1.bf16.msra.mxu0 %v4957_v21 }
 0x127   :  { %v5064_v8 = vpack.c.bf16 %v652_v45, %v650_v44  ;;  %2331 = vmatprep.subr.bf16.mxu0 %v4429_v3 }
 0x128   :  { %v5068_v48 = vpack.c.bf16 %v653_v47, %v651_v17  ;;  %v389_v49 = vpop.f32.mrb[36].mxu0  ;;  %v4397_v47 = vld [vmem:[%s6059_s5 + $0x60] sm:$0xff]  }
 0x129   :  { %v390_v50 = vadd.f32 %v389_v49, %v4827_v59  ;;  %v391_v16 = vpop.f32.mrb[37].mxu0  ;;  %4330 = vmatpush1.bf16.msra.mxu1 %v4397_v47 }
 0x12a   :  { %v392_v53 = vadd.f32 %v391_v16, %v4831_v60  ;;  %v393_v54 = vpop.f32.mrb[38].mxu0  ;;  %3811 = vmatprep.mubr.msk.bf16.mxu1 %vm168_vm0, %v5068_v48  ;;  %2332 = vmatpush1.bf16.msra.mxu0 %v4971_v31 }
 0x12b   :  { %v394_v40 = vadd.f32 %v393_v54, %v4827_v59  ;;  %v395_v61 = vpop.f32.mrb[39].mxu0  ;;  %1236 = vmatmul.mubr.bf16.gmra.mrb[32].mxu1 %v5064_v8  ;;  %2333 = vmatprep.subr.bf16.mxu0 %v4429_v3  ;;  %v654_v1 = vmax.f32 %v390_v50, 0.0 }
 0x12c   :  { %v396_v21 = vadd.f32 %v395_v61, %v4831_v60  ;;  %v655_v4 = vmax.f32 %v392_v53, 0.0  ;;  %4315 = vmatprep.subr.bf16.mxu1 %v4429_v3 }
 0x12d   :  { %v656_v2 = vmax.f32 %v394_v40, 0.0  ;;  %1541 = vmatmul.mubr.bf16.gmra.mrb[144].mxu0 %v4977_v39 }
 0x12e   :  { %v657_v15 = vmax.f32 %v396_v21, 0.0  ;;  %3840 = vmatprep.mubr.msk.bf16.mxu0 %vm168_vm0, %v5004_v0  ;;  %2334 = vmatpush1.bf16.msra.mxu0 %v4985_v42 }
 0x12f   :  { %v5083_v5 = vpack.c.bf16 %v656_v2, %v654_v1  ;;  %2335 = vmatprep.subr.bf16.mxu0 %v4429_v3 }
 0x130   :  { %v5086_v18 = vpack.c.bf16 %v657_v15, %v655_v4  ;;  %v399_v31 = vpop.f32.mrb[40].mxu0 }
 0x131   :  { %v400_v35 = vadd.f32 %v399_v31, %v4827_v59  ;;  %v401_v6 = vpop.f32.mrb[41].mxu0 }
 0x132   :  { %v402_v9 = vadd.f32 %v401_v6, %v4831_v60  ;;  %v403_v39 = vpop.f32.mrb[42].mxu0  ;;  %3812 = vmatprep.mubr.msk.bf16.mxu1 %vm168_vm0, %v5086_v18  ;;  %2336 = vmatpush1.bf16.msra.mxu0 %v5018_v7 }
 0x133   :  { %v404_v0 = vadd.f32 %v403_v39, %v4827_v59  ;;  %v405_v10 = vpop.f32.mrb[43].mxu0  ;;  %1246 = vmatmul.mubr.bf16.gmra.mrb[36].mxu1 %v5083_v5  ;;  %2337 = vmatprep.subr.bf16.mxu0 %v4429_v3  ;;  %v658_v27 = vmax.f32 %v400_v35, 0.0 }
 0x134   :  { %v406_v42 = vadd.f32 %v405_v10, %v4831_v60  ;;  %v659_v34 = vmax.f32 %v402_v9, 0.0 }
 0x135   :  { %v660_v14 = vmax.f32 %v404_v0, 0.0  ;;  %1549 = vmatmul.mubr.bf16.gmra.mrb[148].mxu0 %v5001_v63 }
 0x136   :  { %v661_v20 = vmax.f32 %v406_v42, 0.0  ;;  %3841 = vmatprep.mubr.msk.bf16.mxu0 %vm168_vm0, %v5028_v13  ;;  %2338 = vmatpush1.bf16.msra.mxu0 %v4395_v43 }
 0x137   :  { %v5104_v22 = vpack.c.bf16 %v660_v14, %v658_v27  ;;  %2339 = vmatprep.subr.bf16.mxu0 %v4429_v3 }
 0x138   :  { %v5107_v7 = vpack.c.bf16 %v661_v20, %v659_v34  ;;  %v409_v23 = vpop.f32.mrb[44].mxu0  ;;  %v4398_v20 = vld [vmem:[%s6059_s5 + $0x68] sm:$0xff]  }
 0x139   :  { %v410_v37 = vadd.f32 %v409_v23, %v4827_v59  ;;  %v411_v57 = vpop.f32.mrb[45].mxu0  ;;  %4331 = vmatpush1.bf16.msra.mxu1 %v4398_v20 }
 0x13a   :  { %v412_v63 = vadd.f32 %v411_v57, %v4831_v60  ;;  %v413_v24 = vpop.f32.mrb[46].mxu0  ;;  %3813 = vmatprep.mubr.msk.bf16.mxu1 %vm168_vm0, %v5107_v7  ;;  %2340 = vmatpush1.bf16.msra.mxu0 %v4396_v11 }
 0x13b   :  { %v414_v13 = vadd.f32 %v413_v24, %v4827_v59  ;;  %v415_v25 = vpop.f32.mrb[47].mxu0  ;;  %1256 = vmatmul.mubr.bf16.gmra.mrb[40].mxu1 %v5104_v22  ;;  %2341 = vmatprep.subr.bf16.mxu0 %v4429_v3  ;;  %v662_v28 = vmax.f32 %v410_v37, 0.0 }
 0x13c   :  { %v416_v26 = vadd.f32 %v415_v25, %v4831_v60  ;;  %v663_v32 = vmax.f32 %v412_v63, 0.0  ;;  %4316 = vmatprep.subr.bf16.mxu1 %v4429_v3 }
 0x13d   :  { %v664_v29 = vmax.f32 %v414_v13, 0.0  ;;  %1557 = vmatmul.mubr.bf16.gmra.mrb[152].mxu0 %v5024_v12 }
 0x13e   :  { %v665_v33 = vmax.f32 %v416_v26, 0.0  ;;  %3842 = vmatprep.mubr.msk.bf16.mxu0 %vm168_vm0, %v5047_v30  ;;  %2342 = vmatpush1.bf16.msra.mxu0 %v4397_v47 }
 0x13f   :  { %v5121_v36 = vpack.c.bf16 %v664_v29, %v662_v28  ;;  %2343 = vmatprep.subr.bf16.mxu0 %v4429_v3 }
 0x140   :  { %v5123_v38 = vpack.c.bf16 %v665_v33, %v663_v32  ;;  %v419_v55 = vpop.f32.mrb[48].mxu0 }
 0x141   :  { %v420_v62 = vadd.f32 %v419_v55, %v4827_v59  ;;  %v421_v19 = vpop.f32.mrb[49].mxu0 }
 0x142   :  { %v422_v41 = vadd.f32 %v421_v19, %v4831_v60  ;;  %v423_v43 = vpop.f32.mrb[50].mxu0  ;;  %3814 = vmatprep.mubr.msk.bf16.mxu1 %vm168_vm0, %v5123_v38  ;;  %2344 = vmatpush1.bf16.msra.mxu0 %v4398_v20 }
 0x143   :  { %v424_v12 = vadd.f32 %v423_v43, %v4827_v59  ;;  %v425_v44 = vpop.f32.mrb[51].mxu0  ;;  %1266 = vmatmul.mubr.bf16.gmra.mrb[44].mxu1 %v5121_v36  ;;  %v666_v45 = vmax.f32 %v420_v62, 0.0  ;;  %2345 = vmatprep.subr.bf16.mxu0 %v4429_v3 }
 0x144   :  { %v426_v30 = vadd.f32 %v425_v44, %v4831_v60  ;;  %v667_v49 = vmax.f32 %v422_v41, 0.0 }
 0x145   :  { %v668_v17 = vmax.f32 %v424_v12, 0.0  ;;  %1565 = vmatmul.mubr.bf16.gmra.mrb[156].mxu0 %v5044_v46 }
 0x146   :  { %v669_v50 = vmax.f32 %v426_v30, 0.0  ;;  %3843 = vmatprep.mubr.msk.bf16.mxu0 %vm168_vm0, %v5068_v48 }
 0x147   :  { %v5138_v16 = vpack.c.bf16 %v668_v17, %v666_v45 }
 0x148   :  { %v5140_v53 = vpack.c.bf16 %v669_v50, %v667_v49  ;;  %v429_v54 = vpop.f32.mrb[52].mxu0 }
 0x149   :  { %v430_v46 = vadd.f32 %v429_v54, %v4827_v59  ;;  %v431_v40 = vpop.f32.mrb[53].mxu0 }
 0x14a   :  { %v432_v61 = vadd.f32 %v431_v40, %v4831_v60  ;;  %v433_v21 = vpop.f32.mrb[54].mxu0  ;;  %3815 = vmatprep.mubr.msk.bf16.mxu1 %vm168_vm0, %v5140_v53  ;;  %v4400_v40 = vld [vmem:[%s6059_s5 + $0x78] sm:$0xff]  }
 0x14b   :  { %v434_v48 = vadd.f32 %v433_v21, %v4827_v59  ;;  %v435_v1 = vpop.f32.mrb[55].mxu0  ;;  %1276 = vmatmul.mubr.bf16.gmra.mrb[48].mxu1 %v5138_v16  ;;  %v670_v4 = vmax.f32 %v430_v46, 0.0 }
 0x14c   :  { %v436_v2 = vadd.f32 %v435_v1, %v4831_v60  ;;  %v671_v31 = vmax.f32 %v432_v61, 0.0 }
 0x14d   :  { %v672_v15 = vmax.f32 %v434_v48, 0.0  ;;  %1573 = vmatmul.mubr.bf16.gmra.mrb[160].mxu0 %v5064_v8 }
 0x14e   :  { %v673_v35 = vmax.f32 %v436_v2, 0.0  ;;  %3844 = vmatprep.mubr.msk.bf16.mxu0 %vm168_vm0, %v5086_v18 }
 0x14f   :  { %v5154_v6 = vpack.c.bf16 %v672_v15, %v670_v4 }
 0x150   :  { %v5156_v9 = vpack.c.bf16 %v673_v35, %v671_v31  ;;  %v439_v39 = vpop.f32.mrb[56].mxu0 }
 0x151   :  { %v440_v0 = vadd.f32 %v439_v39, %v4827_v59  ;;  %v441_v10 = vpop.f32.mrb[57].mxu0 }
 0x152   :  { %v442_v42 = vadd.f32 %v441_v10, %v4831_v60  ;;  %v443_v11 = vpop.f32.mrb[58].mxu0  ;;  %3816 = vmatprep.mubr.msk.bf16.mxu1 %vm168_vm0, %v5156_v9 }
 0x153   :  { %v444_v8 = vadd.f32 %v443_v11, %v4827_v59  ;;  %v445_v27 = vpop.f32.mrb[59].mxu0  ;;  %1286 = vmatmul.mubr.bf16.gmra.mrb[52].mxu1 %v5154_v6  ;;  %v674_v14 = vmax.f32 %v440_v0, 0.0 }
 0x154   :  { %v446_v18 = vadd.f32 %v445_v27, %v4831_v60  ;;  %v675_v23 = vmax.f32 %v442_v42, 0.0 }
 0x155   :  { %v676_v34 = vmax.f32 %v444_v8, 0.0  ;;  %1581 = vmatmul.mubr.bf16.gmra.mrb[164].mxu0 %v5083_v5 }
 0x156   :  { %v677_v37 = vmax.f32 %v446_v18, 0.0  ;;  %3845 = vmatprep.mubr.msk.bf16.mxu0 %vm168_vm0, %v5107_v7 }
 0x157   :  { %v5171_v57 = vpack.c.bf16 %v676_v34, %v674_v14 }
 0x158   :  { %v5173_v63 = vpack.c.bf16 %v677_v37, %v675_v23  ;;  %v449_v24 = vpop.f32.mrb[60].mxu0 }
 0x159   :  { %v450_v5 = vadd.f32 %v449_v24, %v4827_v59  ;;  %v451_v13 = vpop.f32.mrb[61].mxu0 }
 0x15a   :  { %v452_v25 = vadd.f32 %v451_v13, %v4831_v60  ;;  %v453_v26 = vpop.f32.mrb[62].mxu0  ;;  %3817 = vmatprep.mubr.msk.bf16.mxu1 %vm168_vm0, %v5173_v63 }
 0x15b   :  { %v454_v7 = vadd.f32 %v453_v26, %v4827_v59  ;;  %v455_v28 = vpop.f32.mrb[63].mxu0  ;;  %1296 = vmatmul.mubr.bf16.gmra.mrb[56].mxu1 %v5171_v57  ;;  %v678_v32 = vmax.f32 %v450_v5, 0.0 }
 0x15c   :  { %v456_v29 = vadd.f32 %v455_v28, %v4831_v60  ;;  %v679_v55 = vmax.f32 %v452_v25, 0.0 }
 0x15d   :  { %v680_v33 = vmax.f32 %v454_v7, 0.0  ;;  %1589 = vmatmul.mubr.bf16.gmra.mrb[168].mxu0 %v5104_v22  ;;  %v4399_v22 = vld [vmem:[%s6059_s5 + $0x70] sm:$0xff]  }
 0x15e   :  { %v681_v62 = vmax.f32 %v456_v29, 0.0  ;;  %3846 = vmatprep.mubr.msk.bf16.mxu0 %vm168_vm0, %v5123_v38  ;;  %4332 = vmatpush1.bf16.msra.mxu1 %v4399_v22 }
 0x15f   :  { %v5187_v19 = vpack.c.bf16 %v680_v33, %v678_v32  ;;  %2346 = vmatpush1.bf16.msra.mxu0 %v4399_v22  ;;  %4317 = vmatprep.subr.bf16.mxu1 %v4429_v3 }
 0x160   :  { %v5189_v41 = vpack.c.bf16 %v681_v62, %v679_v55  ;;  %v459_v43 = vpop.f32.mrb[64].mxu0  ;;  %2347 = vmatprep.subr.bf16.mxu0 %v4429_v3 }
 0x161   :  { %v460_v12 = vadd.f32 %v459_v43, %v4827_v59  ;;  %v461_v44 = vpop.f32.mrb[65].mxu0 }
 0x162   :  { %v462_v30 = vadd.f32 %v461_v44, %v4831_v60  ;;  %v463_v45 = vpop.f32.mrb[66].mxu0  ;;  %3818 = vmatprep.mubr.msk.bf16.mxu1 %vm168_vm0, %v5189_v41  ;;  %4333 = vmatpush1.bf16.msra.mxu1 %v4400_v40 }
 0x163   :  { %v464_v38 = vadd.f32 %v463_v45, %v4827_v59  ;;  %v465_v17 = vpop.f32.mrb[67].mxu0  ;;  %1306 = vmatmul.mubr.bf16.gmra.mrb[60].mxu1 %v5187_v19  ;;  %v682_v49 = vmax.f32 %v460_v12, 0.0  ;;  %2348 = vmatpush1.bf16.msra.mxu0 %v4400_v40 }
 0x164   :  { %v466_v47 = vadd.f32 %v465_v17, %v4831_v60  ;;  %v683_v54 = vmax.f32 %v462_v30, 0.0 }
 0x165   :  { %v684_v50 = vmax.f32 %v464_v38, 0.0  ;;  %1597 = vmatmul.mubr.bf16.gmra.mrb[172].mxu0 %v5121_v36 }
 0x166   :  { %v685_v46 = vmax.f32 %v466_v47, 0.0  ;;  %3847 = vmatprep.mubr.msk.bf16.mxu0 %vm168_vm0, %v5140_v53 }
 0x167   :  { %v5209_v61 = vpack.c.bf16 %v684_v50, %v682_v49 }
 0x168   :  { %v5211_v21 = vpack.c.bf16 %v685_v46, %v683_v54  ;;  %v469_v48 = vpop.f32.mrb[68].mxu0 }
 0x169   :  { %v470_v36 = vadd.f32 %v469_v48, %v4827_v59  ;;  %v471_v1 = vpop.f32.mrb[69].mxu0 }
 0x16a   :  { %v472_v2 = vadd.f32 %v471_v1, %v4831_v60  ;;  %v473_v4 = vpop.f32.mrb[70].mxu0  ;;  %3819 = vmatprep.mubr.msk.bf16.mxu1 %vm168_vm0, %v5211_v21 }
 0x16b   :  { %v474_v53 = vadd.f32 %v473_v4, %v4827_v59  ;;  %v475_v15 = vpop.f32.mrb[71].mxu0  ;;  %1316 = vmatmul.mubr.bf16.gmra.mrb[64].mxu1 %v5209_v61  ;;  %v686_v35 = vmax.f32 %v470_v36, 0.0 }
 0x16c   :  { %v476_v31 = vadd.f32 %v475_v15, %v4831_v60  ;;  %v687_v0 = vmax.f32 %v472_v2, 0.0 }
 0x16d   :  { %v688_v39 = vmax.f32 %v474_v53, 0.0  ;;  %1605 = vmatmul.mubr.bf16.gmra.mrb[176].mxu0 %v5138_v16 }
 0x16e   :  { %v689_v10 = vmax.f32 %v476_v31, 0.0  ;;  %3848 = vmatprep.mubr.msk.bf16.mxu0 %vm168_vm0, %v5156_v9 }
 0x16f   :  { %v5223_v42 = vpack.c.bf16 %v688_v39, %v686_v35 }
 0x170   :  { %v5225_v11 = vpack.c.bf16 %v689_v10, %v687_v0  ;;  %v479_v8 = vpop.f32.mrb[72].mxu0 }
 0x171   :  { %v480_v27 = vadd.f32 %v479_v8, %v4827_v59  ;;  %v481_v18 = vpop.f32.mrb[73].mxu0 }
 0x172   :  { %v482_v14 = vadd.f32 %v481_v18, %v4831_v60  ;;  %v483_v34 = vpop.f32.mrb[74].mxu0  ;;  %3820 = vmatprep.mubr.msk.bf16.mxu1 %vm168_vm0, %v5225_v11 }
 0x173   :  { %v484_v16 = vadd.f32 %v483_v34, %v4827_v59  ;;  %v485_v20 = vpop.f32.mrb[75].mxu0  ;;  %1326 = vmatmul.mubr.bf16.gmra.mrb[68].mxu1 %v5223_v42  ;;  %v690_v23 = vmax.f32 %v480_v27, 0.0 }
 0x174   :  { %v486_v9 = vadd.f32 %v485_v20, %v4831_v60  ;;  %v691_v24 = vmax.f32 %v482_v14, 0.0 }
 0x175   :  { %v692_v37 = vmax.f32 %v484_v16, 0.0  ;;  %1613 = vmatmul.mubr.bf16.gmra.mrb[180].mxu0 %v5154_v6 }
 0x176   :  { %v693_v5 = vmax.f32 %v486_v9, 0.0  ;;  %3849 = vmatprep.mubr.msk.bf16.mxu0 %vm168_vm0, %v5173_v63 }
 0x177   :  { %v5237_v13 = vpack.c.bf16 %v692_v37, %v690_v23 }
 0x178   :  { %v5239_v25 = vpack.c.bf16 %v693_v5, %v691_v24  ;;  %v489_v26 = vpop.f32.mrb[76].mxu0 }
 0x179   :  { %v490_v7 = vadd.f32 %v489_v26, %v4827_v59  ;;  %v491_v28 = vpop.f32.mrb[77].mxu0 }
 0x17a   :  { %v492_v29 = vadd.f32 %v491_v28, %v4831_v60  ;;  %v493_v32 = vpop.f32.mrb[78].mxu0  ;;  %3821 = vmatprep.mubr.msk.bf16.mxu1 %vm168_vm0, %v5239_v25 }
 0x17b   :  { %v494_v6 = vadd.f32 %v493_v32, %v4827_v59  ;;  %v495_v33 = vpop.f32.mrb[79].mxu0  ;;  %1336 = vmatmul.mubr.bf16.gmra.mrb[72].mxu1 %v5237_v13  ;;  %v694_v55 = vmax.f32 %v490_v7, 0.0 }
 0x17c   :  { %v496_v63 = vadd.f32 %v495_v33, %v4831_v60  ;;  %v695_v43 = vmax.f32 %v492_v29, 0.0 }
 0x17d   :  { %v696_v62 = vmax.f32 %v494_v6, 0.0  ;;  %1621 = vmatmul.mubr.bf16.gmra.mrb[184].mxu0 %v5171_v57 }
 0x17e   :  { %v697_v12 = vmax.f32 %v496_v63, 0.0  ;;  %3850 = vmatprep.mubr.msk.bf16.mxu0 %vm168_vm0, %v5189_v41 }
 0x17f   :  { %v5251_v44 = vpack.c.bf16 %v696_v62, %v694_v55 }
 0x180   :  { %v5253_v30 = vpack.c.bf16 %v697_v12, %v695_v43  ;;  %v499_v45 = vpop.f32.mrb[80].mxu0 }
 0x181   :  { %v500_v22 = vadd.f32 %v499_v45, %v4827_v59  ;;  %v501_v38 = vpop.f32.mrb[81].mxu0 }
 0x182   :  { %v502_v17 = vadd.f32 %v501_v38, %v4831_v60  ;;  %v503_v47 = vpop.f32.mrb[82].mxu0  ;;  %3822 = vmatprep.mubr.msk.bf16.mxu1 %vm168_vm0, %v5253_v30 }
 0x183   :  { %v504_v57 = vadd.f32 %v503_v47, %v4827_v59  ;;  %v505_v49 = vpop.f32.mrb[83].mxu0  ;;  %1346 = vmatmul.mubr.bf16.gmra.mrb[76].mxu1 %v5251_v44  ;;  %v698_v50 = vmax.f32 %v500_v22, 0.0 }
 0x184   :  { %v506_v41 = vadd.f32 %v505_v49, %v4831_v60  ;;  %v699_v46 = vmax.f32 %v502_v17, 0.0 }
 0x185   :  { %v700_v54 = vmax.f32 %v504_v57, 0.0  ;;  %1629 = vmatmul.mubr.bf16.gmra.mrb[188].mxu0 %v5187_v19 }
 0x186   :  { %v701_v40 = vmax.f32 %v506_v41, 0.0  ;;  %3851 = vmatprep.mubr.msk.bf16.mxu0 %vm168_vm0, %v5211_v21  ;;  %v5278_v21 = vld [vmem:[%s6059_s5 + $0x80] sm:$0xff]  }
 0x187   :  { %v5265_v48 = vpack.c.bf16 %v700_v54, %v698_v50  ;;  %4094 = vmatprep.subr.bf16.mxu0 %v5278_v21 }
 0x188   :  { %v5267_v36 = vpack.c.bf16 %v701_v40, %v699_v46  ;;  %v509_v1 = vpop.f32.mrb[84].mxu0 }
 0x189   :  { %v510_v2 = vadd.f32 %v509_v1, %v4827_v59  ;;  %v511_v4 = vpop.f32.mrb[85].mxu0 }
 0x18a   :  { %v512_v53 = vadd.f32 %v511_v4, %v4831_v60  ;;  %v513_v15 = vpop.f32.mrb[86].mxu0  ;;  %3823 = vmatprep.mubr.msk.bf16.mxu1 %vm168_vm0, %v5267_v36 }
 0x18b   :  { %v514_v19 = vadd.f32 %v513_v15, %v4827_v59  ;;  %v515_v31 = vpop.f32.mrb[87].mxu0  ;;  %1356 = vmatmul.mubr.bf16.gmra.mrb[80].mxu1 %v5265_v48  ;;  %v702_v39 = vmax.f32 %v510_v2, 0.0 }
 0x18c   :  { %v516_v35 = vadd.f32 %v515_v31, %v4831_v60  ;;  %v703_v10 = vmax.f32 %v512_v53, 0.0 }
 0x18d   :  { %v704_v0 = vmax.f32 %v514_v19, 0.0  ;;  %1637 = vmatmul.mubr.bf16.gmra.mrb[192].mxu0 %v5209_v61 }
 0x18e   :  { %v705_v8 = vmax.f32 %v516_v35, 0.0  ;;  %3852 = vmatprep.mubr.msk.bf16.mxu0 %vm168_vm0, %v5225_v11 }
 0x18f   :  { %v5285_v27 = vpack.c.bf16 %v704_v0, %v702_v39 }
 0x190   :  { %v5287_v18 = vpack.c.bf16 %v705_v8, %v703_v10  ;;  %v519_v14 = vpop.f32.mrb[88].mxu0 }
 0x191   :  { %v520_v34 = vadd.f32 %v519_v14, %v4827_v59  ;;  %v521_v16 = vpop.f32.mrb[89].mxu0 }
 0x192   :  { %v522_v20 = vadd.f32 %v521_v16, %v4831_v60  ;;  %v523_v9 = vpop.f32.mrb[90].mxu0  ;;  %3824 = vmatprep.mubr.msk.bf16.mxu1 %vm168_vm0, %v5287_v18 }
 0x193   :  { %v524_v61 = vadd.f32 %v523_v9, %v4827_v59  ;;  %v525_v23 = vpop.f32.mrb[91].mxu0  ;;  %1366 = vmatmul.mubr.bf16.gmra.mrb[84].mxu1 %v5285_v27  ;;  %v706_v37 = vmax.f32 %v520_v34, 0.0 }
 0x194   :  { %v526_v11 = vadd.f32 %v525_v23, %v4831_v60  ;;  %v707_v5 = vmax.f32 %v522_v20, 0.0 }
 0x195   :  { %v708_v24 = vmax.f32 %v524_v61, 0.0  ;;  %1645 = vmatmul.mubr.bf16.gmra.mrb[196].mxu0 %v5223_v42 }
 0x196   :  { %v709_v26 = vmax.f32 %v526_v11, 0.0  ;;  %3853 = vmatprep.mubr.msk.bf16.mxu0 %vm168_vm0, %v5239_v25 }
 0x197   :  { %v5299_v7 = vpack.c.bf16 %v708_v24, %v706_v37 }
 0x198   :  { %v5301_v28 = vpack.c.bf16 %v709_v26, %v707_v5  ;;  %v529_v29 = vpop.f32.mrb[92].mxu0 }
 0x199   :  { %v530_v32 = vadd.f32 %v529_v29, %v4827_v59  ;;  %v531_v6 = vpop.f32.mrb[93].mxu0 }
 0x19a   :  { %v532_v33 = vadd.f32 %v531_v6, %v4831_v60  ;;  %v533_v63 = vpop.f32.mrb[94].mxu0  ;;  %3825 = vmatprep.mubr.msk.bf16.mxu1 %vm168_vm0, %v5301_v28 }
 0x19b   :  { %v534_v42 = vadd.f32 %v533_v63, %v4827_v59  ;;  %v535_v55 = vpop.f32.mrb[95].mxu0  ;;  %1376 = vmatmul.mubr.bf16.gmra.mrb[88].mxu1 %v5299_v7  ;;  %v710_v62 = vmax.f32 %v530_v32, 0.0  ;;  %v5362_v63 = vld [vmem:[%s6058_s4] sm:$0x7] }
 0x19c   :  { %v536_v25 = vadd.f32 %v535_v55, %v4831_v60  ;;  %v711_v12 = vmax.f32 %v532_v33, 0.0 }
 0x19d   :  { %v712_v43 = vmax.f32 %v534_v42, 0.0  ;;  %1653 = vmatmul.mubr.bf16.gmra.mrb[200].mxu0 %v5237_v13 }
 0x19e   :  { %v713_v45 = vmax.f32 %v536_v25, 0.0  ;;  %3854 = vmatprep.mubr.msk.bf16.mxu0 %vm168_vm0, %v5253_v30 }
 0x19f   :  { %v5313_v22 = vpack.c.bf16 %v712_v43, %v710_v62  ;;  %v5372_v43 = vrot.slane %v5362_v63, %v4819_v56 }
 0x1a0   :  { %v5315_v38 = vpack.c.bf16 %v713_v45, %v711_v12  ;;  %v539_v17 = vpop.f32.mrb[96].mxu0  ;;  %v5378_v45 = vrot.slane %v5362_v63, %v144_v58  ;;  %v2959_v58 = vld [vmem:[%s6061_s7] sm:$0xff] }
 0x1a1   :  { %v540_v47 = vadd.f32 %v539_v17, %v4827_v59  ;;  %v541_v57 = vpop.f32.mrb[97].mxu0 }
 0x1a2   :  { %v542_v49 = vadd.f32 %v541_v57, %v4831_v60  ;;  %v543_v41 = vpop.f32.mrb[98].mxu0  ;;  %3826 = vmatprep.mubr.msk.bf16.mxu1 %vm168_vm0, %v5315_v38 }
 0x1a3   :  { %v544_v13 = vadd.f32 %v543_v41, %v4827_v59  ;;  %v545_v50 = vpop.f32.mrb[99].mxu0  ;;  %1386 = vmatmul.mubr.bf16.gmra.mrb[92].mxu1 %v5313_v22  ;;  %v714_v54 = vmax.f32 %v540_v47, 0.0 }
 0x1a4   :  { %v546_v30 = vadd.f32 %v545_v50, %v4831_v60  ;;  %v715_v40 = vmax.f32 %v542_v49, 0.0 }
 0x1a5   :  { %v716_v46 = vmax.f32 %v544_v13, 0.0  ;;  %1661 = vmatmul.mubr.bf16.gmra.mrb[204].mxu0 %v5251_v44 }
 0x1a6   :  { %v717_v1 = vmax.f32 %v546_v30, 0.0  ;;  %3855 = vmatprep.mubr.msk.bf16.mxu0 %vm168_vm0, %v5267_v36 }
 0x1a7   :  { %v5327_v2 = vpack.c.bf16 %v716_v46, %v714_v54  ;;  %v2960_v54 = vld [vmem:[%s6061_s7 + $0x8] sm:$0xff] }
 0x1a8   :  { %v5329_v4 = vpack.c.bf16 %v717_v1, %v715_v40  ;;  %v549_v53 = vpop.f32.mrb[100].mxu0 }
 0x1a9   :  { %v550_v15 = vadd.f32 %v549_v53, %v4827_v59  ;;  %v551_v19 = vpop.f32.mrb[101].mxu0 }
 0x1aa   :  { %v552_v31 = vadd.f32 %v551_v19, %v4831_v60  ;;  %v553_v35 = vpop.f32.mrb[102].mxu0  ;;  %3827 = vmatprep.mubr.msk.bf16.mxu1 %vm168_vm0, %v5329_v4 }
 0x1ab   :  { %v554_v44 = vadd.f32 %v553_v35, %v4827_v59  ;;  %v555_v39 = vpop.f32.mrb[103].mxu0  ;;  %1396 = vmatmul.mubr.bf16.gmra.mrb[96].mxu1 %v5327_v2  ;;  %v718_v0 = vmax.f32 %v550_v15, 0.0 }
 0x1ac   :  { %v556_v36 = vadd.f32 %v555_v39, %v4831_v60  ;;  %v719_v8 = vmax.f32 %v552_v31, 0.0 }
 0x1ad   :  { %v720_v10 = vmax.f32 %v554_v44, 0.0  ;;  %1669 = vmatmul.mubr.bf16.gmra.mrb[208].mxu0 %v5265_v48 }
 0x1ae   :  { %v721_v14 = vmax.f32 %v556_v36, 0.0  ;;  %3856 = vmatprep.mubr.msk.bf16.mxu0 %vm168_vm0, %v5287_v18 }
 0x1af   :  { %v5341_v34 = vpack.c.bf16 %v720_v10, %v718_v0 }
 0x1b0   :  { %v5343_v16 = vpack.c.bf16 %v721_v14, %v719_v8  ;;  %v559_v20 = vpop.f32.mrb[104].mxu0 }
 0x1b1   :  { %v560_v9 = vadd.f32 %v559_v20, %v4827_v59  ;;  %v561_v61 = vpop.f32.mrb[105].mxu0 }
 0x1b2   :  { %v562_v23 = vadd.f32 %v561_v61, %v4831_v60  ;;  %v563_v11 = vpop.f32.mrb[106].mxu0  ;;  %3828 = vmatprep.mubr.msk.bf16.mxu1 %vm168_vm0, %v5343_v16 }
 0x1b3   :  { %v564_v48 = vadd.f32 %v563_v11, %v4827_v59  ;;  %v565_v37 = vpop.f32.mrb[107].mxu0  ;;  %1406 = vmatmul.mubr.bf16.gmra.mrb[100].mxu1 %v5341_v34  ;;  %v722_v24 = vmax.f32 %v560_v9, 0.0 }
 0x1b4   :  { %v566_v18 = vadd.f32 %v565_v37, %v4831_v60  ;;  %v723_v26 = vmax.f32 %v562_v23, 0.0 }
 0x1b5   :  { %v724_v5 = vmax.f32 %v564_v48, 0.0  ;;  %1677 = vmatmul.mubr.bf16.gmra.mrb[212].mxu0 %v5285_v27 }
 0x1b6   :  { %v725_v29 = vmax.f32 %v566_v18, 0.0  ;;  %3857 = vmatprep.mubr.msk.bf16.mxu0 %vm168_vm0, %v5301_v28 }
 0x1b7   :  { %v5355_v32 = vpack.c.bf16 %v724_v5, %v722_v24 }
 0x1b8   :  { %v5357_v6 = vpack.c.bf16 %v725_v29, %v723_v26  ;;  %v569_v33 = vpop.f32.mrb[108].mxu0 }
 0x1b9   :  { %v570_v42 = vadd.f32 %v569_v33, %v4827_v59  ;;  %v571_v55 = vpop.f32.mrb[109].mxu0 }
 0x1ba   :  { %v572_v27 = vadd.f32 %v571_v55, %v4831_v60  ;;  %v573_v25 = vpop.f32.mrb[110].mxu0  ;;  %3829 = vmatprep.mubr.msk.bf16.mxu1 %vm168_vm0, %v5357_v6 }
 0x1bb   :  { %v574_v28 = vadd.f32 %v573_v25, %v4827_v59  ;;  %v575_v62 = vpop.f32.mrb[111].mxu0  ;;  %1416 = vmatmul.mubr.bf16.gmra.mrb[104].mxu1 %v5355_v32  ;;  %v726_v17 = vmax.f32 %v570_v42, 0.0 }
 0x1bc   :  { %v576_v12 = vadd.f32 %v575_v62, %v4831_v60  ;;  %v727_v57 = vmax.f32 %v572_v27, 0.0 }
 0x1bd   :  { %v728_v47 = vmax.f32 %v574_v28, 0.0  ;;  %1685 = vmatmul.mubr.bf16.gmra.mrb[216].mxu0 %v5299_v7 }
 0x1be   :  { %v729_v49 = vmax.f32 %v576_v12, 0.0  ;;  %v1157_v41 = vpop.f32.mrb[0].mxu1  ;;  %3858 = vmatprep.mubr.msk.bf16.mxu0 %vm168_vm0, %v5315_v38  ;;  %v5395_v38 = vpack.c.bf16 %v2960_v54, %v2959_v58 }
 0x1bf   :  { %v5383_v13 = vpack.c.bf16 %v728_v47, %v726_v17  ;;  %v1158_v50 = vadd.f32 %v1157_v41, %v5372_v43  ;;  %v1159_v30 = vpop.f32.mrb[1].mxu1 }
 0x1c0   :  { %v5392_v7 = vpack.c.bf16 %v729_v49, %v727_v57  ;;  %v1160_v46 = vadd.f32 %v1159_v30, %v5378_v45  ;;  %v579_v40 = vpop.f32.mrb[112].mxu0  ;;  %v1161_v1 = vpop.f32.mrb[2].mxu1  ;;  %4283 = vmatprep.subr.bf16.mxu1 %v5395_v38 }
 0x1c1   :  { %v580_v53 = vadd.f32 %v579_v40, %v4827_v59  ;;  %v1162_v15 = vadd.f32 %v1161_v1, %v5372_v43  ;;  %v581_v19 = vpop.f32.mrb[113].mxu0  ;;  %v1163_v31 = vpop.f32.mrb[3].mxu1  ;;  %v1765_v36 = vmax.f32 %v1158_v50, 0.0 }
 0x1c2   :  { %v582_v35 = vadd.f32 %v581_v19, %v4831_v60  ;;  %v1164_v44 = vadd.f32 %v1163_v31, %v5378_v45  ;;  %v583_v39 = vpop.f32.mrb[114].mxu0  ;;  %3830 = vmatprep.mubr.msk.bf16.mxu1 %vm168_vm0, %v5392_v7  ;;  %v1766_v14 = vmax.f32 %v1160_v46, 0.0 }
 0x1c3   :  { %v1768_v0 = vmax.f32 %v1162_v15, 0.0  ;;  %v584_v10 = vadd.f32 %v583_v39, %v4827_v59  ;;  %v585_v8 = vpop.f32.mrb[115].mxu0  ;;  %1426 = vmatmul.mubr.bf16.gmra.mrb[108].mxu1 %v5383_v13  ;;  %v730_v61 = vmax.f32 %v580_v53, 0.0 }
 0x1c4   :  { %v1769_v20 = vmax.f32 %v1164_v44, 0.0  ;;  %v586_v9 = vadd.f32 %v585_v8, %v4831_v60  ;;  %v731_v48 = vmax.f32 %v582_v35, 0.0 }
 0x1c5   :  { %v5407_v23 = vpack.c.bf16 %v1768_v0, %v1765_v36  ;;  %v732_v11 = vmax.f32 %v584_v10, 0.0  ;;  %1693 = vmatmul.mubr.bf16.gmra.mrb[220].mxu0 %v5313_v22 }
 0x1c6   :  { %v733_v37 = vmax.f32 %v586_v9, 0.0  ;;  %v1167_v18 = vpop.f32.mrb[4].mxu1  ;;  %3859 = vmatprep.mubr.msk.bf16.mxu0 %vm168_vm0, %v5329_v4  ;;  %v5412_v24 = vpack.c.bf16 %v1769_v20, %v1766_v14 }
 0x1c7   :  { %v5414_v5 = vpack.c.bf16 %v732_v11, %v730_v61  ;;  %v1168_v26 = vadd.f32 %v1167_v18, %v5372_v43  ;;  %v1169_v29 = vpop.f32.mrb[5].mxu1 }
 0x1c8   :  { %v5417_v33 = vpack.c.bf16 %v733_v37, %v731_v48  ;;  %v1170_v42 = vadd.f32 %v1169_v29, %v5378_v45  ;;  %v589_v55 = vpop.f32.mrb[116].mxu0  ;;  %v1171_v27 = vpop.f32.mrb[6].mxu1 }
 0x1c9   :  { %v590_v22 = vadd.f32 %v589_v55, %v4827_v59  ;;  %v1172_v25 = vadd.f32 %v1171_v27, %v5372_v43  ;;  %v591_v28 = vpop.f32.mrb[117].mxu0  ;;  %v1173_v62 = vpop.f32.mrb[7].mxu1  ;;  %v1771_v47 = vmax.f32 %v1168_v26, 0.0 }
 0x1ca   :  { %v592_v4 = vadd.f32 %v591_v28, %v4831_v60  ;;  %v1174_v12 = vadd.f32 %v1173_v62, %v5378_v45  ;;  %v593_v17 = vpop.f32.mrb[118].mxu0  ;;  %3831 = vmatprep.mubr.msk.bf16.mxu1 %vm168_vm0, %v5417_v33  ;;  %v1772_v50 = vmax.f32 %v1170_v42, 0.0 }
 0x1cb   :  { %v1774_v57 = vmax.f32 %v1172_v25, 0.0  ;;  %v594_v49 = vadd.f32 %v593_v17, %v4827_v59  ;;  %v595_v41 = vpop.f32.mrb[119].mxu0  ;;  %1436 = vmatmul.mubr.bf16.gmra.mrb[112].mxu1 %v5414_v5  ;;  %v734_v54 = vmax.f32 %v590_v22, 0.0 }
 0x1cc   :  { %v1775_v30 = vmax.f32 %v1174_v12, 0.0  ;;  %v596_v58 = vadd.f32 %v595_v41, %v4831_v60  ;;  %v735_v1 = vmax.f32 %v592_v4, 0.0 }
 0x1cd   :  { %v5429_v46 = vpack.c.bf16 %v1774_v57, %v1771_v47  ;;  %v736_v40 = vmax.f32 %v594_v49, 0.0  ;;  %1701 = vmatmul.mubr.bf16.gmra.mrb[224].mxu0 %v5327_v2 }
 0x1ce   :  { %v737_v53 = vmax.f32 %v596_v58, 0.0  ;;  %v1177_v15 = vpop.f32.mrb[8].mxu1  ;;  %3860 = vmatprep.mubr.msk.bf16.mxu0 %vm168_vm0, %v5343_v16  ;;  %v5434_v19 = vpack.c.bf16 %v1775_v30, %v1772_v50 }
 0x1cf   :  { %v5436_v31 = vpack.c.bf16 %v736_v40, %v734_v54  ;;  %v1178_v35 = vadd.f32 %v1177_v15, %v5372_v43  ;;  %v1179_v44 = vpop.f32.mrb[9].mxu1 }
 0x1d0   :  { %v5439_v39 = vpack.c.bf16 %v737_v53, %v735_v1  ;;  %v1180_v36 = vadd.f32 %v1179_v44, %v5378_v45  ;;  %v599_v0 = vpop.f32.mrb[120].mxu0  ;;  %v1181_v10 = vpop.f32.mrb[10].mxu1 }
 0x1d1   :  { %v600_v2 = vadd.f32 %v599_v0, %v4827_v59  ;;  %v1182_v8 = vadd.f32 %v1181_v10, %v5372_v43  ;;  %v601_v14 = vpop.f32.mrb[121].mxu0  ;;  %v1183_v20 = vpop.f32.mrb[11].mxu1  ;;  %v1777_v11 = vmax.f32 %v1178_v35, 0.0 }
 0x1d2   :  { %v602_v16 = vadd.f32 %v601_v14, %v4831_v60  ;;  %v1184_v9 = vadd.f32 %v1183_v20, %v5378_v45  ;;  %v603_v61 = vpop.f32.mrb[122].mxu0  ;;  %3832 = vmatprep.mubr.msk.bf16.mxu1 %vm168_vm0, %v5439_v39  ;;  %v1778_v26 = vmax.f32 %v1180_v36, 0.0 }
 0x1d3   :  { %v1780_v48 = vmax.f32 %v1182_v8, 0.0  ;;  %v604_v37 = vadd.f32 %v603_v61, %v4827_v59  ;;  %v605_v18 = vpop.f32.mrb[123].mxu0  ;;  %1446 = vmatmul.mubr.bf16.gmra.mrb[116].mxu1 %v5436_v31  ;;  %v738_v55 = vmax.f32 %v600_v2, 0.0 }
 0x1d4   :  { %v1781_v29 = vmax.f32 %v1184_v9, 0.0  ;;  %v606_v42 = vadd.f32 %v605_v18, %v4831_v60  ;;  %v739_v25 = vmax.f32 %v602_v16, 0.0 }
 0x1d5   :  { %v5451_v27 = vpack.c.bf16 %v1780_v48, %v1777_v11  ;;  %v740_v22 = vmax.f32 %v604_v37, 0.0  ;;  %1709 = vmatmul.mubr.bf16.gmra.mrb[228].mxu0 %v5341_v34 }
 0x1d6   :  { %v741_v28 = vmax.f32 %v606_v42, 0.0  ;;  %v1187_v62 = vpop.f32.mrb[12].mxu1  ;;  %3861 = vmatprep.mubr.msk.bf16.mxu0 %vm168_vm0, %v5357_v6  ;;  %v1964_v4 = vpack.c.bf16 %v1781_v29, %v1778_v26  ;;  %v862_v6 = vsub.s32 2, %v4809_v52 }
 0x1d7   :  { %v5456_v12 = vpack.c.bf16 %v740_v22, %v738_v55  ;;  %v1188_v17 = vadd.f32 %v1187_v62, %v5372_v43  ;;  %v1189_v47 = vpop.f32.mrb[13].mxu1 }
 0x1d8   :  { %v5459_v57 = vpack.c.bf16 %v741_v28, %v739_v25  ;;  %v1190_v49 = vadd.f32 %v1189_v47, %v5378_v45  ;;  %v609_v41 = vpop.f32.mrb[124].mxu0  ;;  %v1191_v50 = vpop.f32.mrb[14].mxu1  ;;  %v5474_v20 = vrot.slane %v5362_v63, %v862_v6 }
 0x1d9   :  { %v610_v34 = vadd.f32 %v609_v41, %v4827_v59  ;;  %v1192_v30 = vadd.f32 %v1191_v50, %v5372_v43  ;;  %v611_v58 = vpop.f32.mrb[125].mxu0  ;;  %v1193_v54 = vpop.f32.mrb[15].mxu1  ;;  %v1783_v15 = vmax.f32 %v1188_v17, 0.0 }
 0x1da   :  { %v612_v40 = vadd.f32 %v611_v58, %v4831_v60  ;;  %v1194_v1 = vadd.f32 %v1193_v54, %v5378_v45  ;;  %v613_v53 = vpop.f32.mrb[126].mxu0  ;;  %3833 = vmatprep.mubr.msk.bf16.mxu1 %vm168_vm0, %v5459_v57  ;;  %v1784_v0 = vmax.f32 %v1190_v49, 0.0 }
 0x1db   :  { %v1786_v35 = vmax.f32 %v1192_v30, 0.0  ;;  %v614_v44 = vadd.f32 %v613_v53, %v4827_v59  ;;  %v615_v36 = vpop.f32.mrb[127].mxu0  ;;  %1456 = vmatmul.mubr.bf16.gmra.mrb[120].mxu1 %v5456_v12  ;;  %v742_v8 = vmax.f32 %v610_v34, 0.0 }
 0x1dc   :  { %v1787_v10 = vmax.f32 %v1194_v1, 0.0  ;;  %v616_v2 = vadd.f32 %v615_v36, %v4831_v60  ;;  %v743_v9 = vmax.f32 %v612_v40, 0.0 }
 0x1dd   :  { %v744_v14 = vmax.f32 %v614_v44, 0.0  ;;  %1717 = vmatmul.mubr.bf16.gmra.mrb[232].mxu0 %v5355_v32  ;;  %v5476_v16 = vpack.c.bf16 %v1786_v35, %v1783_v15 }
 0x1de   :  { %v745_v61 = vmax.f32 %v616_v2, 0.0  ;;  %v1197_v11 = vpop.f32.mrb[16].mxu1  ;;  %3862 = vmatprep.mubr.msk.bf16.mxu0 %vm168_vm0, %v5392_v7  ;;  %v1967_v59 = vpack.c.bf16 %v1787_v10, %v1784_v0 }
 0x1df   :  { %v5480_v48 = vpack.c.bf16 %v744_v14, %v742_v8  ;;  %v1198_v60 = vadd.f32 %v1197_v11, %v5372_v43  ;;  %v1199_v37 = vpop.f32.mrb[17].mxu1 }
 0x1e0   :  { %v5483_v18 = vpack.c.bf16 %v745_v61, %v743_v9  ;;  %v1200_v32 = vadd.f32 %v1199_v37, %v5378_v45  ;;  %v1201_v63 = vpop.f32.mrb[18].mxu1  ;;  %v1510_v26 = vpop.f32.mrb[128].mxu0 }
 0x1e1   :  { %v1202_v29 = vadd.f32 %v1201_v63, %v5372_v43  ;;  %v1511_v42 = vadd.f32 %v1510_v26, %v5474_v20  ;;  %v1203_v55 = vpop.f32.mrb[19].mxu1  ;;  %v1512_v22 = vpop.f32.mrb[129].mxu0  ;;  %v1789_v28 = vmax.f32 %v1198_v60, 0.0 }
 0x1e2   :  { %v1204_v7 = vadd.f32 %v1203_v55, %v5378_v45  ;;  %3834 = vmatprep.mubr.msk.bf16.mxu1 %vm168_vm0, %v5483_v18  ;;  %v1513_v25 = vpop.f32.mrb[130].mxu0  ;;  %v1790_v49 = vmax.f32 %v1200_v32, 0.0 }
 0x1e3   :  { %v1792_v62 = vmax.f32 %v1202_v29, 0.0  ;;  %v1514_v17 = vadd.f32 %v1513_v25, %v5474_v20  ;;  %1466 = vmatmul.mubr.bf16.gmra.mrb[124].mxu1 %v5480_v48  ;;  %v1515_v47 = vpop.f32.mrb[131].mxu0  ;;  %v1767_v50 = vmax.f32 %v1511_v42, 0.0 }
 0x1e4   :  { %v1793_v41 = vmax.f32 %v1204_v7, 0.0  ;;  %2365 = vmatprep.mubr.bf16.mxu1 %v1964_v4 }
 0x1e5   :  { %v1770_v34 = vmax.f32 %v1514_v17, 0.0  ;;  %1725 = vmatmul.mubr.bf16.gmra.mrb[236].mxu0 %v5383_v13  ;;  %v5494_v30 = vpack.c.bf16 %v1792_v62, %v1789_v28 }
 0x1e6   :  { %v1207_v58 = vpop.f32.mrb[20].mxu1  ;;  %3863 = vmatprep.mubr.msk.bf16.mxu0 %vm168_vm0, %v5417_v33  ;;  %v1970_v54 = vpack.c.bf16 %v1793_v41, %v1790_v49 }
 0x1e7   :  { %v5498_v6 = vpack.c.bf16 %v1770_v34, %v1767_v50  ;;  %v1208_v40 = vadd.f32 %v1207_v58, %v5372_v43  ;;  %v1209_v1 = vpop.f32.mrb[21].mxu1 }
 0x1e8   :  { %v1210_v53 = vadd.f32 %v1209_v1, %v5378_v45  ;;  %v1211_v15 = vpop.f32.mrb[22].mxu1  ;;  %v1518_v4 = vpop.f32.mrb[132].mxu0 }
 0x1e9   :  { %v1212_v35 = vadd.f32 %v1211_v15, %v5372_v43  ;;  %v1519_v13 = vadd.f32 %v1518_v4, %v5474_v20  ;;  %v1213_v44 = vpop.f32.mrb[23].mxu1  ;;  %v1520_v36 = vpop.f32.mrb[133].mxu0  ;;  %v1795_v33 = vmax.f32 %v1208_v40, 0.0 }
 0x1ea   :  { %v1214_v0 = vadd.f32 %v1213_v44, %v5378_v45  ;;  %v1521_v10 = vpop.f32.mrb[134].mxu0  ;;  %v1796_v9 = vmax.f32 %v1210_v53, 0.0 }
 0x1eb   :  { %v1798_v2 = vmax.f32 %v1212_v35, 0.0  ;;  %v1522_v8 = vadd.f32 %v1521_v10, %v5474_v20  ;;  %v1523_v14 = vpop.f32.mrb[135].mxu0  ;;  %2366 = vmatmul.mubr.bf16.vlgmr.msra.gmra.mrb[128].mxu1 %v5451_v27  ;;  %v1773_v11 = vmax.f32 %v1519_v13, 0.0 }
 0x1ec   :  { %v1799_v61 = vmax.f32 %v1214_v0, 0.0  ;;  %2373 = vmatprep.mubr.bf16.mxu1 %v1967_v59  ;;  %4285 = vmatpush3.bf16.msra.mxu1 %v5395_v38  ;;  %v2961_v38 = vld [vmem:[%s6061_s7 + $0x10] sm:$0xff] }
 0x1ed   :  { %v1776_v60 = vmax.f32 %v1522_v8, 0.0  ;;  %1733 = vmatmul.mubr.bf16.gmra.mrb[240].mxu0 %v5414_v5  ;;  %v5509_v37 = vpack.c.bf16 %v1798_v2, %v1795_v33  ;;  %v2962_v5 = vld [vmem:[%s6061_s7 + $0x18] sm:$0xff] }
 0x1ee   :  { %v1217_v32 = vpop.f32.mrb[24].mxu1  ;;  %3864 = vmatprep.mubr.msk.bf16.mxu0 %vm168_vm0, %v5439_v39  ;;  %v1973_v63 = vpack.c.bf16 %v1799_v61, %v1796_v9  ;;  %v4286_v22 = vpack.c.bf16 %v2962_v5, %v2961_v38 }
 0x1ef   :  { %v5513_v26 = vpack.c.bf16 %v1776_v60, %v1773_v11  ;;  %v1218_v27 = vadd.f32 %v1217_v32, %v5372_v43  ;;  %v1219_v29 = vpop.f32.mrb[25].mxu1 }
 0x1f0   :  { %v1220_v59 = vadd.f32 %v1219_v29, %v5378_v45  ;;  %v1221_v42 = vpop.f32.mrb[26].mxu1  ;;  %v1526_v55 = vpop.f32.mrb[136].mxu0  ;;  %4287 = vmatprep.subr.bf16.mxu1 %v4286_v22 }
 0x1f1   :  { %v1222_v39 = vadd.f32 %v1221_v42, %v5372_v43  ;;  %v1527_v7 = vadd.f32 %v1526_v55, %v5474_v20  ;;  %v1223_v25 = vpop.f32.mrb[27].mxu1  ;;  %v1528_v28 = vpop.f32.mrb[137].mxu0  ;;  %v1801_v47 = vmax.f32 %v1218_v27, 0.0  ;;  %4289 = vmatpush3.bf16.msra.mxu1 %v4286_v22 }
 0x1f2   :  { %v1224_v62 = vadd.f32 %v1223_v25, %v5378_v45  ;;  %v1529_v17 = vpop.f32.mrb[138].mxu0  ;;  %v1802_v34 = vmax.f32 %v1220_v59, 0.0 }
 0x1f3   :  { %v1804_v49 = vmax.f32 %v1222_v39, 0.0  ;;  %v1530_v41 = vadd.f32 %v1529_v17, %v5474_v20  ;;  %v1531_v50 = vpop.f32.mrb[139].mxu0  ;;  %2374 = vmatmul.mubr.bf16.gmra.mrb[132].mxu1 %v5476_v16  ;;  %v1779_v40 = vmax.f32 %v1527_v7, 0.0 }
 0x1f4   :  { %v1805_v58 = vmax.f32 %v1224_v62, 0.0  ;;  %2381 = vmatprep.mubr.bf16.mxu1 %v1970_v54 }
 0x1f5   :  { %v1782_v1 = vmax.f32 %v1530_v41, 0.0  ;;  %1741 = vmatmul.mubr.bf16.gmra.mrb[244].mxu0 %v5436_v31  ;;  %v5529_v53 = vpack.c.bf16 %v1804_v49, %v1801_v47 }
 0x1f6   :  { %v1227_v15 = vpop.f32.mrb[28].mxu1  ;;  %3865 = vmatprep.mubr.msk.bf16.mxu0 %vm168_vm0, %v5459_v57  ;;  %v1976_v4 = vpack.c.bf16 %v1805_v58, %v1802_v34 }
 0x1f7   :  { %v5533_v35 = vpack.c.bf16 %v1782_v1, %v1779_v40  ;;  %v1228_v13 = vadd.f32 %v1227_v15, %v5372_v43  ;;  %v1229_v16 = vpop.f32.mrb[29].mxu1 }
 0x1f8   :  { %v1230_v44 = vadd.f32 %v1229_v16, %v5378_v45  ;;  %v1231_v54 = vpop.f32.mrb[30].mxu1  ;;  %v1534_v36 = vpop.f32.mrb[140].mxu0 }
 0x1f9   :  { %v1232_v0 = vadd.f32 %v1231_v54, %v5372_v43  ;;  %v1535_v31 = vadd.f32 %v1534_v36, %v5474_v20  ;;  %v1233_v10 = vpop.f32.mrb[31].mxu1  ;;  %v1536_v33 = vpop.f32.mrb[141].mxu0  ;;  %v1807_v57 = vmax.f32 %v1228_v13, 0.0 }
 0x1fa   :  { %v1234_v2 = vadd.f32 %v1233_v10, %v5378_v45  ;;  %v1537_v8 = vpop.f32.mrb[142].mxu0  ;;  %v1808_v11 = vmax.f32 %v1230_v44, 0.0 }
 0x1fb   :  { %v1810_v14 = vmax.f32 %v1232_v0, 0.0  ;;  %v1538_v9 = vadd.f32 %v1537_v8, %v5474_v20  ;;  %v1539_v61 = vpop.f32.mrb[143].mxu0  ;;  %2382 = vmatmul.mubr.bf16.gmra.mrb[136].mxu1 %v5494_v30  ;;  %v1785_v32 = vmax.f32 %v1535_v31, 0.0 }
 0x1fc   :  { %v1811_v60 = vmax.f32 %v1234_v2, 0.0  ;;  %2389 = vmatprep.mubr.bf16.mxu1 %v1973_v63 }
 0x1fd   :  { %v1788_v27 = vmax.f32 %v1538_v9, 0.0  ;;  %1749 = vmatmul.mubr.bf16.gmra.mrb[248].mxu0 %v5456_v12  ;;  %v5543_v29 = vpack.c.bf16 %v1810_v14, %v1807_v57  ;;  %v4402_v14 = vld [vmem:[%s6059_s5 + $0x88] sm:$0xff]  }
 0x1fe   :  { %v1237_v38 = vpop.f32.mrb[32].mxu1  ;;  %3866 = vmatprep.mubr.msk.bf16.mxu0 %vm168_vm0, %v5483_v18  ;;  %v1979_v5 = vpack.c.bf16 %v1811_v60, %v1808_v11 }
 0x1ff   :  { %v5547_v59 = vpack.c.bf16 %v1788_v27, %v1785_v32  ;;  %v1238_v42 = vadd.f32 %v1237_v38, %v5372_v43  ;;  %v1239_v55 = vpop.f32.mrb[33].mxu1 }
 0x200   :  { %v1240_v30 = vadd.f32 %v1239_v55, %v5378_v45  ;;  %v1241_v22 = vpop.f32.mrb[34].mxu1  ;;  %v1542_v63 = vpop.f32.mrb[144].mxu0 }
 0x201   :  { %v1242_v39 = vadd.f32 %v1241_v22, %v5372_v43  ;;  %v1543_v12 = vadd.f32 %v1542_v63, %v5474_v20  ;;  %v1243_v7 = vpop.f32.mrb[35].mxu1  ;;  %v1544_v25 = vpop.f32.mrb[145].mxu0  ;;  %v1813_v18 = vmax.f32 %v1238_v42, 0.0 }
 0x202   :  { %v1244_v28 = vadd.f32 %v1243_v7, %v5378_v45  ;;  %v1545_v62 = vpop.f32.mrb[146].mxu0  ;;  %v1814_v41 = vmax.f32 %v1240_v30, 0.0 }
 0x203   :  { %v1816_v17 = vmax.f32 %v1242_v39, 0.0  ;;  %v1546_v47 = vadd.f32 %v1545_v62, %v5474_v20  ;;  %v1547_v49 = vpop.f32.mrb[147].mxu0  ;;  %2390 = vmatmul.mubr.bf16.gmra.mrb[140].mxu1 %v5509_v37  ;;  %v1791_v34 = vmax.f32 %v1543_v12, 0.0 }
 0x204   :  { %v1817_v50 = vmax.f32 %v1244_v28, 0.0  ;;  %2397 = vmatprep.mubr.bf16.mxu1 %v1976_v4 }
 0x205   :  { %v1794_v58 = vmax.f32 %v1546_v47, 0.0  ;;  %1757 = vmatmul.mubr.bf16.gmra.mrb[252].mxu0 %v5480_v48  ;;  %v5557_v40 = vpack.c.bf16 %v1816_v17, %v1813_v18  ;;  %v4404_v17 = vld [vmem:[%s6059_s5 + $0x98] sm:$0xff]  }
 0x206   :  { %v1247_v1 = vpop.f32.mrb[36].mxu1  ;;  %2349 = vmatprep.mubr.bf16.mxu0 %v5412_v24  ;;  %v1982_v15 = vpack.c.bf16 %v1817_v50, %v1814_v41 }
 0x207   :  { %v5560_v13 = vpack.c.bf16 %v1794_v58, %v1791_v34  ;;  %v1248_v16 = vadd.f32 %v1247_v1, %v5372_v43  ;;  %v1249_v44 = vpop.f32.mrb[37].mxu1 }
 0x208   :  { %v1250_v37 = vadd.f32 %v1249_v44, %v5378_v45  ;;  %v1251_v54 = vpop.f32.mrb[38].mxu1  ;;  %v1550_v36 = vpop.f32.mrb[148].mxu0 }
 0x209   :  { %v1252_v4 = vadd.f32 %v1251_v54, %v5372_v43  ;;  %v1551_v0 = vadd.f32 %v1550_v36, %v5474_v20  ;;  %v1253_v48 = vpop.f32.mrb[39].mxu1  ;;  %v1552_v31 = vpop.f32.mrb[149].mxu0  ;;  %v1819_v24 = vmax.f32 %v1248_v16, 0.0 }
 0x20a   :  { %v1254_v10 = vadd.f32 %v1253_v48, %v5378_v45  ;;  %v1553_v33 = vpop.f32.mrb[150].mxu0  ;;  %v1820_v9 = vmax.f32 %v1250_v37, 0.0 }
 0x20b   :  { %v1822_v2 = vmax.f32 %v1252_v4, 0.0  ;;  %v1554_v8 = vadd.f32 %v1553_v33, %v5474_v20  ;;  %v1555_v57 = vpop.f32.mrb[151].mxu0  ;;  %2398 = vmatmul.mubr.bf16.gmra.mrb[144].mxu1 %v5529_v53  ;;  %v1797_v11 = vmax.f32 %v1551_v0, 0.0 }
 0x20c   :  { %v1823_v61 = vmax.f32 %v1254_v10, 0.0  ;;  %2405 = vmatprep.mubr.bf16.mxu1 %v1979_v5  ;;  %v4403_v5 = vld [vmem:[%s6059_s5 + $0x90] sm:$0xff]  }
 0x20d   :  { %v1800_v60 = vmax.f32 %v1554_v8, 0.0  ;;  %2350 = vmatmul.mubr.bf16.vlgmr.msra.gmra.mrb[0].mxu0 %v5407_v23  ;;  %v5573_v32 = vpack.c.bf16 %v1822_v2, %v1819_v24 }
 0x20e   :  { %v1257_v27 = vpop.f32.mrb[40].mxu1  ;;  %2357 = vmatprep.mubr.bf16.mxu0 %v5434_v19  ;;  %4095 = vmatpush3.bf16.msra.mxu0 %v5278_v21  ;;  %v1985_v38 = vpack.c.bf16 %v1823_v61, %v1820_v9 }
 0x20f   :  { %v5577_v53 = vpack.c.bf16 %v1800_v60, %v1797_v11  ;;  %v1258_v42 = vadd.f32 %v1257_v27, %v5372_v43  ;;  %v1259_v55 = vpop.f32.mrb[41].mxu1  ;;  %4096 = vmatprep.subr.bf16.mxu0 %v4402_v14 }
 0x210   :  { %v1260_v23 = vadd.f32 %v1259_v55, %v5378_v45  ;;  %v1261_v30 = vpop.f32.mrb[42].mxu1  ;;  %v1558_v22 = vpop.f32.mrb[152].mxu0 }
 0x211   :  { %v1262_v63 = vadd.f32 %v1261_v30, %v5372_v43  ;;  %v1559_v19 = vadd.f32 %v1558_v22, %v5474_v20  ;;  %v1263_v21 = vpop.f32.mrb[43].mxu1  ;;  %v1560_v39 = vpop.f32.mrb[153].mxu0  ;;  %v1825_v25 = vmax.f32 %v1258_v42, 0.0 }
 0x212   :  { %v1264_v12 = vadd.f32 %v1263_v21, %v5378_v45  ;;  %v1561_v7 = vpop.f32.mrb[154].mxu0  ;;  %4097 = vmatpush3.bf16.msra.mxu0 %v4402_v14  ;;  %v1826_v47 = vmax.f32 %v1260_v23, 0.0 }
 0x213   :  { %v1828_v28 = vmax.f32 %v1262_v63, 0.0  ;;  %v1562_v62 = vadd.f32 %v1561_v7, %v5474_v20  ;;  %v1563_v18 = vpop.f32.mrb[155].mxu0  ;;  %2406 = vmatmul.mubr.bf16.gmra.mrb[148].mxu1 %v5543_v29  ;;  %4098 = vmatprep.subr.bf16.mxu0 %v4403_v5  ;;  %v1803_v41 = vmax.f32 %v1559_v19, 0.0 }
 0x214   :  { %v1829_v49 = vmax.f32 %v1264_v12, 0.0  ;;  %2413 = vmatprep.mubr.bf16.mxu1 %v1982_v15 }
 0x215   :  { %v1806_v50 = vmax.f32 %v1562_v62, 0.0  ;;  %2358 = vmatmul.mubr.bf16.gmra.mrb[4].mxu0 %v5429_v46  ;;  %v5593_v34 = vpack.c.bf16 %v1828_v28, %v1825_v25 }
 0x216   :  { %v1267_v58 = vpop.f32.mrb[44].mxu1  ;;  %4099 = vmatpush3.bf16.msra.mxu0 %v4403_v5  ;;  %4102 = vmatprep.mubr.msk.bf16.mxu0 %vm2220_vm1, %v5498_v6  ;;  %v1988_v29 = vpack.c.bf16 %v1829_v49, %v1826_v47 }
 0x217   :  { %v5597_v1 = vpack.c.bf16 %v1806_v50, %v1803_v41  ;;  %v1268_v16 = vadd.f32 %v1267_v58, %v5372_v43  ;;  %v1269_v44 = vpop.f32.mrb[45].mxu1  ;;  %4100 = vmatprep.subr.bf16.mxu0 %v4404_v17 }
 0x218   :  { %v1270_v15 = vadd.f32 %v1269_v44, %v5378_v45  ;;  %v1271_v37 = vpop.f32.mrb[46].mxu1  ;;  %v1566_v54 = vpop.f32.mrb[156].mxu0 }
 0x219   :  { %v1272_v46 = vadd.f32 %v1271_v37, %v5372_v43  ;;  %v1567_v36 = vadd.f32 %v1566_v54, %v5474_v20  ;;  %v1273_v4 = vpop.f32.mrb[47].mxu1  ;;  %v1568_v0 = vpop.f32.mrb[157].mxu0  ;;  %v1831_v31 = vmax.f32 %v1268_v16, 0.0 }
 0x21a   :  { %v1274_v48 = vadd.f32 %v1273_v4, %v5378_v45  ;;  %v1569_v6 = vpop.f32.mrb[158].mxu0  ;;  %4101 = vmatpush3.bf16.msra.mxu0 %v4404_v17  ;;  %v1832_v2 = vmax.f32 %v1270_v15, 0.0 }
 0x21b   :  { %v1834_v10 = vmax.f32 %v1272_v46, 0.0  ;;  %v1570_v33 = vadd.f32 %v1569_v6, %v5474_v20  ;;  %v1571_v24 = vpop.f32.mrb[159].mxu0  ;;  %2414 = vmatmul.mubr.bf16.gmra.mrb[152].mxu1 %v5557_v40  ;;  %v1809_v57 = vmax.f32 %v1567_v36, 0.0 }
 0x21c   :  { %v1835_v8 = vmax.f32 %v1274_v48, 0.0  ;;  %2421 = vmatprep.mubr.bf16.mxu1 %v1985_v38  ;;  %v2963_v38 = vld [vmem:[%s6061_s7 + $0x20] sm:$0xff] }
 0x21d   :  { %v1812_v14 = vmax.f32 %v1570_v33, 0.0  ;;  %4103 = vmatmul.mubr.msk.bf16.vlgmr.msra.gmra.mrb[8].mxu0 %vm2220_vm1, %v5513_v26  ;;  %v5608_v9 = vpack.c.bf16 %v1834_v10, %v1831_v31  ;;  %v2964_v26 = vld [vmem:[%s6061_s7 + $0x28] sm:$0xff] }
 0x21e   :  { %v1277_v61 = vpop.f32.mrb[48].mxu1  ;;  %4106 = vmatprep.mubr.msk.bf16.mxu0 %vm2220_vm1, %v5533_v35  ;;  %v1991_v11 = vpack.c.bf16 %v1835_v8, %v1832_v2  ;;  %v4290_v23 = vpack.c.bf16 %v2964_v26, %v2963_v38 }
 0x21f   :  { %v5612_v60 = vpack.c.bf16 %v1812_v14, %v1809_v57  ;;  %v1278_v27 = vadd.f32 %v1277_v61, %v5372_v43  ;;  %v1279_v40 = vpop.f32.mrb[49].mxu1 }
 0x220   :  { %v1280_v42 = vadd.f32 %v1279_v40, %v5378_v45  ;;  %v1281_v55 = vpop.f32.mrb[50].mxu1  ;;  %v1574_v5 = vpop.f32.mrb[160].mxu0  ;;  %4291 = vmatprep.subr.bf16.mxu1 %v4290_v23 }
 0x221   :  { %v1282_v35 = vadd.f32 %v1281_v55, %v5372_v43  ;;  %v1575_v30 = vadd.f32 %v1574_v5, %v5474_v20  ;;  %v1283_v22 = vpop.f32.mrb[51].mxu1  ;;  %v1576_v63 = vpop.f32.mrb[161].mxu0  ;;  %v1837_v39 = vmax.f32 %v1278_v27, 0.0  ;;  %4293 = vmatpush3.bf16.msra.mxu1 %v4290_v23 }
 0x222   :  { %v1284_v19 = vadd.f32 %v1283_v22, %v5378_v45  ;;  %v1577_v21 = vpop.f32.mrb[162].mxu0  ;;  %v1838_v28 = vmax.f32 %v1280_v42, 0.0 }
 0x223   :  { %v1840_v12 = vmax.f32 %v1282_v35, 0.0  ;;  %v1578_v7 = vadd.f32 %v1577_v21, %v5474_v20  ;;  %v1579_v25 = vpop.f32.mrb[163].mxu0  ;;  %2422 = vmatmul.mubr.bf16.gmra.mrb[156].mxu1 %v5573_v32  ;;  %v1815_v18 = vmax.f32 %v1575_v30, 0.0 }
 0x224   :  { %v1841_v62 = vmax.f32 %v1284_v19, 0.0  ;;  %2429 = vmatprep.mubr.bf16.mxu1 %v1988_v29 }
 0x225   :  { %v1818_v17 = vmax.f32 %v1578_v7, 0.0  ;;  %4107 = vmatmul.mubr.msk.bf16.gmra.mrb[12].mxu0 %vm2220_vm1, %v5547_v59  ;;  %v5629_v47 = vpack.c.bf16 %v1840_v12, %v1837_v39 }
 0x226   :  { %v1287_v49 = vpop.f32.mrb[52].mxu1  ;;  %4110 = vmatprep.mubr.msk.bf16.mxu0 %vm2220_vm1, %v5560_v13  ;;  %v1994_v41 = vpack.c.bf16 %v1841_v62, %v1838_v28 }
 0x227   :  { %v1983_v50 = vpack.c.bf16 %v1818_v17, %v1815_v18  ;;  %v1288_v58 = vadd.f32 %v1287_v49, %v5372_v43  ;;  %v1289_v32 = vpop.f32.mrb[53].mxu1 }
 0x228   :  { %v1290_v16 = vadd.f32 %v1289_v32, %v5378_v45  ;;  %v1291_v29 = vpop.f32.mrb[54].mxu1  ;;  %v1582_v44 = vpop.f32.mrb[164].mxu0 }
 0x229   :  { %v1292_v15 = vadd.f32 %v1291_v29, %v5372_v43  ;;  %v1583_v37 = vadd.f32 %v1582_v44, %v5474_v20  ;;  %v1293_v59 = vpop.f32.mrb[55].mxu1  ;;  %v1584_v54 = vpop.f32.mrb[165].mxu0  ;;  %v1843_v4 = vmax.f32 %v1288_v58, 0.0 }
 0x22a   :  { %v1294_v46 = vadd.f32 %v1293_v59, %v5378_v45  ;;  %v1585_v36 = vpop.f32.mrb[166].mxu0  ;;  %v1844_v6 = vmax.f32 %v1290_v16, 0.0 }
 0x22b   :  { %v1846_v13 = vmax.f32 %v1292_v15, 0.0  ;;  %v1586_v0 = vadd.f32 %v1585_v36, %v5474_v20  ;;  %v1587_v48 = vpop.f32.mrb[167].mxu0  ;;  %2430 = vmatmul.mubr.bf16.gmra.mrb[160].mxu1 %v5593_v34  ;;  %v1821_v10 = vmax.f32 %v1583_v37, 0.0 }
 0x22c   :  { %v1847_v31 = vmax.f32 %v1294_v46, 0.0  ;;  %2437 = vmatprep.mubr.bf16.mxu1 %v1991_v11 }
 0x22d   :  { %v1824_v33 = vmax.f32 %v1586_v0, 0.0  ;;  %4111 = vmatmul.mubr.msk.bf16.gmra.mrb[16].mxu0 %vm2220_vm1, %v5577_v53  ;;  %v5642_v24 = vpack.c.bf16 %v1846_v13, %v1843_v4 }
 0x22e   :  { %v1297_v2 = vpop.f32.mrb[56].mxu1  ;;  %4114 = vmatprep.mubr.msk.bf16.mxu0 %vm2220_vm1, %v5597_v1  ;;  %v1997_v8 = vpack.c.bf16 %v1847_v31, %v1844_v6 }
 0x22f   :  { %v1986_v57 = vpack.c.bf16 %v1824_v33, %v1821_v10  ;;  %v1298_v14 = vadd.f32 %v1297_v2, %v5372_v43  ;;  %v1299_v61 = vpop.f32.mrb[57].mxu1 }
 0x230   :  { %v1300_v34 = vadd.f32 %v1299_v61, %v5378_v45  ;;  %v1301_v27 = vpop.f32.mrb[58].mxu1  ;;  %v1590_v11 = vpop.f32.mrb[168].mxu0 }
 0x231   :  { %v1302_v40 = vadd.f32 %v1301_v27, %v5372_v43  ;;  %v1591_v38 = vadd.f32 %v1590_v11, %v5474_v20  ;;  %v1303_v53 = vpop.f32.mrb[59].mxu1  ;;  %v1592_v26 = vpop.f32.mrb[169].mxu0  ;;  %v1849_v5 = vmax.f32 %v1298_v14, 0.0 }
 0x232   :  { %v1304_v42 = vadd.f32 %v1303_v53, %v5378_v45  ;;  %v1593_v55 = vpop.f32.mrb[170].mxu0  ;;  %v1850_v30 = vmax.f32 %v1300_v34, 0.0 }
 0x233   :  { %v1852_v1 = vmax.f32 %v1302_v40, 0.0  ;;  %v1594_v23 = vadd.f32 %v1593_v55, %v5474_v20  ;;  %v1595_v35 = vpop.f32.mrb[171].mxu0  ;;  %2438 = vmatmul.mubr.bf16.gmra.mrb[164].mxu1 %v5608_v9  ;;  %v1827_v19 = vmax.f32 %v1591_v38, 0.0 }
 0x234   :  { %v1853_v22 = vmax.f32 %v1304_v42, 0.0  ;;  %2445 = vmatprep.mubr.bf16.mxu1 %v1994_v41 }
 0x235   :  { %v5653_v63 = vpack.c.bf16 %v1852_v1, %v1849_v5  ;;  %v1830_v21 = vmax.f32 %v1594_v23, 0.0  ;;  %4115 = vmatmul.mubr.msk.bf16.gmra.mrb[20].mxu0 %vm2220_vm1, %v5612_v60 }
 0x236   :  { %v2000_v39 = vpack.c.bf16 %v1853_v22, %v1850_v30  ;;  %v1307_v12 = vpop.f32.mrb[60].mxu1  ;;  %4118 = vmatprep.mubr.msk.bf16.mxu0 %vm2220_vm1, %v1983_v50 }
 0x237   :  { %v1989_v7 = vpack.c.bf16 %v1830_v21, %v1827_v19  ;;  %v1308_v25 = vadd.f32 %v1307_v12, %v5372_v43  ;;  %v1309_v28 = vpop.f32.mrb[61].mxu1 }
 0x238   :  { %v1310_v9 = vadd.f32 %v1309_v28, %v5378_v45  ;;  %v1311_v62 = vpop.f32.mrb[62].mxu1  ;;  %v1598_v18 = vpop.f32.mrb[172].mxu0 }
 0x239   :  { %v1312_v17 = vadd.f32 %v1311_v62, %v5372_v43  ;;  %v1599_v49 = vadd.f32 %v1598_v18, %v5474_v20  ;;  %v1313_v41 = vpop.f32.mrb[63].mxu1  ;;  %v1600_v58 = vpop.f32.mrb[173].mxu0  ;;  %v1855_v16 = vmax.f32 %v1308_v25, 0.0 }
 0x23a   :  { %v1314_v60 = vadd.f32 %v1313_v41, %v5378_v45  ;;  %v1601_v32 = vpop.f32.mrb[174].mxu0  ;;  %v1856_v15 = vmax.f32 %v1310_v9, 0.0 }
 0x23b   :  { %v1858_v29 = vmax.f32 %v1312_v17, 0.0  ;;  %v1602_v50 = vadd.f32 %v1601_v32, %v5474_v20  ;;  %v1603_v44 = vpop.f32.mrb[175].mxu0  ;;  %2446 = vmatmul.mubr.bf16.gmra.mrb[168].mxu1 %v5629_v47  ;;  %v1833_v54 = vmax.f32 %v1599_v49, 0.0 }
 0x23c   :  { %v1859_v37 = vmax.f32 %v1314_v60, 0.0  ;;  %2453 = vmatprep.mubr.bf16.mxu1 %v1997_v8 }
 0x23d   :  { %v5665_v59 = vpack.c.bf16 %v1858_v29, %v1855_v16  ;;  %v1836_v46 = vmax.f32 %v1602_v50, 0.0  ;;  %4119 = vmatmul.mubr.msk.bf16.gmra.mrb[24].mxu0 %vm2220_vm1, %v1986_v57 }
 0x23e   :  { %v2003_v36 = vpack.c.bf16 %v1859_v37, %v1856_v15  ;;  %v1317_v4 = vpop.f32.mrb[64].mxu1  ;;  %4122 = vmatprep.mubr.msk.bf16.mxu0 %vm2220_vm1, %v1989_v7  ;;  %v2965_v15 = vld [vmem:[%s6061_s7 + $0x30] sm:$0xff] }
 0x23f   :  { %v1992_v13 = vpack.c.bf16 %v1836_v46, %v1833_v54  ;;  %v1318_v0 = vadd.f32 %v1317_v4, %v5372_v43  ;;  %v1319_v48 = vpop.f32.mrb[65].mxu1 }
 0x240   :  { %v1320_v6 = vadd.f32 %v1319_v48, %v5378_v45  ;;  %v1321_v47 = vpop.f32.mrb[66].mxu1  ;;  %v1606_v31 = vpop.f32.mrb[176].mxu0 }
 0x241   :  { %v1322_v10 = vadd.f32 %v1321_v47, %v5372_v43  ;;  %v1607_v33 = vadd.f32 %v1606_v31, %v5474_v20  ;;  %v1323_v2 = vpop.f32.mrb[67].mxu1  ;;  %v1608_v8 = vpop.f32.mrb[177].mxu0  ;;  %v1861_v61 = vmax.f32 %v1318_v0, 0.0 }
 0x242   :  { %v1324_v57 = vadd.f32 %v1323_v2, %v5378_v45  ;;  %v1609_v14 = vpop.f32.mrb[178].mxu0  ;;  %v1862_v40 = vmax.f32 %v1320_v6, 0.0 }
 0x243   :  { %v1864_v34 = vmax.f32 %v1322_v10, 0.0  ;;  %v1610_v27 = vadd.f32 %v1609_v14, %v5474_v20  ;;  %v1611_v11 = vpop.f32.mrb[179].mxu0  ;;  %2454 = vmatmul.mubr.bf16.gmra.mrb[172].mxu1 %v5642_v24  ;;  %v1839_v26 = vmax.f32 %v1607_v33, 0.0 }
 0x244   :  { %v1865_v38 = vmax.f32 %v1324_v57, 0.0  ;;  %2461 = vmatprep.mubr.bf16.mxu1 %v2000_v39 }
 0x245   :  { %v5676_v53 = vpack.c.bf16 %v1864_v34, %v1861_v61  ;;  %v1842_v42 = vmax.f32 %v1610_v27, 0.0  ;;  %4123 = vmatmul.mubr.msk.bf16.gmra.mrb[28].mxu0 %vm2220_vm1, %v1992_v13 }
 0x246   :  { %v2006_v55 = vpack.c.bf16 %v1865_v38, %v1862_v40  ;;  %v1327_v5 = vpop.f32.mrb[68].mxu1 }
 0x247   :  { %v1995_v1 = vpack.c.bf16 %v1842_v42, %v1839_v26  ;;  %v1328_v23 = vadd.f32 %v1327_v5, %v5372_v43  ;;  %v1329_v35 = vpop.f32.mrb[69].mxu1 }
 0x248   :  { %v1330_v30 = vadd.f32 %v1329_v35, %v5378_v45  ;;  %v1331_v22 = vpop.f32.mrb[70].mxu1  ;;  %v1614_v19 = vpop.f32.mrb[180].mxu0 }
 0x249   :  { %v1332_v24 = vadd.f32 %v1331_v22, %v5372_v43  ;;  %v1615_v21 = vadd.f32 %v1614_v19, %v5474_v20  ;;  %v1333_v39 = vpop.f32.mrb[71].mxu1  ;;  %v1616_v12 = vpop.f32.mrb[181].mxu0  ;;  %4126 = vmatprep.mubr.msk.bf16.mxu0 %vm2220_vm1, %v1995_v1  ;;  %v1867_v28 = vmax.f32 %v1328_v23, 0.0 }
 0x24a   :  { %v1334_v7 = vadd.f32 %v1333_v39, %v5378_v45  ;;  %v1617_v25 = vpop.f32.mrb[182].mxu0  ;;  %v1868_v17 = vmax.f32 %v1330_v30, 0.0 }
 0x24b   :  { %v1870_v9 = vmax.f32 %v1332_v24, 0.0  ;;  %v1618_v62 = vadd.f32 %v1617_v25, %v5474_v20  ;;  %v1619_v18 = vpop.f32.mrb[183].mxu0  ;;  %2462 = vmatmul.mubr.bf16.gmra.mrb[176].mxu1 %v5653_v63  ;;  %v1845_v58 = vmax.f32 %v1615_v21, 0.0  ;;  %v2966_v63 = vld [vmem:[%s6061_s7 + $0x38] sm:$0xff] }
 0x24c   :  { %v1871_v49 = vmax.f32 %v1334_v7, 0.0  ;;  %2469 = vmatprep.mubr.bf16.mxu1 %v2003_v36  ;;  %v4294_v36 = vpack.c.bf16 %v2966_v63, %v2965_v15 }
 0x24d   :  { %v5687_v41 = vpack.c.bf16 %v1870_v9, %v1867_v28  ;;  %v1848_v60 = vmax.f32 %v1618_v62, 0.0 }
 0x24e   :  { %v2009_v32 = vpack.c.bf16 %v1871_v49, %v1868_v17  ;;  %v1337_v16 = vpop.f32.mrb[72].mxu1  ;;  %4295 = vmatprep.subr.bf16.mxu1 %v4294_v36 }
 0x24f   :  { %v1998_v29 = vpack.c.bf16 %v1848_v60, %v1845_v58  ;;  %v1338_v50 = vadd.f32 %v1337_v16, %v5372_v43  ;;  %v1339_v44 = vpop.f32.mrb[73].mxu1  ;;  %4297 = vmatpush3.bf16.msra.mxu1 %v4294_v36 }
 0x250   :  { %v1340_v37 = vadd.f32 %v1339_v44, %v5378_v45  ;;  %v1341_v54 = vpop.f32.mrb[74].mxu1  ;;  %v1622_v46 = vpop.f32.mrb[184].mxu0 }
 0x251   :  { %v1342_v4 = vadd.f32 %v1341_v54, %v5372_v43  ;;  %v1623_v13 = vadd.f32 %v1622_v46, %v5474_v20  ;;  %v1343_v0 = vpop.f32.mrb[75].mxu1  ;;  %v1624_v48 = vpop.f32.mrb[185].mxu0  ;;  %4127 = vmatmul.mubr.msk.bf16.gmra.mrb[32].mxu0 %vm2220_vm1, %v1998_v29  ;;  %v1873_v31 = vmax.f32 %v1338_v50, 0.0 }
 0x252   :  { %v1344_v6 = vadd.f32 %v1343_v0, %v5378_v45  ;;  %v1625_v47 = vpop.f32.mrb[186].mxu0  ;;  %v1874_v8 = vmax.f32 %v1340_v37, 0.0 }
 0x253   :  { %v1876_v10 = vmax.f32 %v1342_v4, 0.0  ;;  %v1626_v33 = vadd.f32 %v1625_v47, %v5474_v20  ;;  %v1627_v2 = vpop.f32.mrb[187].mxu0  ;;  %2470 = vmatmul.mubr.bf16.gmra.mrb[180].mxu1 %v5665_v59  ;;  %v1851_v61 = vmax.f32 %v1623_v13, 0.0 }
 0x254   :  { %v1877_v57 = vmax.f32 %v1344_v6, 0.0  ;;  %2477 = vmatprep.mubr.bf16.mxu1 %v2006_v55 }
 0x255   :  { %v5703_v14 = vpack.c.bf16 %v1876_v10, %v1873_v31  ;;  %v1854_v34 = vmax.f32 %v1626_v33, 0.0 }
 0x256   :  { %v2012_v27 = vpack.c.bf16 %v1877_v57, %v1874_v8  ;;  %v1347_v11 = vpop.f32.mrb[76].mxu1 }
 0x257   :  { %v2001_v40 = vpack.c.bf16 %v1854_v34, %v1851_v61  ;;  %v1348_v38 = vadd.f32 %v1347_v11, %v5372_v43  ;;  %v1349_v26 = vpop.f32.mrb[77].mxu1 }
 0x258   :  { %v1350_v42 = vadd.f32 %v1349_v26, %v5378_v45  ;;  %v1351_v5 = vpop.f32.mrb[78].mxu1  ;;  %v1630_v1 = vpop.f32.mrb[188].mxu0 }
 0x259   :  { %v1352_v59 = vadd.f32 %v1351_v5, %v5372_v43  ;;  %v1631_v23 = vadd.f32 %v1630_v1, %v5474_v20  ;;  %v1353_v55 = vpop.f32.mrb[79].mxu1  ;;  %v1632_v35 = vpop.f32.mrb[189].mxu0  ;;  %4130 = vmatprep.mubr.msk.bf16.mxu0 %vm2220_vm1, %v2001_v40  ;;  %v1879_v19 = vmax.f32 %v1348_v38, 0.0 }
 0x25a   :  { %v1354_v30 = vadd.f32 %v1353_v55, %v5378_v45  ;;  %v1633_v22 = vpop.f32.mrb[190].mxu0  ;;  %v1880_v12 = vmax.f32 %v1350_v42, 0.0 }
 0x25b   :  { %v1882_v24 = vmax.f32 %v1352_v59, 0.0  ;;  %v1634_v21 = vadd.f32 %v1633_v22, %v5474_v20  ;;  %v1635_v39 = vpop.f32.mrb[191].mxu0  ;;  %2478 = vmatmul.mubr.bf16.gmra.mrb[184].mxu1 %v5676_v53  ;;  %v1857_v28 = vmax.f32 %v1631_v23, 0.0 }
 0x25c   :  { %v1883_v7 = vmax.f32 %v1354_v30, 0.0  ;;  %2485 = vmatprep.mubr.bf16.mxu1 %v2009_v32 }
 0x25d   :  { %v5713_v25 = vpack.c.bf16 %v1882_v24, %v1879_v19  ;;  %v1860_v9 = vmax.f32 %v1634_v21, 0.0 }
 0x25e   :  { %v2015_v62 = vpack.c.bf16 %v1883_v7, %v1880_v12  ;;  %v1357_v18 = vpop.f32.mrb[80].mxu1 }
 0x25f   :  { %v2004_v17 = vpack.c.bf16 %v1860_v9, %v1857_v28  ;;  %v1358_v49 = vadd.f32 %v1357_v18, %v5372_v43  ;;  %v1359_v58 = vpop.f32.mrb[81].mxu1 }
 0x260   :  { %v1360_v60 = vadd.f32 %v1359_v58, %v5378_v45  ;;  %v1361_v16 = vpop.f32.mrb[82].mxu1  ;;  %v1638_v29 = vpop.f32.mrb[192].mxu0 }
 0x261   :  { %v1362_v50 = vadd.f32 %v1361_v16, %v5372_v43  ;;  %v1639_v53 = vadd.f32 %v1638_v29, %v5474_v20  ;;  %v1363_v44 = vpop.f32.mrb[83].mxu1  ;;  %v1640_v32 = vpop.f32.mrb[193].mxu0  ;;  %4131 = vmatmul.mubr.msk.bf16.gmra.mrb[36].mxu0 %vm2220_vm1, %v2004_v17  ;;  %v1885_v37 = vmax.f32 %v1358_v49, 0.0  ;;  %v2967_v17 = vld [vmem:[%s6061_s7 + $0x40] sm:$0xff]  ;;  %v2968_v49 = vld [vmem:[%s6061_s7 + $0x48] sm:$0xff] }
 0x262   :  { %v1364_v15 = vadd.f32 %v1363_v44, %v5378_v45  ;;  %v1641_v63 = vpop.f32.mrb[194].mxu0  ;;  %v1886_v4 = vmax.f32 %v1360_v60, 0.0  ;;  %v4298_v16 = vpack.c.bf16 %v2968_v49, %v2967_v17 }
 0x263   :  { %v1888_v54 = vmax.f32 %v1362_v50, 0.0  ;;  %v1642_v46 = vadd.f32 %v1641_v63, %v5474_v20  ;;  %v1643_v36 = vpop.f32.mrb[195].mxu0  ;;  %2486 = vmatmul.mubr.bf16.gmra.mrb[188].mxu1 %v5687_v41  ;;  %v1863_v48 = vmax.f32 %v1639_v53, 0.0 }
 0x264   :  { %v1889_v13 = vmax.f32 %v1364_v15, 0.0  ;;  %2493 = vmatprep.mubr.bf16.mxu1 %v2012_v27  ;;  %4299 = vmatprep.subr.bf16.mxu1 %v4298_v16 }
 0x265   :  { %v5723_v0 = vpack.c.bf16 %v1888_v54, %v1885_v37  ;;  %v1866_v6 = vmax.f32 %v1642_v46, 0.0  ;;  %4301 = vmatpush3.bf16.msra.mxu1 %v4298_v16 }
 0x266   :  { %v2018_v47 = vpack.c.bf16 %v1889_v13, %v1886_v4  ;;  %v1367_v31 = vpop.f32.mrb[84].mxu1 }
 0x267   :  { %v2007_v10 = vpack.c.bf16 %v1866_v6, %v1863_v48  ;;  %v1368_v33 = vadd.f32 %v1367_v31, %v5372_v43  ;;  %v1369_v2 = vpop.f32.mrb[85].mxu1 }
 0x268   :  { %v1370_v8 = vadd.f32 %v1369_v2, %v5378_v45  ;;  %v1371_v57 = vpop.f32.mrb[86].mxu1  ;;  %v1646_v61 = vpop.f32.mrb[196].mxu0 }
 0x269   :  { %v1372_v34 = vadd.f32 %v1371_v57, %v5372_v43  ;;  %v1647_v41 = vadd.f32 %v1646_v61, %v5474_v20  ;;  %v1373_v11 = vpop.f32.mrb[87].mxu1  ;;  %v1648_v27 = vpop.f32.mrb[197].mxu0  ;;  %4134 = vmatprep.mubr.msk.bf16.mxu0 %vm2220_vm1, %v2007_v10  ;;  %v1891_v26 = vmax.f32 %v1368_v33, 0.0 }
 0x26a   :  { %v1374_v40 = vadd.f32 %v1373_v11, %v5378_v45  ;;  %v1649_v38 = vpop.f32.mrb[198].mxu0  ;;  %v1892_v59 = vmax.f32 %v1370_v8, 0.0 }
 0x26b   :  { %v1894_v42 = vmax.f32 %v1372_v34, 0.0  ;;  %v1650_v5 = vadd.f32 %v1649_v38, %v5474_v20  ;;  %v1651_v1 = vpop.f32.mrb[199].mxu0  ;;  %2494 = vmatmul.mubr.bf16.gmra.mrb[192].mxu1 %v5703_v14  ;;  %v1869_v35 = vmax.f32 %v1647_v41, 0.0 }
 0x26c   :  { %v1895_v23 = vmax.f32 %v1374_v40, 0.0  ;;  %2501 = vmatprep.mubr.bf16.mxu1 %v2015_v62 }
 0x26d   :  { %v5733_v55 = vpack.c.bf16 %v1894_v42, %v1891_v26  ;;  %v1872_v30 = vmax.f32 %v1650_v5, 0.0 }
 0x26e   :  { %v2021_v22 = vpack.c.bf16 %v1895_v23, %v1892_v59  ;;  %v1377_v19 = vpop.f32.mrb[88].mxu1 }
 0x26f   :  { %v2010_v24 = vpack.c.bf16 %v1872_v30, %v1869_v35  ;;  %v1378_v21 = vadd.f32 %v1377_v19, %v5372_v43  ;;  %v1379_v39 = vpop.f32.mrb[89].mxu1 }
 0x270   :  { %v1380_v12 = vadd.f32 %v1379_v39, %v5378_v45  ;;  %v1381_v7 = vpop.f32.mrb[90].mxu1  ;;  %v1654_v28 = vpop.f32.mrb[200].mxu0 }
 0x271   :  { %v1382_v9 = vadd.f32 %v1381_v7, %v5372_v43  ;;  %v1655_v14 = vadd.f32 %v1654_v28, %v5474_v20  ;;  %v1383_v18 = vpop.f32.mrb[91].mxu1  ;;  %v1656_v62 = vpop.f32.mrb[201].mxu0  ;;  %4135 = vmatmul.mubr.msk.bf16.gmra.mrb[40].mxu0 %vm2220_vm1, %v2010_v24  ;;  %v1897_v29 = vmax.f32 %v1378_v21, 0.0 }
 0x272   :  { %v1384_v58 = vadd.f32 %v1383_v18, %v5378_v45  ;;  %v1657_v60 = vpop.f32.mrb[202].mxu0  ;;  %v1898_v32 = vmax.f32 %v1380_v12, 0.0 }
 0x273   :  { %v1900_v50 = vmax.f32 %v1382_v9, 0.0  ;;  %v1658_v53 = vadd.f32 %v1657_v60, %v5474_v20  ;;  %v1659_v44 = vpop.f32.mrb[203].mxu0  ;;  %2502 = vmatmul.mubr.bf16.gmra.mrb[196].mxu1 %v5713_v25  ;;  %v1875_v37 = vmax.f32 %v1655_v14, 0.0 }
 0x274   :  { %v1901_v15 = vmax.f32 %v1384_v58, 0.0  ;;  %2509 = vmatprep.mubr.bf16.mxu1 %v2018_v47 }
 0x275   :  { %v5749_v63 = vpack.c.bf16 %v1900_v50, %v1897_v29  ;;  %v1878_v54 = vmax.f32 %v1658_v53, 0.0 }
 0x276   :  { %v2024_v46 = vpack.c.bf16 %v1901_v15, %v1898_v32  ;;  %v1387_v36 = vpop.f32.mrb[92].mxu1 }
 0x277   :  { %v2013_v4 = vpack.c.bf16 %v1878_v54, %v1875_v37  ;;  %v1388_v13 = vadd.f32 %v1387_v36, %v5372_v43  ;;  %v1389_v48 = vpop.f32.mrb[93].mxu1 }
 0x278   :  { %v1390_v6 = vadd.f32 %v1389_v48, %v5378_v45  ;;  %v1391_v31 = vpop.f32.mrb[94].mxu1  ;;  %v1662_v10 = vpop.f32.mrb[204].mxu0 }
 0x279   :  { %v1392_v25 = vadd.f32 %v1391_v31, %v5372_v43  ;;  %v1663_v47 = vadd.f32 %v1662_v10, %v5474_v20  ;;  %v1393_v33 = vpop.f32.mrb[95].mxu1  ;;  %v1664_v2 = vpop.f32.mrb[205].mxu0  ;;  %4138 = vmatprep.mubr.msk.bf16.mxu0 %vm2220_vm1, %v2013_v4  ;;  %v1903_v61 = vmax.f32 %v1388_v13, 0.0 }
 0x27a   :  { %v1394_v8 = vadd.f32 %v1393_v33, %v5378_v45  ;;  %v1665_v57 = vpop.f32.mrb[206].mxu0  ;;  %v1904_v27 = vmax.f32 %v1390_v6, 0.0 }
 0x27b   :  { %v1906_v34 = vmax.f32 %v1392_v25, 0.0  ;;  %v1666_v41 = vadd.f32 %v1665_v57, %v5474_v20  ;;  %v1667_v11 = vpop.f32.mrb[207].mxu0  ;;  %2510 = vmatmul.mubr.bf16.gmra.mrb[200].mxu1 %v5723_v0  ;;  %v1881_v26 = vmax.f32 %v1663_v47, 0.0 }
 0x27c   :  { %v1907_v40 = vmax.f32 %v1394_v8, 0.0  ;;  %2517 = vmatprep.mubr.bf16.mxu1 %v2021_v22 }
 0x27d   :  { %v5759_v38 = vpack.c.bf16 %v1906_v34, %v1903_v61  ;;  %v1884_v42 = vmax.f32 %v1666_v41, 0.0 }
 0x27e   :  { %v2027_v5 = vpack.c.bf16 %v1907_v40, %v1904_v27  ;;  %v1397_v1 = vpop.f32.mrb[96].mxu1 }
 0x27f   :  { %v2016_v59 = vpack.c.bf16 %v1884_v42, %v1881_v26  ;;  %v1398_v23 = vadd.f32 %v1397_v1, %v5372_v43  ;;  %v1399_v35 = vpop.f32.mrb[97].mxu1 }
 0x280   :  { %v1400_v30 = vadd.f32 %v1399_v35, %v5378_v45  ;;  %v1401_v19 = vpop.f32.mrb[98].mxu1  ;;  %v1670_v24 = vpop.f32.mrb[208].mxu0 }
 0x281   :  { %v1402_v21 = vadd.f32 %v1401_v19, %v5372_v43  ;;  %v1671_v0 = vadd.f32 %v1670_v24, %v5474_v20  ;;  %v1403_v39 = vpop.f32.mrb[99].mxu1  ;;  %v1672_v22 = vpop.f32.mrb[209].mxu0  ;;  %4139 = vmatmul.mubr.msk.bf16.gmra.mrb[44].mxu0 %vm2220_vm1, %v2016_v59  ;;  %v1909_v28 = vmax.f32 %v1398_v23, 0.0 }
 0x282   :  { %v1404_v12 = vadd.f32 %v1403_v39, %v5378_v45  ;;  %v1673_v7 = vpop.f32.mrb[210].mxu0  ;;  %v1910_v62 = vmax.f32 %v1400_v30, 0.0 }
 0x283   :  { %v1912_v9 = vmax.f32 %v1402_v21, 0.0  ;;  %v1674_v14 = vadd.f32 %v1673_v7, %v5474_v20  ;;  %v1675_v18 = vpop.f32.mrb[211].mxu0  ;;  %2518 = vmatmul.mubr.bf16.gmra.mrb[204].mxu1 %v5733_v55  ;;  %v1887_v58 = vmax.f32 %v1671_v0, 0.0 }
 0x284   :  { %v1913_v17 = vmax.f32 %v1404_v12, 0.0  ;;  %2525 = vmatprep.mubr.bf16.mxu1 %v2024_v46 }
 0x285   :  { %v5769_v49 = vpack.c.bf16 %v1912_v9, %v1909_v28  ;;  %v1890_v60 = vmax.f32 %v1674_v14, 0.0 }
 0x286   :  { %v2030_v16 = vpack.c.bf16 %v1913_v17, %v1910_v62  ;;  %v1407_v29 = vpop.f32.mrb[100].mxu1 }
 0x287   :  { %v2019_v50 = vpack.c.bf16 %v1890_v60, %v1887_v58  ;;  %v1408_v53 = vadd.f32 %v1407_v29, %v5372_v43  ;;  %v1409_v44 = vpop.f32.mrb[101].mxu1 }
 0x288   :  { %v1410_v32 = vadd.f32 %v1409_v44, %v5378_v45  ;;  %v1411_v15 = vpop.f32.mrb[102].mxu1  ;;  %v1678_v37 = vpop.f32.mrb[212].mxu0 }
 0x289   :  { %v1412_v54 = vadd.f32 %v1411_v15, %v5372_v43  ;;  %v1679_v55 = vadd.f32 %v1678_v37, %v5474_v20  ;;  %v1413_v36 = vpop.f32.mrb[103].mxu1  ;;  %v1680_v46 = vpop.f32.mrb[213].mxu0  ;;  %4142 = vmatprep.mubr.msk.bf16.mxu0 %vm2220_vm1, %v2019_v50  ;;  %v1915_v48 = vmax.f32 %v1408_v53, 0.0 }
 0x28a   :  { %v1414_v4 = vadd.f32 %v1413_v36, %v5378_v45  ;;  %v1681_v13 = vpop.f32.mrb[214].mxu0  ;;  %v1916_v25 = vmax.f32 %v1410_v32, 0.0 }
 0x28b   :  { %v1918_v6 = vmax.f32 %v1412_v54, 0.0  ;;  %v1682_v31 = vadd.f32 %v1681_v13, %v5474_v20  ;;  %v1683_v10 = vpop.f32.mrb[215].mxu0  ;;  %2526 = vmatmul.mubr.bf16.gmra.mrb[208].mxu1 %v5749_v63  ;;  %v1893_v2 = vmax.f32 %v1679_v55, 0.0 }
 0x28c   :  { %v1919_v47 = vmax.f32 %v1414_v4, 0.0  ;;  %2533 = vmatprep.mubr.bf16.mxu1 %v2027_v5 }
 0x28d   :  { %v5779_v33 = vpack.c.bf16 %v1918_v6, %v1915_v48  ;;  %v1896_v8 = vmax.f32 %v1682_v31, 0.0 }
 0x28e   :  { %v2033_v57 = vpack.c.bf16 %v1919_v47, %v1916_v25  ;;  %v1417_v61 = vpop.f32.mrb[104].mxu1 }
 0x28f   :  { %v2022_v34 = vpack.c.bf16 %v1896_v8, %v1893_v2  ;;  %v1418_v41 = vadd.f32 %v1417_v61, %v5372_v43  ;;  %v1419_v11 = vpop.f32.mrb[105].mxu1 }
 0x290   :  { %v1420_v27 = vadd.f32 %v1419_v11, %v5378_v45  ;;  %v1421_v40 = vpop.f32.mrb[106].mxu1  ;;  %v1686_v26 = vpop.f32.mrb[216].mxu0 }
 0x291   :  { %v1422_v42 = vadd.f32 %v1421_v40, %v5372_v43  ;;  %v1687_v63 = vadd.f32 %v1686_v26, %v5474_v20  ;;  %v1423_v1 = vpop.f32.mrb[107].mxu1  ;;  %v1688_v5 = vpop.f32.mrb[217].mxu0  ;;  %4143 = vmatmul.mubr.msk.bf16.gmra.mrb[48].mxu0 %vm2220_vm1, %v2022_v34  ;;  %v1921_v35 = vmax.f32 %v1418_v41, 0.0 }
 0x292   :  { %v1424_v59 = vadd.f32 %v1423_v1, %v5378_v45  ;;  %v1689_v23 = vpop.f32.mrb[218].mxu0  ;;  %v1922_v21 = vmax.f32 %v1420_v27, 0.0 }
 0x293   :  { %v1924_v30 = vmax.f32 %v1422_v42, 0.0  ;;  %v1690_v19 = vadd.f32 %v1689_v23, %v5474_v20  ;;  %v1691_v24 = vpop.f32.mrb[219].mxu0  ;;  %2534 = vmatmul.mubr.bf16.gmra.mrb[212].mxu1 %v5759_v38  ;;  %v1899_v22 = vmax.f32 %v1687_v63, 0.0 }
 0x294   :  { %v1925_v0 = vmax.f32 %v1424_v59, 0.0  ;;  %2541 = vmatprep.mubr.bf16.mxu1 %v2030_v16 }
 0x295   :  { %v5789_v39 = vpack.c.bf16 %v1924_v30, %v1921_v35  ;;  %v1902_v12 = vmax.f32 %v1690_v19, 0.0 }
 0x296   :  { %v2036_v7 = vpack.c.bf16 %v1925_v0, %v1922_v21  ;;  %v1427_v28 = vpop.f32.mrb[108].mxu1 }
 0x297   :  { %v2025_v9 = vpack.c.bf16 %v1902_v12, %v1899_v22  ;;  %v1428_v14 = vadd.f32 %v1427_v28, %v5372_v43  ;;  %v1429_v18 = vpop.f32.mrb[109].mxu1 }
 0x298   :  { %v1430_v62 = vadd.f32 %v1429_v18, %v5378_v45  ;;  %v1431_v17 = vpop.f32.mrb[110].mxu1  ;;  %v1694_v58 = vpop.f32.mrb[220].mxu0 }
 0x299   :  { %v1432_v60 = vadd.f32 %v1431_v17, %v5372_v43  ;;  %v1695_v38 = vadd.f32 %v1694_v58, %v5474_v20  ;;  %v1433_v29 = vpop.f32.mrb[111].mxu1  ;;  %v1696_v16 = vpop.f32.mrb[221].mxu0  ;;  %4146 = vmatprep.mubr.msk.bf16.mxu0 %vm2220_vm1, %v2025_v9  ;;  %v1927_v44 = vmax.f32 %v1428_v14, 0.0 }
 0x29a   :  { %v1434_v50 = vadd.f32 %v1433_v29, %v5378_v45  ;;  %v1697_v53 = vpop.f32.mrb[222].mxu0  ;;  %v1928_v54 = vmax.f32 %v1430_v62, 0.0 }
 0x29b   :  { %v1930_v32 = vmax.f32 %v1432_v60, 0.0  ;;  %v1698_v15 = vadd.f32 %v1697_v53, %v5474_v20  ;;  %v1699_v37 = vpop.f32.mrb[223].mxu0  ;;  %2542 = vmatmul.mubr.bf16.gmra.mrb[216].mxu1 %v5769_v49  ;;  %v1905_v46 = vmax.f32 %v1695_v38, 0.0 }
 0x29c   :  { %v1931_v55 = vmax.f32 %v1434_v50, 0.0  ;;  %2549 = vmatprep.mubr.bf16.mxu1 %v2033_v57 }
 0x29d   :  { %v5799_v36 = vpack.c.bf16 %v1930_v32, %v1927_v44  ;;  %v1908_v4 = vmax.f32 %v1698_v15, 0.0 }
 0x29e   :  { %v2039_v13 = vpack.c.bf16 %v1931_v55, %v1928_v54  ;;  %v1437_v48 = vpop.f32.mrb[112].mxu1 }
 0x29f   :  { %v2028_v6 = vpack.c.bf16 %v1908_v4, %v1905_v46  ;;  %v1438_v31 = vadd.f32 %v1437_v48, %v5372_v43  ;;  %v1439_v10 = vpop.f32.mrb[113].mxu1 }
 0x2a0   :  { %v1440_v25 = vadd.f32 %v1439_v10, %v5378_v45  ;;  %v1441_v47 = vpop.f32.mrb[114].mxu1  ;;  %v1702_v2 = vpop.f32.mrb[224].mxu0 }
 0x2a1   :  { %v1442_v8 = vadd.f32 %v1441_v47, %v5372_v43  ;;  %v1703_v49 = vadd.f32 %v1702_v2, %v5474_v20  ;;  %v1443_v61 = vpop.f32.mrb[115].mxu1  ;;  %v1704_v57 = vpop.f32.mrb[225].mxu0  ;;  %4147 = vmatmul.mubr.msk.bf16.gmra.mrb[52].mxu0 %vm2220_vm1, %v2028_v6  ;;  %v1933_v11 = vmax.f32 %v1438_v31, 0.0 }
 0x2a2   :  { %v1444_v34 = vadd.f32 %v1443_v61, %v5378_v45  ;;  %v1705_v41 = vpop.f32.mrb[226].mxu0  ;;  %v1934_v42 = vmax.f32 %v1440_v25, 0.0 }
 0x2a3   :  { %v1936_v27 = vmax.f32 %v1442_v8, 0.0  ;;  %v1706_v40 = vadd.f32 %v1705_v41, %v5474_v20  ;;  %v1707_v26 = vpop.f32.mrb[227].mxu0  ;;  %2550 = vmatmul.mubr.bf16.gmra.mrb[220].mxu1 %v5779_v33  ;;  %v1911_v5 = vmax.f32 %v1703_v49, 0.0 }
 0x2a4   :  { %v1937_v63 = vmax.f32 %v1444_v34, 0.0  ;;  %2557 = vmatprep.mubr.bf16.mxu1 %v2036_v7 }
 0x2a5   :  { %v5809_v1 = vpack.c.bf16 %v1936_v27, %v1933_v11  ;;  %v1914_v59 = vmax.f32 %v1706_v40, 0.0 }
 0x2a6   :  { %v2042_v23 = vpack.c.bf16 %v1937_v63, %v1934_v42  ;;  %v1447_v35 = vpop.f32.mrb[116].mxu1 }
 0x2a7   :  { %v2031_v30 = vpack.c.bf16 %v1914_v59, %v1911_v5  ;;  %v1448_v19 = vadd.f32 %v1447_v35, %v5372_v43  ;;  %v1449_v24 = vpop.f32.mrb[117].mxu1 }
 0x2a8   :  { %v1450_v21 = vadd.f32 %v1449_v24, %v5378_v45  ;;  %v1451_v0 = vpop.f32.mrb[118].mxu1  ;;  %v1710_v22 = vpop.f32.mrb[228].mxu0 }
 0x2a9   :  { %v1452_v12 = vadd.f32 %v1451_v0, %v5372_v43  ;;  %v1711_v33 = vadd.f32 %v1710_v22, %v5474_v20  ;;  %v1453_v28 = vpop.f32.mrb[119].mxu1  ;;  %v1712_v7 = vpop.f32.mrb[229].mxu0  ;;  %4150 = vmatprep.mubr.msk.bf16.mxu0 %vm2220_vm1, %v2031_v30  ;;  %v1939_v18 = vmax.f32 %v1448_v19, 0.0 }
 0x2aa   :  { %v1454_v9 = vadd.f32 %v1453_v28, %v5378_v45  ;;  %v1713_v14 = vpop.f32.mrb[230].mxu0  ;;  %v1940_v60 = vmax.f32 %v1450_v21, 0.0 }
 0x2ab   :  { %v1942_v62 = vmax.f32 %v1452_v12, 0.0  ;;  %v1714_v17 = vadd.f32 %v1713_v14, %v5474_v20  ;;  %v1715_v58 = vpop.f32.mrb[231].mxu0  ;;  %2558 = vmatmul.mubr.bf16.gmra.mrb[224].mxu1 %v5789_v39  ;;  %v1917_v16 = vmax.f32 %v1711_v33, 0.0 }
 0x2ac   :  { %v1943_v38 = vmax.f32 %v1454_v9, 0.0  ;;  %2565 = vmatprep.mubr.bf16.mxu1 %v2039_v13 }
 0x2ad   :  { %v5819_v29 = vpack.c.bf16 %v1942_v62, %v1939_v18  ;;  %v1920_v50 = vmax.f32 %v1714_v17, 0.0 }
 0x2ae   :  { %v2045_v53 = vpack.c.bf16 %v1943_v38, %v1940_v60  ;;  %v1457_v44 = vpop.f32.mrb[120].mxu1 }
 0x2af   :  { %v2034_v32 = vpack.c.bf16 %v1920_v50, %v1917_v16  ;;  %v1458_v15 = vadd.f32 %v1457_v44, %v5372_v43  ;;  %v1459_v37 = vpop.f32.mrb[121].mxu1 }
 0x2b0   :  { %v1460_v54 = vadd.f32 %v1459_v37, %v5378_v45  ;;  %v1461_v55 = vpop.f32.mrb[122].mxu1  ;;  %v1718_v46 = vpop.f32.mrb[232].mxu0 }
 0x2b1   :  { %v1462_v4 = vadd.f32 %v1461_v55, %v5372_v43  ;;  %v1719_v39 = vadd.f32 %v1718_v46, %v5474_v20  ;;  %v1463_v48 = vpop.f32.mrb[123].mxu1  ;;  %v1720_v13 = vpop.f32.mrb[233].mxu0  ;;  %4151 = vmatmul.mubr.msk.bf16.gmra.mrb[56].mxu0 %vm2220_vm1, %v2034_v32  ;;  %v1945_v10 = vmax.f32 %v1458_v15, 0.0 }
 0x2b2   :  { %v1464_v6 = vadd.f32 %v1463_v48, %v5378_v45  ;;  %v1721_v31 = vpop.f32.mrb[234].mxu0  ;;  %v1946_v8 = vmax.f32 %v1460_v54, 0.0 }
 0x2b3   :  { %v1948_v25 = vmax.f32 %v1462_v4, 0.0  ;;  %v1722_v47 = vadd.f32 %v1721_v31, %v5474_v20  ;;  %v1723_v2 = vpop.f32.mrb[235].mxu0  ;;  %2566 = vmatmul.mubr.bf16.gmra.mrb[228].mxu1 %v5799_v36  ;;  %v1923_v57 = vmax.f32 %v1719_v39, 0.0 }
 0x2b4   :  { %v1949_v49 = vmax.f32 %v1464_v6, 0.0  ;;  %2573 = vmatprep.mubr.bf16.mxu1 %v2042_v23 }
 0x2b5   :  { %v2047_v61 = vpack.c.bf16 %v1948_v25, %v1945_v10  ;;  %v1926_v34 = vmax.f32 %v1722_v47, 0.0 }
 0x2b6   :  { %v2048_v41 = vpack.c.bf16 %v1949_v49, %v1946_v8  ;;  %v1467_v11 = vpop.f32.mrb[124].mxu1 }
 0x2b7   :  { %v2037_v27 = vpack.c.bf16 %v1926_v34, %v1923_v57  ;;  %v1468_v40 = vadd.f32 %v1467_v11, %v5372_v43  ;;  %v1469_v26 = vpop.f32.mrb[125].mxu1 }
 0x2b8   :  { %v1470_v42 = vadd.f32 %v1469_v26, %v5378_v45  ;;  %v1471_v63 = vpop.f32.mrb[126].mxu1  ;;  %v1726_v5 = vpop.f32.mrb[236].mxu0 }
 0x2b9   :  { %v1472_v59 = vadd.f32 %v1471_v63, %v5372_v43  ;;  %v1727_v36 = vadd.f32 %v1726_v5, %v5474_v20  ;;  %v1473_v35 = vpop.f32.mrb[127].mxu1  ;;  %v1728_v30 = vpop.f32.mrb[237].mxu0  ;;  %4154 = vmatprep.mubr.msk.bf16.mxu0 %vm2220_vm1, %v2037_v27  ;;  %v1951_v24 = vmax.f32 %v1468_v40, 0.0 }
 0x2ba   :  { %v1474_v23 = vadd.f32 %v1473_v35, %v5378_v45  ;;  %v1729_v19 = vpop.f32.mrb[238].mxu0  ;;  %v1952_v12 = vmax.f32 %v1470_v42, 0.0 }
 0x2bb   :  { %v1954_v21 = vmax.f32 %v1472_v59, 0.0  ;;  %v1730_v0 = vadd.f32 %v1729_v19, %v5474_v20  ;;  %v1731_v22 = vpop.f32.mrb[239].mxu0  ;;  %2574 = vmatmul.mubr.bf16.gmra.mrb[232].mxu1 %v5809_v1  ;;  %v1929_v28 = vmax.f32 %v1727_v36, 0.0 }
 0x2bc   :  { %v1955_v33 = vmax.f32 %v1474_v23, 0.0  ;;  %2581 = vmatprep.mubr.bf16.mxu1 %v2045_v53 }
 0x2bd   :  { %v2050_v43 = vpack.c.bf16 %v1954_v21, %v1951_v24  ;;  %v1932_v7 = vmax.f32 %v1730_v0, 0.0 }
 0x2be   :  { %v2051_v9 = vpack.c.bf16 %v1955_v33, %v1952_v12  ;;  %v5837_v14 = vpop.f32.mrb[128].mxu1 }
 0x2bf   :  { %v2040_v18 = vpack.c.bf16 %v1932_v7, %v1929_v28  ;;  %v2369_v62 = vpop.f32.mrb[129].mxu1 }
 0x2c0   :  { %v1734_v45 = vpop.f32.mrb[240].mxu0  ;;  %v5839_v17 = vpop.f32.mrb[130].mxu1 }
 0x2c1   :  { %v1735_v58 = vadd.f32 %v1734_v45, %v5474_v20  ;;  %v1736_v60 = vpop.f32.mrb[241].mxu0  ;;  %v2372_v38 = vpop.f32.mrb[131].mxu1  ;;  %4155 = vmatmul.mubr.msk.bf16.gmra.mrb[60].mxu0 %vm2220_vm1, %v2040_v18 }
 0x2c2   :  { %v1737_v1 = vpop.f32.mrb[242].mxu0 }
 0x2c3   :  { %v1738_v16 = vadd.f32 %v1737_v1, %v5474_v20  ;;  %v1739_v50 = vpop.f32.mrb[243].mxu0  ;;  %2582 = vmatmul.mubr.bf16.gmra.mrb[236].mxu1 %v5819_v29  ;;  %v1935_v53 = vmax.f32 %v1735_v58, 0.0 }
 0x2c4   :  { %2589 = vmatprep.mubr.bf16.mxu1 %v2048_v41 }
 0x2c5   :  { %v1938_v44 = vmax.f32 %v1738_v16, 0.0 }
 0x2c6   :  { %v5845_v32 = vpop.f32.mrb[132].mxu1 }
 0x2c7   :  { %v2043_v15 = vpack.c.bf16 %v1938_v44, %v1935_v53  ;;  %v2377_v37 = vpop.f32.mrb[133].mxu1  ;;  %v5878_v53 = vld [vmem:[%s6060_s6] ss:$0 sm:$0xff]  ;;  %s4431_s6 = smov [#allocation3]  }
 0x2c8   :  { %v1742_v54 = vpop.f32.mrb[244].mxu0  ;;  %v5847_v55 = vpop.f32.mrb[134].mxu1  ;;  %s3729_s2 = sshll.u32 %s4431_s6, 4  ;;  %s3730_s2 = int_to_ptr.vmem [resolvable:$true] %s3729_s2 }
 0x2c9   :  { %v1743_v46 = vadd.f32 %v1742_v54, %v5474_v20  ;;  %v1744_v4 = vpop.f32.mrb[245].mxu0  ;;  %v2380_v39 = vpop.f32.mrb[135].mxu1  ;;  %4158 = vmatprep.mubr.msk.bf16.mxu0 %vm2220_vm1, %v2043_v15  ;;  %s4405_s4 = scalar_lea.vmem %s3730_s2, 64  ;;  %p4410_p1 = scmp.lt.s32.totalorder %s3730_s2, %s3730_s2 }
 0x2ca   :  { %v1745_v48 = vpop.f32.mrb[246].mxu0  ;;  %p4406_p0 = scmp.ne.s32.totalorder %s3730_s2, %s4405_s4  ;;  %p4411_p2 = scmp.lt.s32.totalorder %s4405_s4, %s4405_s4 }
 0x2cb   :  { %v1746_v13 = vadd.f32 %v1745_v48, %v5474_v20  ;;  %v1747_v29 = vpop.f32.mrb[247].mxu0  ;;  %2590 = vmatmul.mubr.bf16.gmra.mrb[240].mxu1 %v2047_v61  ;;  %v1941_v6 = vmax.f32 %v1743_v46, 0.0 }
 0x2cc   :  { %2597 = vmatprep.mubr.bf16.mxu1 %v2051_v9  ;;  %p4412_p3 = por %p4411_p2, %p4410_p1 }
 0x2cd   :  { %v1944_v31 = vmax.f32 %v1746_v13, 0.0 }
 0x2ce   :  { %v5852_v10 = vpop.f32.mrb[136].mxu1  ;;  %p4413_p4 = pnand %p4412_p3, %p4406_p0 }
 0x2cf   :  { %v2046_v25 = vpack.c.bf16 %v1944_v31, %v1941_v6  ;;  %v2385_v47 = vpop.f32.mrb[137].mxu1 }
 0x2d0   :  { %v1750_v2 = vpop.f32.mrb[248].mxu0  ;;  %v5854_v8 = vpop.f32.mrb[138].mxu1 }
 0x2d1   :  { %v1751_v49 = vadd.f32 %v1750_v2, %v5474_v20  ;;  %v1752_v57 = vpop.f32.mrb[249].mxu0  ;;  %v2388_v34 = vpop.f32.mrb[139].mxu1  ;;  %4159 = vmatmul.mubr.msk.bf16.gmra.mrb[64].mxu0 %vm2220_vm1, %v2046_v25 }
 0x2d2   :  { %v1753_v41 = vpop.f32.mrb[250].mxu0 }
 0x2d3   :  { %v1754_v11 = vadd.f32 %v1753_v41, %v5474_v20  ;;  %v1755_v61 = vpop.f32.mrb[251].mxu0  ;;  %2598 = vmatmul.mubr.bf16.gmra.mrb[244].mxu1 %v2050_v43  ;;  %v1947_v27 = vmax.f32 %v1751_v49, 0.0 }
 0x2d5   :  { %v1950_v40 = vmax.f32 %v1754_v11, 0.0  ;;  %v2376_v11 = vadd.f32 %v5878_v53, %v5845_v32  ;;  %v2371_v32 = vadd.f32 %v5878_v53, %v5839_v17  ;;  %v2384_v17 = vadd.f32 %v5878_v53, %v5852_v10 }
 0x2d6   :  { %v5859_v26 = vpop.f32.mrb[140].mxu1 }
 0x2d7   :  { %v2049_v42 = vpack.c.bf16 %v1950_v40, %v1947_v27  ;;  %v2393_v63 = vpop.f32.mrb[141].mxu1  ;;  %v2368_v40 = vadd.f32 %v5878_v53, %v5837_v14 }
 0x2d8   :  { %v1758_v5 = vpop.f32.mrb[252].mxu0  ;;  %v5861_v59 = vpop.f32.mrb[142].mxu1 }
 0x2d9   :  { %v1759_v36 = vadd.f32 %v1758_v5, %v5474_v20  ;;  %v1760_v35 = vpop.f32.mrb[253].mxu0  ;;  %v2396_v30 = vpop.f32.mrb[143].mxu1  ;;  %4162 = vmatprep.mubr.msk.bf16.mxu0 %vm2220_vm1, %v2049_v42  ;;  %v2379_v5 = vadd.f32 %v5878_v53, %v5847_v55  ;;  %v2392_v55 = vadd.f32 %v5878_v53, %v5859_v26  ;;  %v2387_v26 = vadd.f32 %v5878_v53, %v5854_v8 }
 0x2da   :  { %v1761_v23 = vpop.f32.mrb[254].mxu0 }
 0x2db   :  { %v1762_v19 = vadd.f32 %v1761_v23, %v5474_v20  ;;  %v1763_v24 = vpop.f32.mrb[255].mxu0  ;;  %v1953_v21 = vmax.f32 %v1759_v36, 0.0 }
 0x2dd   :  { %v1956_v0 = vmax.f32 %v1762_v19, 0.0 }
 0x2de   :  { %v5866_v22 = vpop.f32.mrb[144].mxu1 }
 0x2df   :  { %v2052_v12 = vpack.c.bf16 %v1956_v0, %v1953_v21  ;;  %v2401_v33 = vpop.f32.mrb[145].mxu1  ;;  %v2400_v8 = vadd.f32 %v5878_v53, %v5866_v22 }
 0x2e0   :  { %v2351_v43 = vpop.f32.mrb[0].mxu0  ;;  %v5868_v28 = vpop.f32.mrb[146].mxu1 }
 0x2e1   :  { %v2353_v7 = vpop.f32.mrb[1].mxu0  ;;  %v2404_v9 = vpop.f32.mrb[147].mxu1  ;;  %4163 = vmatmul.mubr.msk.bf16.gmra.mrb[68].mxu0 %vm2220_vm1, %v2052_v12  ;;  %v2352_v54 = vadd.f32 %v5878_v53, %v2351_v43 }
 0x2e2   :  { %v2354_v18 = vpop.f32.mrb[2].mxu0 }
 0x2e3   :  { %v2356_v62 = vpop.f32.mrb[3].mxu0  ;;  %v2355_v6 = vadd.f32 %v5878_v53, %v2354_v18 }
 0x2e6   :  { %v5871_v45 = vpop.f32.mrb[148].mxu1 }
 0x2e7   :  { %v2409_v58 = vpop.f32.mrb[149].mxu1 }
 0x2e8   :  { %v2359_v20 = vpop.f32.mrb[4].mxu0  ;;  %v5873_v60 = vpop.f32.mrb[150].mxu1  ;;  %v2395_v58 = vadd.f32 %v5878_v53, %v5861_v59  ;;  %v2408_v59 = vadd.f32 %v5878_v53, %v5871_v45  ;;  %v2403_v45 = vadd.f32 %v5878_v53, %v5868_v28 }
 0x2e9   :  { %v2361_v38 = vpop.f32.mrb[5].mxu0  ;;  %v2412_v1 = vpop.f32.mrb[151].mxu1  ;;  %v2360_v15 = vadd.f32 %v5878_v53, %v2359_v20 }
 0x2ea   :  { %v2362_v16 = vpop.f32.mrb[6].mxu0 }
 0x2eb   :  { %v2364_v50 = vpop.f32.mrb[7].mxu0  ;;  %v2363_v39 = vadd.f32 %v5878_v53, %v2362_v16 }
 0x2ee   :  { %v5880_v44 = vpop.f32.mrb[152].mxu1 }
 0x2ef   :  { %v2417_v37 = vpop.f32.mrb[153].mxu1  ;;  %v2416_v28 = vadd.f32 %v5878_v53, %v5880_v44 }
 0x2f0   :  { %v5884_v46 = vpop.f32.mrb[154].mxu1  ;;  %v4104_v4 = vpop.f32.mrb[8].mxu0 }
 0x2f1   :  { %v2649_v48 = vadd.f32 %v4104_v4, %v2360_v15  ;;  %v2420_v13 = vpop.f32.mrb[155].mxu1  ;;  %v2640_v29 = vpop.f32.mrb[9].mxu0 }
 0x2f2   :  { %v2641_v31 = vadd.f32 %v2640_v29, %v2352_v54  ;;  %v4105_v25 = vpop.f32.mrb[10].mxu0 }
 0x2f3   :  { %v2652_v47 = vadd.f32 %v4105_v25, %v2363_v39  ;;  %v2643_v2 = vpop.f32.mrb[11].mxu0  ;;  %v2897_v61 = vmax.f32 %v2649_v48, 0.0  ;;  %v2411_v25 = vadd.f32 %v5878_v53, %v5873_v60 }
 0x2f4   :  { %v2895_v49 = vmax.f32 %v2641_v31, 0.0  ;;  %v2644_v57 = vadd.f32 %v2643_v2, %v2355_v6 }
 0x2f5   :  { %v2898_v23 = vmax.f32 %v2652_v47, 0.0 }
 0x2f6   :  { %v2896_v34 = vmax.f32 %v2644_v57, 0.0  ;;  %v5888_v41 = vpop.f32.mrb[156].mxu1  ;;  %4186 = vmatprep.mubr.msk.f32.mxu1 %vm2969_vm2, %v2895_v49 }
 0x2f7   :  { %v2425_v27 = vpop.f32.mrb[157].mxu1  ;;  %v2424_v60 = vadd.f32 %v5878_v53, %v5888_v41  ;;  %v2419_v41 = vadd.f32 %v5878_v53, %v5884_v46 }
 0x2f8   :  { %v5895_v42 = vpop.f32.mrb[158].mxu1  ;;  %v4108_v63 = vpop.f32.mrb[12].mxu0  ;;  %4187 = vmatmul.mubr.msk.f32.vlgmr.msra.gmra.mrb[248].mxu1 %vm2969_vm2, %v2896_v34 }
 0x2f9   :  { %v2665_v36 = vadd.f32 %v4108_v63, %v2376_v11  ;;  %v2428_v35 = vpop.f32.mrb[159].mxu1  ;;  %v2656_v30 = vpop.f32.mrb[13].mxu0  ;;  %4189 = vmatprep.mubr.msk.f32.mxu1 %vm2969_vm2, %v2897_v61 }
 0x2fa   :  { %v2657_v19 = vadd.f32 %v2656_v30, %v2368_v40  ;;  %v4109_v24 = vpop.f32.mrb[14].mxu0 }
 0x2fb   :  { %v2668_v14 = vadd.f32 %v4109_v24, %v2379_v5  ;;  %v2659_v21 = vpop.f32.mrb[15].mxu0  ;;  %v2901_v7 = vmax.f32 %v2665_v36, 0.0 }
 0x2fc   :  { %v2899_v0 = vmax.f32 %v2657_v19, 0.0  ;;  %v2660_v12 = vadd.f32 %v2659_v21, %v2371_v32  ;;  %4190 = vmatmul.mubr.msk.f32.gmra.mrb[250].mxu1 %vm2969_vm2, %v2898_v23  ;;  %v2427_v23 = vadd.f32 %v5878_v53, %v5895_v42 }
 0x2fd   :  { %v2902_v16 = vmax.f32 %v2668_v14, 0.0 }
 0x2fe   :  { %v2900_v33 = vmax.f32 %v2660_v12, 0.0  ;;  %v5904_v43 = vpop.f32.mrb[160].mxu1  ;;  %4192 = vmatprep.mubr.msk.f32.mxu1 %vm2969_vm2, %v2899_v0 }
 0x2ff   :  { %v2433_v9 = vpop.f32.mrb[161].mxu1  ;;  %v2432_v46 = vadd.f32 %v5878_v53, %v5904_v43 }
 0x300   :  { %v5911_v18 = vpop.f32.mrb[162].mxu1  ;;  %v4112_v62 = vpop.f32.mrb[16].mxu0  ;;  %4193 = vmatmul.mubr.msk.f32.gmra.mrb[252].mxu1 %vm2969_vm2, %v2900_v33 }
 0x301   :  { %v2681_v20 = vadd.f32 %v4112_v62, %v2392_v55  ;;  %v2436_v38 = vpop.f32.mrb[163].mxu1  ;;  %v2672_v1 = vpop.f32.mrb[17].mxu0  ;;  %4195 = vmatprep.mubr.msk.f32.mxu1 %vm2969_vm2, %v2901_v7 }
 0x302   :  { %v2673_v50 = vadd.f32 %v2672_v1, %v2384_v17  ;;  %v4113_v15 = vpop.f32.mrb[18].mxu0 }
 0x303   :  { %v2684_v10 = vadd.f32 %v4113_v15, %v2395_v58  ;;  %v2675_v37 = vpop.f32.mrb[19].mxu0  ;;  %v2905_v13 = vmax.f32 %v2681_v20, 0.0  ;;  %v2435_v15 = vadd.f32 %v5878_v53, %v5911_v18 }
 0x304   :  { %v2903_v54 = vmax.f32 %v2673_v50, 0.0  ;;  %v2676_v4 = vadd.f32 %v2675_v37, %v2387_v26  ;;  %4196 = vmatmul.mubr.msk.f32.gmra.mrb[254].mxu1 %vm2969_vm2, %v2902_v16 }
 0x305   :  { %v2906_v57 = vmax.f32 %v2684_v10, 0.0 }
 0x306   :  { %v2904_v39 = vmax.f32 %v2676_v4, 0.0  ;;  %v2439_v48 = vpop.f32.mrb[164].mxu1  ;;  %4198 = vmatprep.mubr.msk.f32.mxu1 %vm2969_vm2, %v2903_v54 }
 0x307   :  { %v2441_v29 = vpop.f32.mrb[165].mxu1  ;;  %v2440_v42 = vadd.f32 %v5878_v53, %v2439_v48 }
 0x308   :  { %v2442_v6 = vpop.f32.mrb[166].mxu1  ;;  %v4116_v31 = vpop.f32.mrb[20].mxu0  ;;  %4199 = vmatmul.mubr.msk.f32.gmra.mrb[0].mxu1 %vm2969_vm2, %v2904_v39 }
 0x309   :  { %v2697_v47 = vadd.f32 %v4116_v31, %v2408_v59  ;;  %v2444_v2 = vpop.f32.mrb[167].mxu1  ;;  %v2688_v49 = vpop.f32.mrb[21].mxu0  ;;  %4201 = vmatprep.mubr.msk.f32.mxu1 %vm2969_vm2, %v2905_v13  ;;  %v2443_v1 = vadd.f32 %v5878_v53, %v2442_v6 }
 0x30a   :  { %v2689_v34 = vadd.f32 %v2688_v49, %v2400_v8  ;;  %v4117_v11 = vpop.f32.mrb[22].mxu0 }
 0x30b   :  { %v2700_v61 = vadd.f32 %v4117_v11, %v2411_v25  ;;  %v2691_v22 = vpop.f32.mrb[23].mxu0  ;;  %v2909_v36 = vmax.f32 %v2697_v47, 0.0 }
 0x30c   :  { %v2907_v27 = vmax.f32 %v2689_v34, 0.0  ;;  %v2692_v40 = vadd.f32 %v2691_v22, %v2403_v45  ;;  %4202 = vmatmul.mubr.msk.f32.gmra.mrb[2].mxu1 %vm2969_vm2, %v2906_v57 }
 0x30d   :  { %v2910_v21 = vmax.f32 %v2700_v61, 0.0 }
 0x30e   :  { %v2908_v63 = vmax.f32 %v2692_v40, 0.0  ;;  %v2447_v5 = vpop.f32.mrb[168].mxu1  ;;  %4204 = vmatprep.mubr.msk.f32.mxu1 %vm2969_vm2, %v2907_v27 }
 0x30f   :  { %v2449_v35 = vpop.f32.mrb[169].mxu1  ;;  %v2448_v47 = vadd.f32 %v5878_v53, %v2447_v5 }
 0x310   :  { %v2450_v30 = vpop.f32.mrb[170].mxu1  ;;  %v4120_v32 = vpop.f32.mrb[24].mxu0  ;;  %4205 = vmatmul.mubr.msk.f32.gmra.mrb[4].mxu1 %vm2969_vm2, %v2908_v63 }
 0x311   :  { %v2713_v19 = vadd.f32 %v4120_v32, %v2424_v60  ;;  %v2452_v24 = vpop.f32.mrb[171].mxu1  ;;  %v2704_v14 = vpop.f32.mrb[25].mxu0  ;;  %4207 = vmatprep.mubr.msk.f32.mxu1 %vm2969_vm2, %v2909_v36  ;;  %v2451_v34 = vadd.f32 %v5878_v53, %v2450_v30 }
 0x312   :  { %v2705_v0 = vadd.f32 %v2704_v14, %v2416_v28  ;;  %v4121_v12 = vpop.f32.mrb[26].mxu0 }
 0x313   :  { %v2716_v33 = vadd.f32 %v4121_v12, %v2427_v23  ;;  %v2707_v44 = vpop.f32.mrb[27].mxu0  ;;  %v2913_v62 = vmax.f32 %v2713_v19, 0.0 }
 0x314   :  { %v2911_v55 = vmax.f32 %v2705_v0, 0.0  ;;  %v2708_v7 = vadd.f32 %v2707_v44, %v2419_v41  ;;  %4208 = vmatmul.mubr.msk.f32.gmra.mrb[6].mxu1 %vm2969_vm2, %v2910_v21 }
 0x315   :  { %v2914_v10 = vmax.f32 %v2716_v33, 0.0 }
 0x316   :  { %v2912_v9 = vmax.f32 %v2708_v7, 0.0  ;;  %v2455_v17 = vpop.f32.mrb[172].mxu1  ;;  %4210 = vmatprep.mubr.msk.f32.mxu1 %vm2969_vm2, %v2911_v55 }
 0x317   :  { %v2457_v58 = vpop.f32.mrb[173].mxu1  ;;  %v2456_v25 = vadd.f32 %v5878_v53, %v2455_v17 }
 0x318   :  { %v2458_v20 = vpop.f32.mrb[174].mxu1  ;;  %v4124_v38 = vpop.f32.mrb[28].mxu0  ;;  %4211 = vmatmul.mubr.msk.f32.gmra.mrb[8].mxu1 %vm2969_vm2, %v2912_v9 }
 0x319   :  { %v2729_v26 = vadd.f32 %v4124_v38, %v2440_v42  ;;  %v2460_v16 = vpop.f32.mrb[175].mxu1  ;;  %v2720_v50 = vpop.f32.mrb[29].mxu0  ;;  %4213 = vmatprep.mubr.msk.f32.mxu1 %vm2969_vm2, %v2913_v62  ;;  %v2459_v49 = vadd.f32 %v5878_v53, %v2458_v20 }
 0x31a   :  { %v2721_v37 = vadd.f32 %v2720_v50, %v2432_v46  ;;  %v4125_v54 = vpop.f32.mrb[30].mxu0 }
 0x31b   :  { %v2732_v4 = vadd.f32 %v4125_v54, %v2443_v1  ;;  %v2723_v39 = vpop.f32.mrb[31].mxu0  ;;  %v2917_v29 = vmax.f32 %v2729_v26, 0.0  ;;  %v3675_v54 = vld [vmem:[#allocation2] sm:$0x1] }
 0x31c   :  { %v2915_v43 = vmax.f32 %v2721_v37, 0.0  ;;  %v2724_v48 = vadd.f32 %v2723_v39, %v2435_v15  ;;  %4214 = vmatmul.mubr.msk.f32.gmra.mrb[10].mxu1 %vm2969_vm2, %v2914_v10  ;;  %3678 = vperm.xlu1 %4337, %v3675_v54  }
 0x31d   :  { %v2918_v18 = vmax.f32 %v2732_v4, 0.0 }
 0x31e   :  { %v2916_v59 = vmax.f32 %v2724_v48, 0.0  ;;  %v2463_v13 = vpop.f32.mrb[176].mxu1  ;;  %4216 = vmatprep.mubr.msk.f32.mxu1 %vm2969_vm2, %v2915_v43 }
 0x31f   :  { %v2465_v8 = vpop.f32.mrb[177].mxu1  ;;  %v2464_v21 = vadd.f32 %v5878_v53, %v2463_v13 }
 0x320   :  { %v2466_v6 = vpop.f32.mrb[178].mxu1  ;;  %4217 = vmatmul.mubr.msk.f32.gmra.mrb[12].mxu1 %vm2969_vm2, %v2916_v59 }
 0x321   :  { %v2468_v31 = vpop.f32.mrb[179].mxu1  ;;  %4219 = vmatprep.mubr.msk.f32.mxu1 %vm2969_vm2, %v2917_v29  ;;  %v2467_v55 = vadd.f32 %v5878_v53, %v2466_v6 }
 0x324   :  { %v4128_v2 = vpop.f32.mrb[32].mxu0  ;;  %4220 = vmatmul.mubr.msk.f32.gmra.mrb[14].mxu1 %vm2969_vm2, %v2918_v18 }
 0x325   :  { %v2745_v45 = vadd.f32 %v4128_v2, %v2456_v25  ;;  %v2736_v57 = vpop.f32.mrb[33].mxu0 }
 0x326   :  { %v2737_v11 = vadd.f32 %v2736_v57, %v2448_v47  ;;  %v2471_v61 = vpop.f32.mrb[180].mxu1  ;;  %v4129_v22 = vpop.f32.mrb[34].mxu0 }
 0x327   :  { %v2748_v27 = vadd.f32 %v4129_v22, %v2459_v49  ;;  %v2473_v40 = vpop.f32.mrb[181].mxu1  ;;  %v2739_v63 = vpop.f32.mrb[35].mxu0  ;;  %v2921_v32 = vmax.f32 %v2745_v45, 0.0  ;;  %v2472_v41 = vadd.f32 %v5878_v53, %v2471_v61 }
 0x328   :  { %v2919_v60 = vmax.f32 %v2737_v11, 0.0  ;;  %v2740_v36 = vadd.f32 %v2739_v63, %v2451_v34  ;;  %v2474_v35 = vpop.f32.mrb[182].mxu1 }
 0x329   :  { %v2476_v28 = vpop.f32.mrb[183].mxu1  ;;  %v2922_v23 = vmax.f32 %v2748_v27, 0.0  ;;  %v2475_v12 = vadd.f32 %v5878_v53, %v2474_v35 }
 0x32a   :  { %v2920_v5 = vmax.f32 %v2740_v36, 0.0  ;;  %4222 = vmatprep.mubr.msk.f32.mxu1 %vm2969_vm2, %v2919_v60 }
 0x32c   :  { %4223 = vmatmul.mubr.msk.f32.gmra.mrb[16].mxu1 %vm2969_vm2, %v2920_v5 }
 0x32d   :  { %4225 = vmatprep.mubr.msk.f32.mxu1 %vm2969_vm2, %v2921_v32 }
 0x32e   :  { %v2479_v30 = vpop.f32.mrb[184].mxu1 }
 0x32f   :  { %v2481_v19 = vpop.f32.mrb[185].mxu1  ;;  %v2480_v43 = vadd.f32 %v5878_v53, %v2479_v30 }
 0x330   :  { %v2482_v24 = vpop.f32.mrb[186].mxu1  ;;  %4226 = vmatmul.mubr.msk.f32.gmra.mrb[18].mxu1 %vm2969_vm2, %v2922_v23 }
 0x331   :  { %v2484_v14 = vpop.f32.mrb[187].mxu1  ;;  %v2483_v8 = vadd.f32 %v5878_v53, %v2482_v24 }
 0x334   :  { %v4132_v0 = vpop.f32.mrb[36].mxu0 }
 0x335   :  { %v2761_v33 = vadd.f32 %v4132_v0, %v2472_v41  ;;  %v2752_v44 = vpop.f32.mrb[37].mxu0 }
 0x336   :  { %v2753_v7 = vadd.f32 %v2752_v44, %v2464_v21  ;;  %v2487_v9 = vpop.f32.mrb[188].mxu1  ;;  %v4133_v17 = vpop.f32.mrb[38].mxu0 }
 0x337   :  { %v2764_v42 = vadd.f32 %v4133_v17, %v2475_v12  ;;  %v2489_v62 = vpop.f32.mrb[189].mxu1  ;;  %v2755_v58 = vpop.f32.mrb[39].mxu0  ;;  %v2925_v16 = vmax.f32 %v2761_v33, 0.0  ;;  %v2488_v39 = vadd.f32 %v5878_v53, %v2487_v9 }
 0x338   :  { %v2923_v46 = vmax.f32 %v2753_v7, 0.0  ;;  %v2756_v20 = vadd.f32 %v2755_v58, %v2467_v55  ;;  %v2490_v38 = vpop.f32.mrb[190].mxu1 }
 0x339   :  { %v2492_v1 = vpop.f32.mrb[191].mxu1  ;;  %v2926_v50 = vmax.f32 %v2764_v42, 0.0  ;;  %v2491_v59 = vadd.f32 %v5878_v53, %v2490_v38 }
 0x33a   :  { %v2924_v26 = vmax.f32 %v2756_v20, 0.0  ;;  %4228 = vmatprep.mubr.msk.f32.mxu1 %vm2969_vm2, %v2923_v46 }
 0x33c   :  { %4229 = vmatmul.mubr.msk.f32.gmra.mrb[20].mxu1 %vm2969_vm2, %v2924_v26 }
 0x33d   :  { %4231 = vmatprep.mubr.msk.f32.mxu1 %vm2969_vm2, %v2925_v16 }
 0x33e   :  { %v2495_v15 = vpop.f32.mrb[192].mxu1 }
 0x33f   :  { %v2497_v10 = vpop.f32.mrb[193].mxu1  ;;  %v2496_v35 = vadd.f32 %v5878_v53, %v2495_v15 }
 0x340   :  { %v2498_v37 = vpop.f32.mrb[194].mxu1  ;;  %4232 = vmatmul.mubr.msk.f32.gmra.mrb[22].mxu1 %vm2969_vm2, %v2926_v50 }
 0x341   :  { %v2500_v4 = vpop.f32.mrb[195].mxu1  ;;  %v2499_v30 = vadd.f32 %v5878_v53, %v2498_v37 }
 0x344   :  { %v4136_v48 = vpop.f32.mrb[40].mxu0 }
 0x345   :  { %v2777_v13 = vadd.f32 %v4136_v48, %v2488_v39  ;;  %v2768_v29 = vpop.f32.mrb[41].mxu0 }
 0x346   :  { %v2769_v6 = vadd.f32 %v2768_v29, %v2480_v43  ;;  %v2503_v31 = vpop.f32.mrb[196].mxu1  ;;  %v4137_v18 = vpop.f32.mrb[42].mxu0 }
 0x347   :  { %v2780_v25 = vadd.f32 %v4137_v18, %v2491_v59  ;;  %v2505_v47 = vpop.f32.mrb[197].mxu1  ;;  %v2771_v2 = vpop.f32.mrb[43].mxu0  ;;  %v2929_v61 = vmax.f32 %v2777_v13, 0.0  ;;  %v2504_v36 = vadd.f32 %v5878_v53, %v2503_v31 }
 0x348   :  { %v2927_v49 = vmax.f32 %v2769_v6, 0.0  ;;  %v2772_v45 = vadd.f32 %v2771_v2, %v2483_v8  ;;  %v2506_v57 = vpop.f32.mrb[198].mxu1 }
 0x349   :  { %v2508_v34 = vpop.f32.mrb[199].mxu1  ;;  %v2930_v22 = vmax.f32 %v2780_v25, 0.0  ;;  %v2507_v5 = vadd.f32 %v5878_v53, %v2506_v57 }
 0x34a   :  { %v2928_v11 = vmax.f32 %v2772_v45, 0.0  ;;  %4234 = vmatprep.mubr.msk.f32.mxu1 %vm2969_vm2, %v2927_v49 }
 0x34c   :  { %4235 = vmatmul.mubr.msk.f32.gmra.mrb[24].mxu1 %vm2969_vm2, %v2928_v11 }
 0x34d   :  { %4237 = vmatprep.mubr.msk.f32.mxu1 %vm2969_vm2, %v2929_v61 }
 0x34e   :  { %v2511_v27 = vpop.f32.mrb[200].mxu1 }
 0x34f   :  { %v2513_v40 = vpop.f32.mrb[201].mxu1  ;;  %v2512_v38 = vadd.f32 %v5878_v53, %v2511_v27 }
 0x350   :  { %v2514_v63 = vpop.f32.mrb[202].mxu1  ;;  %4238 = vmatmul.mubr.msk.f32.gmra.mrb[26].mxu1 %vm2969_vm2, %v2930_v22 }
 0x351   :  { %v2516_v60 = vpop.f32.mrb[203].mxu1  ;;  %v2515_v15 = vadd.f32 %v5878_v53, %v2514_v63 }
 0x354   :  { %v4140_v28 = vpop.f32.mrb[44].mxu0 }
 0x355   :  { %v2793_v32 = vadd.f32 %v4140_v28, %v2504_v36  ;;  %v2784_v23 = vpop.f32.mrb[45].mxu0 }
 0x356   :  { %v2785_v19 = vadd.f32 %v2784_v23, %v2496_v35  ;;  %v2519_v24 = vpop.f32.mrb[204].mxu1  ;;  %v4141_v14 = vpop.f32.mrb[46].mxu0 }
 0x357   :  { %v2796_v41 = vadd.f32 %v4141_v14, %v2507_v5  ;;  %v2521_v21 = vpop.f32.mrb[205].mxu1  ;;  %v2787_v0 = vpop.f32.mrb[47].mxu0  ;;  %v2933_v9 = vmax.f32 %v2793_v32, 0.0  ;;  %v2520_v20 = vadd.f32 %v5878_v53, %v2519_v24 }
 0x358   :  { %v2931_v12 = vmax.f32 %v2785_v19, 0.0  ;;  %v2788_v33 = vadd.f32 %v2787_v0, %v2499_v30  ;;  %v2522_v44 = vpop.f32.mrb[206].mxu1 }
 0x359   :  { %v2524_v55 = vpop.f32.mrb[207].mxu1  ;;  %v2934_v17 = vmax.f32 %v2796_v41, 0.0  ;;  %v2523_v26 = vadd.f32 %v5878_v53, %v2522_v44 }
 0x35a   :  { %v2932_v7 = vmax.f32 %v2788_v33, 0.0  ;;  %4240 = vmatprep.mubr.msk.f32.mxu1 %vm2969_vm2, %v2931_v12 }
 0x35c   :  { %4241 = vmatmul.mubr.msk.f32.gmra.mrb[28].mxu1 %vm2969_vm2, %v2932_v7 }
 0x35d   :  { %4243 = vmatprep.mubr.msk.f32.mxu1 %vm2969_vm2, %v2933_v9 }
 0x35e   :  { %v2527_v42 = vpop.f32.mrb[208].mxu1 }
 0x35f   :  { %v2529_v62 = vpop.f32.mrb[209].mxu1  ;;  %v2528_v45 = vadd.f32 %v5878_v53, %v2527_v42 }
 0x360   :  { %v2530_v58 = vpop.f32.mrb[210].mxu1  ;;  %4244 = vmatmul.mubr.msk.f32.gmra.mrb[30].mxu1 %vm2969_vm2, %v2934_v17 }
 0x361   :  { %v2532_v46 = vpop.f32.mrb[211].mxu1  ;;  %v2531_v22 = vadd.f32 %v5878_v53, %v2530_v58 }
 0x364   :  { %v4144_v1 = vpop.f32.mrb[48].mxu0 }
 0x365   :  { %v2809_v16 = vadd.f32 %v4144_v1, %v2520_v20  ;;  %v2800_v50 = vpop.f32.mrb[49].mxu0 }
 0x366   :  { %v2801_v10 = vadd.f32 %v2800_v50, %v2512_v38  ;;  %v2535_v37 = vpop.f32.mrb[212].mxu1  ;;  %v4145_v54 = vpop.f32.mrb[50].mxu0 }
 0x367   :  { %v2812_v4 = vadd.f32 %v4145_v54, %v2523_v26  ;;  %v2537_v39 = vpop.f32.mrb[213].mxu1  ;;  %v2803_v43 = vpop.f32.mrb[51].mxu0  ;;  %v2937_v6 = vmax.f32 %v2809_v16, 0.0  ;;  %v2536_v49 = vadd.f32 %v5878_v53, %v2535_v37 }
 0x368   :  { %v2935_v48 = vmax.f32 %v2801_v10, 0.0  ;;  %v2804_v59 = vadd.f32 %v2803_v43, %v2515_v15  ;;  %v2538_v13 = vpop.f32.mrb[214].mxu1 }
 0x369   :  { %v2540_v29 = vpop.f32.mrb[215].mxu1  ;;  %v2938_v31 = vmax.f32 %v2812_v4, 0.0  ;;  %v2539_v34 = vadd.f32 %v5878_v53, %v2538_v13 }
 0x36a   :  { %v2936_v8 = vmax.f32 %v2804_v59, 0.0  ;;  %4246 = vmatprep.mubr.msk.f32.mxu1 %vm2969_vm2, %v2935_v48 }
 0x36c   :  { %4247 = vmatmul.mubr.msk.f32.gmra.mrb[32].mxu1 %vm2969_vm2, %v2936_v8 }
 0x36d   :  { %4249 = vmatprep.mubr.msk.f32.mxu1 %vm2969_vm2, %v2937_v6 }
 0x36e   :  { %v2543_v18 = vpop.f32.mrb[216].mxu1 }
 0x36f   :  { %v2545_v25 = vpop.f32.mrb[217].mxu1  ;;  %v2544_v33 = vadd.f32 %v5878_v53, %v2543_v18 }
 0x370   :  { %v2546_v47 = vpop.f32.mrb[218].mxu1  ;;  %4250 = vmatmul.mubr.msk.f32.gmra.mrb[34].mxu1 %vm2969_vm2, %v2938_v31 }
 0x371   :  { %v2548_v2 = vpop.f32.mrb[219].mxu1  ;;  %v2547_v17 = vadd.f32 %v5878_v53, %v2546_v47 }
 0x374   :  { %v4148_v57 = vpop.f32.mrb[52].mxu0 }
 0x375   :  { %v2825_v11 = vadd.f32 %v4148_v57, %v2536_v49  ;;  %v2816_v61 = vpop.f32.mrb[53].mxu0 }
 0x376   :  { %v2817_v27 = vadd.f32 %v2816_v61, %v2528_v45  ;;  %v2551_v40 = vpop.f32.mrb[220].mxu1  ;;  %v4149_v63 = vpop.f32.mrb[54].mxu0 }
 0x377   :  { %v2828_v60 = vadd.f32 %v4149_v63, %v2539_v34  ;;  %v2553_v36 = vpop.f32.mrb[221].mxu1  ;;  %v2819_v35 = vpop.f32.mrb[55].mxu0  ;;  %v2941_v19 = vmax.f32 %v2825_v11, 0.0  ;;  %v2552_v12 = vadd.f32 %v5878_v53, %v2551_v40 }
 0x378   :  { %v2939_v28 = vmax.f32 %v2817_v27, 0.0  ;;  %v2820_v5 = vadd.f32 %v2819_v35, %v2531_v22  ;;  %v2554_v32 = vpop.f32.mrb[222].mxu1 }
 0x379   :  { %v2556_v23 = vpop.f32.mrb[223].mxu1  ;;  %v2942_v24 = vmax.f32 %v2828_v60, 0.0  ;;  %v2555_v55 = vadd.f32 %v5878_v53, %v2554_v32 }
 0x37a   :  { %v2940_v30 = vmax.f32 %v2820_v5, 0.0  ;;  %4252 = vmatprep.mubr.msk.f32.mxu1 %vm2969_vm2, %v2939_v28 }
 0x37c   :  { %4253 = vmatmul.mubr.msk.f32.gmra.mrb[36].mxu1 %vm2969_vm2, %v2940_v30 }
 0x37d   :  { %4255 = vmatprep.mubr.msk.f32.mxu1 %vm2969_vm2, %v2941_v19 }
 0x37e   :  { %v2559_v14 = vpop.f32.mrb[224].mxu1 }
 0x37f   :  { %v2561_v41 = vpop.f32.mrb[225].mxu1  ;;  %v2560_v59 = vadd.f32 %v5878_v53, %v2559_v14 }
 0x380   :  { %v2562_v21 = vpop.f32.mrb[226].mxu1  ;;  %4256 = vmatmul.mubr.msk.f32.gmra.mrb[38].mxu1 %vm2969_vm2, %v2942_v24 }
 0x381   :  { %v2564_v0 = vpop.f32.mrb[227].mxu1  ;;  %v2563_v31 = vadd.f32 %v5878_v53, %v2562_v21 }
 0x384   :  { %v4152_v44 = vpop.f32.mrb[56].mxu0 }
 0x385   :  { %v2841_v7 = vadd.f32 %v4152_v44, %v2552_v12  ;;  %v2832_v9 = vpop.f32.mrb[57].mxu0 }
 0x386   :  { %v2833_v42 = vadd.f32 %v2832_v9, %v2544_v33  ;;  %v2567_v62 = vpop.f32.mrb[228].mxu1  ;;  %v4153_v58 = vpop.f32.mrb[58].mxu0 }
 0x387   :  { %v2844_v46 = vadd.f32 %v4153_v58, %v2555_v55  ;;  %v2569_v20 = vpop.f32.mrb[229].mxu1  ;;  %v2835_v38 = vpop.f32.mrb[59].mxu0  ;;  %v2945_v10 = vmax.f32 %v2841_v7, 0.0  ;;  %v2568_v48 = vadd.f32 %v5878_v53, %v2567_v62 }
 0x388   :  { %v2943_v1 = vmax.f32 %v2833_v42, 0.0  ;;  %v2836_v26 = vadd.f32 %v2835_v38, %v2547_v17  ;;  %v2570_v16 = vpop.f32.mrb[230].mxu1 }
 0x389   :  { %v2572_v50 = vpop.f32.mrb[231].mxu1  ;;  %v2946_v37 = vmax.f32 %v2844_v46, 0.0  ;;  %v2571_v29 = vadd.f32 %v5878_v53, %v2570_v16 }
 0x38a   :  { %v2944_v15 = vmax.f32 %v2836_v26, 0.0  ;;  %4258 = vmatprep.mubr.msk.f32.mxu1 %vm2969_vm2, %v2943_v1 }
 0x38c   :  { %4259 = vmatmul.mubr.msk.f32.gmra.mrb[40].mxu1 %vm2969_vm2, %v2944_v15 }
 0x38d   :  { %4261 = vmatprep.mubr.msk.f32.mxu1 %vm2969_vm2, %v2945_v10 }
 0x38e   :  { %v2575_v54 = vpop.f32.mrb[232].mxu1 }
 0x38f   :  { %v2577_v4 = vpop.f32.mrb[233].mxu1  ;;  %v2576_v5 = vadd.f32 %v5878_v53, %v2575_v54 }
 0x390   :  { %v2578_v39 = vpop.f32.mrb[234].mxu1  ;;  %4262 = vmatmul.mubr.msk.f32.gmra.mrb[42].mxu1 %vm2969_vm2, %v2946_v37 }
 0x391   :  { %v2580_v43 = vpop.f32.mrb[235].mxu1  ;;  %v2579_v24 = vadd.f32 %v5878_v53, %v2578_v39 }
 0x394   :  { %v4156_v13 = vpop.f32.mrb[60].mxu0 }
 0x395   :  { %v2857_v8 = vadd.f32 %v4156_v13, %v2568_v48  ;;  %v2848_v6 = vpop.f32.mrb[61].mxu0 }
 0x396   :  { %v2849_v18 = vadd.f32 %v2848_v6, %v2560_v59  ;;  %v2583_v25 = vpop.f32.mrb[236].mxu1  ;;  %v4157_v47 = vpop.f32.mrb[62].mxu0 }
 0x397   :  { %v2860_v2 = vadd.f32 %v4157_v47, %v2571_v29  ;;  %v2585_v49 = vpop.f32.mrb[237].mxu1  ;;  %v2851_v45 = vpop.f32.mrb[63].mxu0  ;;  %v2949_v27 = vmax.f32 %v2857_v8, 0.0  ;;  %v2584_v28 = vadd.f32 %v5878_v53, %v2583_v25 }
 0x398   :  { %v2947_v57 = vmax.f32 %v2849_v18, 0.0  ;;  %v2852_v34 = vadd.f32 %v2851_v45, %v2563_v31  ;;  %v2586_v11 = vpop.f32.mrb[238].mxu1 }
 0x399   :  { %v2588_v61 = vpop.f32.mrb[239].mxu1  ;;  %v2950_v40 = vmax.f32 %v2860_v2, 0.0  ;;  %v2587_v23 = vadd.f32 %v5878_v53, %v2586_v11 }
 0x39a   :  { %v2948_v22 = vmax.f32 %v2852_v34, 0.0  ;;  %4264 = vmatprep.mubr.msk.f32.mxu1 %vm2969_vm2, %v2947_v57 }
 0x39c   :  { %4265 = vmatmul.mubr.msk.f32.gmra.mrb[44].mxu1 %vm2969_vm2, %v2948_v22 }
 0x39d   :  { %4267 = vmatprep.mubr.msk.f32.mxu1 %vm2969_vm2, %v2949_v27 }
 0x39e   :  { %v2591_v63 = vpop.f32.mrb[240].mxu1 }
 0x39f   :  { %v2593_v60 = vpop.f32.mrb[241].mxu1  ;;  %v2592_v46 = vadd.f32 %v5878_v53, %v2591_v63 }
 0x3a0   :  { %v2594_v36 = vpop.f32.mrb[242].mxu1  ;;  %4268 = vmatmul.mubr.msk.f32.gmra.mrb[46].mxu1 %vm2969_vm2, %v2950_v40 }
 0x3a1   :  { %v2596_v35 = vpop.f32.mrb[243].mxu1  ;;  %v2595_v16 = vadd.f32 %v5878_v53, %v2594_v36 }
 0x3a4   :  { %v4160_v32 = vpop.f32.mrb[64].mxu0 }
 0x3a5   :  { %v2873_v30 = vadd.f32 %v4160_v32, %v2584_v28  ;;  %v2864_v19 = vpop.f32.mrb[65].mxu0 }
 0x3a6   :  { %v2865_v14 = vadd.f32 %v2864_v19, %v2576_v5  ;;  %v2599_v41 = vpop.f32.mrb[244].mxu1  ;;  %v4161_v21 = vpop.f32.mrb[66].mxu0 }
 0x3a7   :  { %v2876_v0 = vadd.f32 %v4161_v21, %v2587_v23  ;;  %v2601_v12 = vpop.f32.mrb[245].mxu1  ;;  %v2867_v33 = vpop.f32.mrb[67].mxu0  ;;  %v2953_v42 = vmax.f32 %v2873_v30, 0.0  ;;  %v2600_v58 = vadd.f32 %v5878_v53, %v2599_v41 }
 0x3a8   :  { %v2951_v44 = vmax.f32 %v2865_v14, 0.0  ;;  %v2868_v55 = vadd.f32 %v2867_v33, %v2579_v24  ;;  %v2602_v7 = vpop.f32.mrb[246].mxu1 }
 0x3a9   :  { %v2604_v9 = vpop.f32.mrb[247].mxu1  ;;  %v2954_v62 = vmax.f32 %v2876_v0, 0.0  ;;  %v2603_v38 = vadd.f32 %v5878_v53, %v2602_v7 }
 0x3aa   :  { %v2952_v17 = vmax.f32 %v2868_v55, 0.0  ;;  %4270 = vmatprep.mubr.msk.f32.mxu1 %vm2969_vm2, %v2951_v44 }
 0x3ac   :  { %4271 = vmatmul.mubr.msk.f32.gmra.mrb[48].mxu1 %vm2969_vm2, %v2952_v17 }
 0x3ad   :  { %4273 = vmatprep.mubr.msk.f32.mxu1 %vm2969_vm2, %v2953_v42 }
 0x3b0   :  { %4274 = vmatmul.mubr.msk.f32.gmra.mrb[50].mxu1 %vm2969_vm2, %v2954_v62 }
 0x3b4   :  { %v4164_v20 = vpop.f32.mrb[68].mxu0 }
 0x3b5   :  { %v2889_v1 = vadd.f32 %v4164_v20, %v2600_v58  ;;  %v2880_v26 = vpop.f32.mrb[69].mxu0 }
 0x3b6   :  { %v2881_v50 = vadd.f32 %v2880_v26, %v2592_v46  ;;  %v4165_v15 = vpop.f32.mrb[70].mxu0 }
 0x3b7   :  { %v2892_v10 = vadd.f32 %v4165_v15, %v2603_v38  ;;  %v2883_v37 = vpop.f32.mrb[71].mxu0  ;;  %v2957_v43 = vmax.f32 %v2889_v1, 0.0 }
 0x3b8   :  { %v2955_v54 = vmax.f32 %v2881_v50, 0.0  ;;  %v2884_v4 = vadd.f32 %v2883_v37, %v2595_v16 }
 0x3b9   :  { %v2958_v48 = vmax.f32 %v2892_v10, 0.0 }
 0x3ba   :  { %v2956_v39 = vmax.f32 %v2884_v4, 0.0  ;;  %4276 = vmatprep.mubr.msk.f32.mxu1 %vm2969_vm2, %v2955_v54 }
 0x3bc   :  { %4277 = vmatmul.mubr.msk.f32.gmra.mrb[52].mxu1 %vm2969_vm2, %v2956_v39 }
 0x3bd   :  { %4279 = vmatprep.mubr.msk.f32.mxu1 %vm2969_vm2, %v2957_v43 }
 0x3c0   :  { %4280 = vmatmul.mubr.msk.f32.gmra.mrb[54].mxu1 %vm2969_vm2, %v2958_v48 }
 0x3cb   :  { %v4188_v59 = vpop.f32.mrb[248].mxu1 }
 0x3cc   :  { %v3228_v13 = vpop.f32.mrb[249].mxu1 }
 0x3cd   :  { %3547 = vxpose.xlu0.b32.start [1/16] (narrow) %v3228_v13, 8 }
 0x3cf   :  { %v4191_v53 = vpop.f32.mrb[250].mxu1 }
 0x3d0   :  { %v3238_v29 = vpop.f32.mrb[251].mxu1 }
 0x3d1   :  { %3548 = vxpose.xlu0.b32.cont [2/16] (narrow) %v4188_v59, 8 }
 0x3d3   :  { %v4194_v8 = vpop.f32.mrb[252].mxu1 }
 0x3d4   :  { %v3248_v6 = vpop.f32.mrb[253].mxu1 }
 0x3d5   :  { %3549 = vxpose.xlu0.b32.cont [3/16] (narrow) %v3238_v29, 8 }
 0x3d7   :  { %v4197_v31 = vpop.f32.mrb[254].mxu1 }
 0x3d8   :  { %v3258_v18 = vpop.f32.mrb[255].mxu1 }
 0x3d9   :  { %3550 = vxpose.xlu0.b32.cont [4/16] (narrow) %v4191_v53, 8 }
 0x3db   :  { %v4200_v25 = vpop.f32.mrb[0].mxu1 }
 0x3dc   :  { %v3268_v47 = vpop.f32.mrb[1].mxu1 }
 0x3dd   :  { %3551 = vxpose.xlu0.b32.cont [5/16] (narrow) %v3248_v6, 8 }
 0x3df   :  { %v4203_v2 = vpop.f32.mrb[2].mxu1 }
 0x3e0   :  { %v3278_v49 = vpop.f32.mrb[3].mxu1 }
 0x3e1   :  { %3552 = vxpose.xlu0.b32.cont [6/16] (narrow) %v4194_v8, 8  ;;  %v3679_v8 = vpop.permute.xlu1 %3678 }
 0x3e2   :  { %v3684_v6 = vrot.slane %v3679_v8, %v4819_v56 }
 0x3e3   :  { %v4206_v45 = vpop.f32.mrb[4].mxu1 }
 0x3e4   :  { %v3288_v57 = vpop.f32.mrb[5].mxu1 }
 0x3e5   :  { %3553 = vxpose.xlu0.b32.cont [7/16] (narrow) %v3258_v18, 8 }
 0x3e7   :  { %v4209_v34 = vpop.f32.mrb[6].mxu1 }
 0x3e8   :  { %v3298_v11 = vpop.f32.mrb[7].mxu1 }
 0x3e9   :  { %3554 = vxpose.xlu0.b32.cont [8/16] (narrow) %v4197_v31, 8  ;;  %v4430_v31 = vmov 1966171168  }
 0x3ea   :  { %v3696_v18 = vunpack.c.l.s4 %v4430_v31 }
 0x3eb   :  { %v4212_v61 = vpop.f32.mrb[8].mxu1 }
 0x3ec   :  { %v3308_v22 = vpop.f32.mrb[9].mxu1 }
 0x3ed   :  { %3555 = vxpose.xlu0.b32.cont [9/16] (narrow) %v3268_v47, 8  ;;  %3579 = vxpose.xlu1.b32.start [1/16] (narrow) %v3308_v22, 8 }
 0x3ef   :  { %v4215_v27 = vpop.f32.mrb[10].mxu1 }
 0x3f0   :  { %v3318_v40 = vpop.f32.mrb[11].mxu1 }
 0x3f1   :  { %3556 = vxpose.xlu0.b32.cont [10/16] (narrow) %v4200_v25, 8  ;;  %3580 = vxpose.xlu1.b32.cont [2/16] (narrow) %v4212_v61, 8 }
 0x3f3   :  { %v4218_v63 = vpop.f32.mrb[12].mxu1 }
 0x3f4   :  { %v3328_v60 = vpop.f32.mrb[13].mxu1 }
 0x3f5   :  { %3557 = vxpose.xlu0.b32.cont [11/16] (narrow) %v3278_v49, 8  ;;  %3581 = vxpose.xlu1.b32.cont [3/16] (narrow) %v3318_v40, 8  ;;  %v3697_v49 = vunpack.c.0.s8 %v3696_v18 }
 0x3f7   :  { %v4221_v36 = vpop.f32.mrb[14].mxu1 }
 0x3f8   :  { %v3338_v35 = vpop.f32.mrb[15].mxu1 }
 0x3f9   :  { %3558 = vxpose.xlu0.b32.cont [12/16] (narrow) %v4203_v2, 8  ;;  %3582 = vxpose.xlu1.b32.cont [4/16] (narrow) %v4215_v27, 8 }
 0x3fd   :  { %3559 = vxpose.xlu0.b32.cont [13/16] (narrow) %v3288_v57, 8  ;;  %3583 = vxpose.xlu1.b32.cont [5/16] (narrow) %v3328_v60, 8 }
 0x3ff   :  { %v4224_v28 = vpop.f32.mrb[16].mxu1 }
 0x400   :  { %v3348_v5 = vpop.f32.mrb[17].mxu1 }
 0x401   :  { %3560 = vxpose.xlu0.b32.cont [14/16] (narrow) %v4206_v45, 8  ;;  %3584 = vxpose.xlu1.b32.cont [6/16] (narrow) %v4218_v63, 8 }
 0x403   :  { %v4227_v32 = vpop.f32.mrb[18].mxu1 }
 0x404   :  { %v3358_v23 = vpop.f32.mrb[19].mxu1 }
 0x405   :  { %3561 = vxpose.xlu0.b32.cont [15/16] (narrow) %v3298_v11, 8  ;;  %3585 = vxpose.xlu1.b32.cont [7/16] (narrow) %v3338_v35, 8 }
 0x409   :  { %3562 = vxpose.xlu0.b32.end [16/16] (narrow) %v4209_v34, 8  ;;  %3586 = vxpose.xlu1.b32.cont [8/16] (narrow) %v4221_v36, 8  ;;  %v3700_v34 = vsub.s32 %v3697_v49, %v4809_v52 }
 0x40d   :  { %3587 = vxpose.xlu1.b32.cont [9/16] (narrow) %v3348_v5, 8 }
 0x40f   :  { %v4230_v30 = vpop.f32.mrb[20].mxu1 }
 0x410   :  { %v3368_v19 = vpop.f32.mrb[21].mxu1 }
 0x411   :  { %3588 = vxpose.xlu1.b32.cont [10/16] (narrow) %v4224_v28, 8 }
 0x413   :  { %v4233_v24 = vpop.f32.mrb[22].mxu1 }
 0x414   :  { %v3378_v14 = vpop.f32.mrb[23].mxu1 }
 0x415   :  { %3589 = vxpose.xlu1.b32.cont [11/16] (narrow) %v3358_v23, 8 }
 0x419   :  { %3590 = vxpose.xlu1.b32.cont [12/16] (narrow) %v4227_v32, 8 }
 0x41d   :  { %3591 = vxpose.xlu1.b32.cont [13/16] (narrow) %v3368_v19, 8 }
 0x41f   :  { %v4236_v41 = vpop.f32.mrb[24].mxu1 }
 0x420   :  { %v3388_v21 = vpop.f32.mrb[25].mxu1 }
 0x421   :  { %3592 = vxpose.xlu1.b32.cont [14/16] (narrow) %v4230_v30, 8  ;;  %3611 = vxpose.xlu0.b32.start [1/16] (narrow) %v3388_v21, 8 }
 0x423   :  { %v4239_v0 = vpop.f32.mrb[26].mxu1 }
 0x424   :  { %v3398_v12 = vpop.f32.mrb[27].mxu1 }
 0x425   :  { %3593 = vxpose.xlu1.b32.cont [15/16] (narrow) %v3378_v14, 8  ;;  %3612 = vxpose.xlu0.b32.cont [2/16] (narrow) %v4236_v41, 8 }
 0x429   :  { %3594 = vxpose.xlu1.b32.end [16/16] (narrow) %v4233_v24, 8  ;;  %3613 = vxpose.xlu0.b32.cont [3/16] (narrow) %v3398_v12, 8 }
 0x42d   :  { %3614 = vxpose.xlu0.b32.cont [4/16] (narrow) %v4239_v0, 8 }
 0x42f   :  { %v4242_v33 = vpop.f32.mrb[28].mxu1 }
 0x430   :  { %v3408_v44 = vpop.f32.mrb[29].mxu1 }
 0x431   :  { %3615 = vxpose.xlu0.b32.cont [5/16] (narrow) %v3408_v44, 8 }
 0x433   :  { %v4245_v55 = vpop.f32.mrb[30].mxu1 }
 0x434   :  { %v3418_v7 = vpop.f32.mrb[31].mxu1 }
 0x435   :  { %3616 = vxpose.xlu0.b32.cont [6/16] (narrow) %v4242_v33, 8 }
 0x439   :  { %3617 = vxpose.xlu0.b32.cont [7/16] (narrow) %v3418_v7, 8 }
 0x43d   :  { %3618 = vxpose.xlu0.b32.cont [8/16] (narrow) %v4245_v55, 8 }
 0x43f   :  { %v4248_v9 = vpop.f32.mrb[32].mxu1 }
 0x440   :  { %v3428_v17 = vpop.f32.mrb[33].mxu1 }
 0x441   :  { %3619 = vxpose.xlu0.b32.cont [9/16] (narrow) %v3428_v17, 8 }
 0x443   :  { %v4251_v42 = vpop.f32.mrb[34].mxu1 }
 0x444   :  { %v3438_v62 = vpop.f32.mrb[35].mxu1 }
 0x445   :  { %3620 = vxpose.xlu0.b32.cont [10/16] (narrow) %v4248_v9, 8 }
 0x449   :  { %3621 = vxpose.xlu0.b32.cont [11/16] (narrow) %v3438_v62, 8 }
 0x44d   :  { %3622 = vxpose.xlu0.b32.cont [12/16] (narrow) %v4251_v42, 8  ;;  %v3563_v25 = vpop.trf.xlu0 }
 0x44e   :  { %v3685_v2 = vadd.f32 %v3684_v6, %v3563_v25 }
 0x44f   :  { %v4254_v58 = vpop.f32.mrb[36].mxu1 }
 0x450   :  { %v3448_v46 = vpop.f32.mrb[37].mxu1 }
 0x451   :  { %3623 = vxpose.xlu0.b32.cont [13/16] (narrow) %v3448_v46, 8 }
 0x453   :  { %v4257_v20 = vpop.f32.mrb[38].mxu1 }
 0x454   :  { %v3458_v38 = vpop.f32.mrb[39].mxu1 }
 0x455   :  { %3624 = vxpose.xlu0.b32.cont [14/16] (narrow) %v4254_v58, 8 }
 0x459   :  { %3625 = vxpose.xlu0.b32.cont [15/16] (narrow) %v3458_v38, 8 }
 0x45d   :  { %3626 = vxpose.xlu0.b32.end [16/16] (narrow) %v4257_v20, 8 }
 0x45f   :  { %v4260_v1 = vpop.f32.mrb[40].mxu1 }
 0x460   :  { %v3468_v26 = vpop.f32.mrb[41].mxu1 }
 0x461   :  { %3643 = vxpose.xlu1.b32.start [1/16] (narrow) %v3468_v26, 8 }
 0x463   :  { %v4263_v16 = vpop.f32.mrb[42].mxu1 }
 0x464   :  { %v3478_v50 = vpop.f32.mrb[43].mxu1 }
 0x465   :  { %3644 = vxpose.xlu1.b32.cont [2/16] (narrow) %v4260_v1, 8 }
 0x469   :  { %3645 = vxpose.xlu1.b32.cont [3/16] (narrow) %v3478_v50, 8 }
 0x46d   :  { %3646 = vxpose.xlu1.b32.cont [4/16] (narrow) %v4263_v16, 8  ;;  %v3595_v47 = vpop.trf.xlu1 }
 0x46f   :  { %v4266_v15 = vpop.f32.mrb[44].mxu1 }
 0x470   :  { %v3488_v10 = vpop.f32.mrb[45].mxu1 }
 0x471   :  { %3647 = vxpose.xlu1.b32.cont [5/16] (narrow) %v3488_v10, 8 }
 0x473   :  { %v4269_v37 = vpop.f32.mrb[46].mxu1 }
 0x474   :  { %v3498_v54 = vpop.f32.mrb[47].mxu1 }
 0x475   :  { %3648 = vxpose.xlu1.b32.cont [6/16] (narrow) %v4266_v15, 8 }
 0x479   :  { %3649 = vxpose.xlu1.b32.cont [7/16] (narrow) %v3498_v54, 8 }
 0x47d   :  { %3650 = vxpose.xlu1.b32.cont [8/16] (narrow) %v4269_v37, 8 }
 0x47f   :  { %v4272_v4 = vpop.f32.mrb[48].mxu1 }
 0x480   :  { %v3508_v39 = vpop.f32.mrb[49].mxu1 }
 0x481   :  { %3651 = vxpose.xlu1.b32.cont [9/16] (narrow) %v3508_v39, 8 }
 0x483   :  { %v4275_v43 = vpop.f32.mrb[50].mxu1 }
 0x484   :  { %v3518_v48 = vpop.f32.mrb[51].mxu1 }
 0x485   :  { %3652 = vxpose.xlu1.b32.cont [10/16] (narrow) %v4272_v4, 8 }
 0x486   :  { %4338 = vset.pattern.permute.xlu0 %v4429_v3  ;;  %v3686_v3 = vadd.f32 %v3684_v6, %v3595_v47 }
 0x488   :  { %v3693_v11 = vcombine.low %v3685_v2, %v3686_v3 }
 0x489   :  { %3653 = vxpose.xlu1.b32.cont [11/16] (narrow) %v3518_v48, 8 }
 0x48a   :  { %v3701_v40 = vrot.slane %v3693_v11, %v3700_v34 }
 0x48d   :  { %3654 = vxpose.xlu1.b32.cont [12/16] (narrow) %v4275_v43, 8 }
 0x48f   :  { %v4278_v59 = vpop.f32.mrb[52].mxu1 }
 0x490   :  { %v3528_v13 = vpop.f32.mrb[53].mxu1 }
 0x491   :  { %3655 = vxpose.xlu1.b32.cont [13/16] (narrow) %v3528_v13, 8 }
 0x493   :  { %v4281_v53 = vpop.f32.mrb[54].mxu1 }
 0x494   :  { %v3538_v29 = vpop.f32.mrb[55].mxu1 }
 0x495   :  { %3656 = vxpose.xlu1.b32.cont [14/16] (narrow) %v4278_v59, 8 }
 0x499   :  { %3657 = vxpose.xlu1.b32.cont [15/16] (narrow) %v3538_v29, 8 }
 0x49d   :  { %3658 = vxpose.xlu1.b32.end [16/16] (narrow) %v4281_v53, 8 }
 0x4a1   :  { %v3627_v45 = vpop.trf.xlu0 }
 0x4a2   :  { %v3687_v61 = vadd.f32 %v3684_v6, %v3627_v45 }
 0x4e1   :  { %v3659_v57 = vpop.trf.xlu1 }
 0x4e2   :  { %v3688_v22 = vadd.f32 %v3684_v6, %v3659_v57 }
 0x4e4   :  { %v3694_v27 = vcombine.low %v3687_v61, %v3688_v22 }
 0x4e6   :  { %v3708_v63 = vrot.slane %v3694_v27, %v3700_v34 }
 0x4e8   :  { %v3709_v56 = vcombine.low %v3701_v40, %v3708_v63 }
 0x4ea   :  { %v3716_v60 = vrot.slane %v3709_v56, %v3700_v34 }
 0x4ec   :  { %3722 = vst.msk [vmem:[#allocation3] sm:$0xf] %vm3720_vm3, %v3716_v60 }
 0x4ed   :  { %4416 = shalt.err (!%p4413_p4)
}
 0x4ee   :  { %s4417_s29 = scalar_lea.hbm %s6063_s9, 64 }
 0x4ef   :  { %p4418_p5 = scmp.ne.s32.totalorder %s6063_s9, %s4417_s29  ;;  %p4421_p6 = scmp.lt.u32.totalorder %s4417_s29, %s6063_s9 }
 0x4f1   :  { %p4423_p7 = pnand %p4421_p6, %p4418_p5 }
 0x4f3   :  { %4426 = shalt.err (!%p4423_p7)
}
 0x4f4   :  { %3732 = dma.vmem_to_hbm [thread:$0]  %s3730_s2, 64, %s6063_s9, [#allocation4]  }
 0x4f5   :  { %4427 = dma.done.wait [#allocation4], 64  }
 0x4f6   :  { %4428 = vsyncadd [#allocation4], 4294967232 }
 0x4f7   :  { %3736 = vsyncpa [#allocation4], 1 }

</bundles_post_ra>
